<compile_context>
chip_gen: v6e
topology: v6e:2x2x1
jax: 0.10.0
libtpu: 0.0.40
codegen_flags: <defaults>
</compile_context>

<pallas_src>
import functools

import jax
import jax.numpy as jnp
from jax.experimental import pallas as pl
from jax.experimental.pallas import tpu as pltpu

ALPHA = 1.0
EPS = 1e-12  # torch.nn.functional.normalize default eps


def _round_up(v, m):
    return ((v + m - 1) // m) * m


def _l2_normalize(v):
    # x / max(||x||_2, eps)  ==  x * rsqrt(max(sum(x^2), eps^2))   (exact torch semantics)
    ss = jnp.sum(v * v, axis=1, keepdims=True)
    return v * jax.lax.rsqrt(jnp.maximum(ss, EPS * EPS))


def _textmlp_kernel(x_ref, w1_ref, b1_ref, w2_ref, b2_ref, o_ref, acc_ref, *, k_chunk):
    # x_ref: (bm, D_in) f32, w1_ref: (D_in, 4096) bf16, b1_ref: (1, 4096) f32
    # w2_ref: (4096, H) bf16, b2_ref: (1, H) f32, o_ref: (bm, H) f32
    # acc_ref: (bm, H) f32 VMEM scratch accumulator.
    x = x_ref[...].astype(jnp.float32)

    # normalize(x, p=2, dim=1) in f32, then cast to bf16 for the MXU.
    xb = _l2_normalize(x).astype(jnp.bfloat16)

    acc_ref[...] = jnp.zeros_like(acc_ref)
    hidden = w1_ref.shape[1]
    n_chunks = hidden // k_chunk

    # Chunk the 4096-wide hidden dim: never materialize the full (bm, 4096) f32 feat.
    for c in range(n_chunks):  # static unroll; slices are static (lane-aligned)
        lo, hi = c * k_chunk, (c + 1) * k_chunk
        f = jnp.dot(xb, w1_ref[:, lo:hi], preferred_element_type=jnp.float32)
        f = jnp.maximum(f + b1_ref[:, lo:hi], 0.0)  # fc1 bias + ReLU
        # TODO(synk): dropout is identity here (inference / eval mode).
        acc_ref[...] += jnp.dot(f.astype(jnp.bfloat16), w2_ref[lo:hi, :],
                                preferred_element_type=jnp.float32)

    hid = acc_ref[...] + b2_ref[...]
    out = jnp.tanh(hid * ALPHA)

    # final normalize(out, p=2, dim=1)
    o_ref[...] = _l2_normalize(out).astype(o_ref.dtype)


@functools.partial(jax.jit, static_argnames=("block_m",))
def textmlp_forward(x, w1_t, b1, w2_t, b2, *, block_m=256):
    """x: (B, D_in); w1_t: (D_in, 4096); b1: (1, 4096); w2_t: (4096, H); b2: (1, H)."""
    B, D_in = x.shape
    H4096 = w1_t.shape[1]
    H = w2_t.shape[1]

    # bf16 weights (f32 accumulation on the MXU); biases stay f32.
    w1_bf = w1_t.astype(jnp.bfloat16)
    w2_bf = w2_t.astype(jnp.bfloat16)
    b1f = b1.astype(jnp.float32).reshape(1, H4096)
    b2f = b2.astype(jnp.float32).reshape(1, H)

    # Batch tile: large by default, clamped for tiny batches, always a multiple of 8.
    bm = min(_round_up(block_m, 8), _round_up(B, 8))
    B_pad = _round_up(B, bm)
    xp = x.astype(jnp.float32)
    if B_pad != B:
        xp = jnp.pad(xp, ((0, B_pad - B), (0, 0)))  # zero rows are harmless; sliced off below

    k_chunk = 512 if H4096 % 512 == 0 else H4096
    grid = (B_pad // bm,)

    # Rough VMEM budget (double-buffered tiles + weights + scratch) with headroom,
    # capped at 48 MiB so it fits comfortably inside v7x's 64 MiB per-core VMEM.
    est_vmem = (
        2 * bm * D_in * 4                      # x tiles (f32, double-buffered)
        + 2 * bm * H * 4                       # out tiles
        + 2 * (D_in * H4096 + H4096 * H) * 2   # bf16 weights (double-buffered)
        + 2 * (H4096 + H) * 4                  # biases
        + bm * H * 4                           # accumulator scratch
        + 2 * bm * k_chunk * 4                 # feat-chunk intermediates / spill room
    )
    vmem_limit = min(48 << 20, max(32 << 20, int(est_vmem * 1.25)))

    cost = pl.CostEstimate(
        flops=2 * B_pad * (D_in * H4096 + H4096 * H),
        transcendentals=B_pad * (H + 2),  # tanh + two rsqrt per row
        bytes_accessed=(B_pad * D_in * 4 + (D_in * H4096 + H4096 * H) * 2
                        + (H4096 + H) * 4 + B_pad * H * 4),
    )

    out = pl.pallas_call(
        functools.partial(_textmlp_kernel, k_chunk=k_chunk),
        out_shape=jax.ShapeDtypeStruct((B_pad, H), jnp.float32),
        grid_spec=pltpu.PrefetchScalarGridSpec(
            num_scalar_prefetch=0,
            grid=grid,
            in_specs=[
                pl.BlockSpec((bm, D_in), lambda i: (i, 0)),     # x tile
                pl.BlockSpec((D_in, H4096), lambda i: (0, 0)),  # W1 (full, constant)
                pl.BlockSpec((1, H4096), lambda i: (0, 0)),     # b1
                pl.BlockSpec((H4096, H), lambda i: (0, 0)),     # W2 (full, constant)
                pl.BlockSpec((1, H), lambda i: (0, 0)),         # b2
            ],
            out_specs=pl.BlockSpec((bm, H), lambda i: (i, 0)),
            scratch_shapes=[pltpu.VMEM((bm, H), jnp.float32)],
        ),
        compiler_params=pltpu.CompilerParams(
            dimension_semantics=("parallel",),  # batch axis shards across v7x's 2 TCs
            vmem_limit_bytes=vmem_limit,
        ),
        cost_estimate=cost,
    )(xp, w1_bf, b1f, w2_bf, b2f)

    return out[:B] if B_pad != B else out


def _reference(x, w1_t, b1, w2_t, b2):
    """Precision-matched JAX reference (bf16 matmul inputs, f32 accumulation)."""
    xn = _l2_normalize(x.astype(jnp.float32)).astype(jnp.bfloat16)
    feat = jnp.maximum(
        jnp.dot(xn, w1_t.astype(jnp.bfloat16), preferred_element_type=jnp.float32)
        + b1.reshape(1, -1), 0.0)
    hid = jnp.dot(feat.astype(jnp.bfloat16), w2_t.astype(jnp.bfloat16),
                  preferred_element_type=jnp.float32) + b2.reshape(1, -1)
    out = jnp.tanh(hid * ALPHA)
    return _l2_normalize(out)


if __name__ == "__main__":
    # Shapes consistent with the module: TextMlp(input_dim=256, hash_lens=128); hidden fixed at 4096.
    INPUT_DIM, HIDDEN, HASH_LENS = 256, 4096, 128

    key = jax.random.PRNGKey(0)
    kx, kw1, kb1, kw2, kb2, kx2 = jax.random.split(key, 6)

    # PyTorch Linear weight is (out, in); store transposed (in, out) for x @ W.
    w1_t = jax.random.normal(kw1, (INPUT_DIM, HIDDEN), dtype=jnp.float32) * 0.02
    b1 = jax.random.normal(kb1, (1, HIDDEN), dtype=jnp.float32) * 0.02
    w2_t = jax.random.normal(kw2, (HIDDEN, HASH_LENS), dtype=jnp.float32) * 0.02
    b2 = jax.random.normal(kb2, (1, HASH_LENS), dtype=jnp.float32) * 0.02

    # Small-batch check (B=8).
    x = jax.random.normal(kx, (8, INPUT_DIM), dtype=jnp.float32)
    out = jax.block_until_ready(textmlp_forward(x, w1_t, b1, w2_t, b2))
    ref = _reference(x, w1_t, b1, w2_t, b2)
    assert out.shape == (8, HASH_LENS)
    assert jnp.allclose(out, ref, atol=2e-3, rtol=2e-3), "mismatch vs reference (B=8)"

    # Larger, non-multiple batch: exercises 256-row tiles, padding, and a grid of length 2.
    x2 = jax.random.normal(kx2, (300, INPUT_DIM), dtype=jnp.float32)
    out2 = jax.block_until_ready(textmlp_forward(x2, w1_t, b1, w2_t, b2))
    ref2 = _reference(x2, w1_t, b1, w2_t, b2)
    assert out2.shape == (300, HASH_LENS)
    assert jnp.allclose(out2, ref2, atol=2e-3, rtol=2e-3), "mismatch vs reference (B=300)"

    print("KERNEL_OK")
</pallas_src>

<mosaic_0001>
module attributes {stable_mosaic.version = 11 : i64} {
  func.func @_textmlp_kernel(%arg0: i32, %arg1: memref<8x256xf32, #tpu.memory_space<vmem>>, %arg2: memref<256x4096xbf16, #tpu.memory_space<vmem>>, %arg3: memref<1x4096xf32, #tpu.memory_space<vmem>>, %arg4: memref<4096x128xbf16, #tpu.memory_space<vmem>>, %arg5: memref<1x128xf32, #tpu.memory_space<vmem>>, %arg6: memref<8x128xf32, #tpu.memory_space<vmem>>, %arg7: memref<8x128xf32, #tpu.memory_space<vmem>>) attributes {dimension_semantics = [#tpu.dimension_semantics<parallel>], iteration_bounds = array<i64: 1>, scalar_prefetch = 0 : i64, scratch_operands = 1 : i64, tpu.core_type = #tpu.core_type<tc>, window_params = [{transform_indices = @transform_0, window_bounds = array<i64: 8, 256>}, {pipeline_mode = #tpu.pipeline_mode<synchronous>, transform_indices = @transform_1, window_bounds = array<i64: 256, 4096>}, {pipeline_mode = #tpu.pipeline_mode<synchronous>, transform_indices = @transform_2, window_bounds = array<i64: 1, 4096>}, {pipeline_mode = #tpu.pipeline_mode<synchronous>, transform_indices = @transform_3, window_bounds = array<i64: 4096, 128>}, {pipeline_mode = #tpu.pipeline_mode<synchronous>, transform_indices = @transform_4, window_bounds = array<i64: 1, 128>}, {transform_indices = @transform_5, window_bounds = array<i64: 8, 128>}]} {
    %c0 = arith.constant 0 : index
    %c0_0 = arith.constant 0 : index
    %0 = vector.load %arg1[%c0, %c0_0] : memref<8x256xf32, #tpu.memory_space<vmem>>, vector<8x256xf32>
    %1 = arith.mulf %0, %0 : vector<8x256xf32>
    %cst = arith.constant dense<0.000000e+00> : vector<8xf32>
    %2 = vector.multi_reduction <add>, %1, %cst [1] : vector<8x256xf32> to vector<8xf32>
    %3 = vector.shape_cast %2 : vector<8xf32> to vector<8x1xf32>
    %cst_1 = arith.constant 1.000000e-24 : f32
    %4 = vector.broadcast %cst_1 : f32 to vector<8x1xf32>
    %5 = arith.maximumf %3, %4 : vector<8x1xf32>
    %6 = math.rsqrt %5 : vector<8x1xf32>
    %7 = vector.broadcast %6 : vector<8x1xf32> to vector<8x256xf32>
    %8 = arith.mulf %0, %7 : vector<8x256xf32>
    %9 = arith.truncf %8 : vector<8x256xf32> to vector<8x256xbf16>
    %cst_2 = arith.constant 0.000000e+00 : f32
    %10 = vector.broadcast %cst_2 : f32 to vector<8x128xf32>
    %c0_3 = arith.constant 0 : index
    %c0_4 = arith.constant 0 : index
    %11 = vector.load %arg7[%c0_3, %c0_4] : memref<8x128xf32, #tpu.memory_space<vmem>>, vector<8x128xf32>
    tpu.vector_store %arg7[%c0_3, %c0_4], %10 {strides = array<i32>} : memref<8x128xf32, #tpu.memory_space<vmem>>, vector<8x128xf32>,
    %c0_5 = arith.constant 0 : index
    %c0_6 = arith.constant 0 : index
    %12 = vector.load %arg2[%c0_5, %c0_6] : memref<256x4096xbf16, #tpu.memory_space<vmem>>, vector<256x512xbf16>
    %cst_7 = arith.constant dense<0.000000e+00> : vector<8x512xf32>
    %13 = tpu.matmul %9, %12, %cst_7 {dimension_numbers = #tpu.dot_dimension_numbers<[1], [0], [0], [1], [0, 0, 1, 1], [], []>} : vector<8x256xbf16>, vector<256x512xbf16>, vector<8x512xf32> -> vector<8x512xf32>
    %c0_8 = arith.constant 0 : index
    %c0_9 = arith.constant 0 : index
    %14 = vector.load %arg3[%c0_8, %c0_9] : memref<1x4096xf32, #tpu.memory_space<vmem>>, vector<1x512xf32>
    %15 = vector.broadcast %14 : vector<1x512xf32> to vector<8x512xf32>
    %16 = arith.addf %13, %15 : vector<8x512xf32>
    %cst_10 = arith.constant 0.000000e+00 : f32
    %17 = vector.broadcast %cst_10 : f32 to vector<8x512xf32>
    %18 = arith.maximumf %16, %17 : vector<8x512xf32>
    %c0_11 = arith.constant 0 : index
    %c0_12 = arith.constant 0 : index
    %19 = vector.load %arg7[%c0_11, %c0_12] : memref<8x128xf32, #tpu.memory_space<vmem>>, vector<8x128xf32>
    %20 = arith.truncf %18 : vector<8x512xf32> to vector<8x512xbf16>
    %c0_13 = arith.constant 0 : index
    %c0_14 = arith.constant 0 : index
    %21 = vector.load %arg4[%c0_13, %c0_14] : memref<4096x128xbf16, #tpu.memory_space<vmem>>, vector<512x128xbf16>
    %cst_15 = arith.constant dense<0.000000e+00> : vector<8x128xf32>
    %22 = tpu.matmul %20, %21, %cst_15 {dimension_numbers = #tpu.dot_dimension_numbers<[1], [0], [0], [1], [0, 0, 1, 1], [], []>} : vector<8x512xbf16>, vector<512x128xbf16>, vector<8x128xf32> -> vector<8x128xf32>
    %23 = arith.addf %19, %22 : vector<8x128xf32>
    %c0_16 = arith.constant 0 : index
    %c0_17 = arith.constant 0 : index
    %24 = vector.load %arg7[%c0_16, %c0_17] : memref<8x128xf32, #tpu.memory_space<vmem>>, vector<8x128xf32>
    tpu.vector_store %arg7[%c0_16, %c0_17], %23 {strides = array<i32>} : memref<8x128xf32, #tpu.memory_space<vmem>>, vector<8x128xf32>,
    %c0_18 = arith.constant 0 : index
    %c512 = arith.constant 512 : index
    %25 = vector.load %arg2[%c0_18, %c512] : memref<256x4096xbf16, #tpu.memory_space<vmem>>, vector<256x512xbf16>
    %cst_19 = arith.constant dense<0.000000e+00> : vector<8x512xf32>
    %26 = tpu.matmul %9, %25, %cst_19 {dimension_numbers = #tpu.dot_dimension_numbers<[1], [0], [0], [1], [0, 0, 1, 1], [], []>} : vector<8x256xbf16>, vector<256x512xbf16>, vector<8x512xf32> -> vector<8x512xf32>
    %c0_20 = arith.constant 0 : index
    %c512_21 = arith.constant 512 : index
    %27 = vector.load %arg3[%c0_20, %c512_21] : memref<1x4096xf32, #tpu.memory_space<vmem>>, vector<1x512xf32>
    %28 = vector.broadcast %27 : vector<1x512xf32> to vector<8x512xf32>
    %29 = arith.addf %26, %28 : vector<8x512xf32>
    %cst_22 = arith.constant 0.000000e+00 : f32
    %30 = vector.broadcast %cst_22 : f32 to vector<8x512xf32>
    %31 = arith.maximumf %29, %30 : vector<8x512xf32>
    %c0_23 = arith.constant 0 : index
    %c0_24 = arith.constant 0 : index
    %32 = vector.load %arg7[%c0_23, %c0_24] : memref<8x128xf32, #tpu.memory_space<vmem>>, vector<8x128xf32>
    %33 = arith.truncf %31 : vector<8x512xf32> to vector<8x512xbf16>
    %c512_25 = arith.constant 512 : index
    %c0_26 = arith.constant 0 : index
    %34 = vector.load %arg4[%c512_25, %c0_26] : memref<4096x128xbf16, #tpu.memory_space<vmem>>, vector<512x128xbf16>
    %cst_27 = arith.constant dense<0.000000e+00> : vector<8x128xf32>
    %35 = tpu.matmul %33, %34, %cst_27 {dimension_numbers = #tpu.dot_dimension_numbers<[1], [0], [0], [1], [0, 0, 1, 1], [], []>} : vector<8x512xbf16>, vector<512x128xbf16>, vector<8x128xf32> -> vector<8x128xf32>
    %36 = arith.addf %32, %35 : vector<8x128xf32>
    %c0_28 = arith.constant 0 : index
    %c0_29 = arith.constant 0 : index
    %37 = vector.load %arg7[%c0_28, %c0_29] : memref<8x128xf32, #tpu.memory_space<vmem>>, vector<8x128xf32>
    tpu.vector_store %arg7[%c0_28, %c0_29], %36 {strides = array<i32>} : memref<8x128xf32, #tpu.memory_space<vmem>>, vector<8x128xf32>,
    %c0_30 = arith.constant 0 : index
    %c1024 = arith.constant 1024 : index
    %38 = vector.load %arg2[%c0_30, %c1024] : memref<256x4096xbf16, #tpu.memory_space<vmem>>, vector<256x512xbf16>
    %cst_31 = arith.constant dense<0.000000e+00> : vector<8x512xf32>
    %39 = tpu.matmul %9, %38, %cst_31 {dimension_numbers = #tpu.dot_dimension_numbers<[1], [0], [0], [1], [0, 0, 1, 1], [], []>} : vector<8x256xbf16>, vector<256x512xbf16>, vector<8x512xf32> -> vector<8x512xf32>
    %c0_32 = arith.constant 0 : index
    %c1024_33 = arith.constant 1024 : index
    %40 = vector.load %arg3[%c0_32, %c1024_33] : memref<1x4096xf32, #tpu.memory_space<vmem>>, vector<1x512xf32>
    %41 = vector.broadcast %40 : vector<1x512xf32> to vector<8x512xf32>
    %42 = arith.addf %39, %41 : vector<8x512xf32>
    %cst_34 = arith.constant 0.000000e+00 : f32
    %43 = vector.broadcast %cst_34 : f32 to vector<8x512xf32>
    %44 = arith.maximumf %42, %43 : vector<8x512xf32>
    %c0_35 = arith.constant 0 : index
    %c0_36 = arith.constant 0 : index
    %45 = vector.load %arg7[%c0_35, %c0_36] : memref<8x128xf32, #tpu.memory_space<vmem>>, vector<8x128xf32>
    %46 = arith.truncf %44 : vector<8x512xf32> to vector<8x512xbf16>
    %c1024_37 = arith.constant 1024 : index
    %c0_38 = arith.constant 0 : index
    %47 = vector.load %arg4[%c1024_37, %c0_38] : memref<4096x128xbf16, #tpu.memory_space<vmem>>, vector<512x128xbf16>
    %cst_39 = arith.constant dense<0.000000e+00> : vector<8x128xf32>
    %48 = tpu.matmul %46, %47, %cst_39 {dimension_numbers = #tpu.dot_dimension_numbers<[1], [0], [0], [1], [0, 0, 1, 1], [], []>} : vector<8x512xbf16>, vector<512x128xbf16>, vector<8x128xf32> -> vector<8x128xf32>
    %49 = arith.addf %45, %48 : vector<8x128xf32>
    %c0_40 = arith.constant 0 : index
    %c0_41 = arith.constant 0 : index
    %50 = vector.load %arg7[%c0_40, %c0_41] : memref<8x128xf32, #tpu.memory_space<vmem>>, vector<8x128xf32>
    tpu.vector_store %arg7[%c0_40, %c0_41], %49 {strides = array<i32>} : memref<8x128xf32, #tpu.memory_space<vmem>>, vector<8x128xf32>,
    %c0_42 = arith.constant 0 : index
    %c1536 = arith.constant 1536 : index
    %51 = vector.load %arg2[%c0_42, %c1536] : memref<256x4096xbf16, #tpu.memory_space<vmem>>, vector<256x512xbf16>
    %cst_43 = arith.constant dense<0.000000e+00> : vector<8x512xf32>
    %52 = tpu.matmul %9, %51, %cst_43 {dimension_numbers = #tpu.dot_dimension_numbers<[1], [0], [0], [1], [0, 0, 1, 1], [], []>} : vector<8x256xbf16>, vector<256x512xbf16>, vector<8x512xf32> -> vector<8x512xf32>
    %c0_44 = arith.constant 0 : index
    %c1536_45 = arith.constant 1536 : index
    %53 = vector.load %arg3[%c0_44, %c1536_45] : memref<1x4096xf32, #tpu.memory_space<vmem>>, vector<1x512xf32>
    %54 = vector.broadcast %53 : vector<1x512xf32> to vector<8x512xf32>
    %55 = arith.addf %52, %54 : vector<8x512xf32>
    %cst_46 = arith.constant 0.000000e+00 : f32
    %56 = vector.broadcast %cst_46 : f32 to vector<8x512xf32>
    %57 = arith.maximumf %55, %56 : vector<8x512xf32>
    %c0_47 = arith.constant 0 : index
    %c0_48 = arith.constant 0 : index
    %58 = vector.load %arg7[%c0_47, %c0_48] : memref<8x128xf32, #tpu.memory_space<vmem>>, vector<8x128xf32>
    %59 = arith.truncf %57 : vector<8x512xf32> to vector<8x512xbf16>
    %c1536_49 = arith.constant 1536 : index
    %c0_50 = arith.constant 0 : index
    %60 = vector.load %arg4[%c1536_49, %c0_50] : memref<4096x128xbf16, #tpu.memory_space<vmem>>, vector<512x128xbf16>
    %cst_51 = arith.constant dense<0.000000e+00> : vector<8x128xf32>
    %61 = tpu.matmul %59, %60, %cst_51 {dimension_numbers = #tpu.dot_dimension_numbers<[1], [0], [0], [1], [0, 0, 1, 1], [], []>} : vector<8x512xbf16>, vector<512x128xbf16>, vector<8x128xf32> -> vector<8x128xf32>
    %62 = arith.addf %58, %61 : vector<8x128xf32>
    %c0_52 = arith.constant 0 : index
    %c0_53 = arith.constant 0 : index
    %63 = vector.load %arg7[%c0_52, %c0_53] : memref<8x128xf32, #tpu.memory_space<vmem>>, vector<8x128xf32>
    tpu.vector_store %arg7[%c0_52, %c0_53], %62 {strides = array<i32>} : memref<8x128xf32, #tpu.memory_space<vmem>>, vector<8x128xf32>,
    %c0_54 = arith.constant 0 : index
    %c2048 = arith.constant 2048 : index
    %64 = vector.load %arg2[%c0_54, %c2048] : memref<256x4096xbf16, #tpu.memory_space<vmem>>, vector<256x512xbf16>
    %cst_55 = arith.constant dense<0.000000e+00> : vector<8x512xf32>
    %65 = tpu.matmul %9, %64, %cst_55 {dimension_numbers = #tpu.dot_dimension_numbers<[1], [0], [0], [1], [0, 0, 1, 1], [], []>} : vector<8x256xbf16>, vector<256x512xbf16>, vector<8x512xf32> -> vector<8x512xf32>
    %c0_56 = arith.constant 0 : index
    %c2048_57 = arith.constant 2048 : index
    %66 = vector.load %arg3[%c0_56, %c2048_57] : memref<1x4096xf32, #tpu.memory_space<vmem>>, vector<1x512xf32>
    %67 = vector.broadcast %66 : vector<1x512xf32> to vector<8x512xf32>
    %68 = arith.addf %65, %67 : vector<8x512xf32>
    %cst_58 = arith.constant 0.000000e+00 : f32
    %69 = vector.broadcast %cst_58 : f32 to vector<8x512xf32>
    %70 = arith.maximumf %68, %69 : vector<8x512xf32>
    %c0_59 = arith.constant 0 : index
    %c0_60 = arith.constant 0 : index
    %71 = vector.load %arg7[%c0_59, %c0_60] : memref<8x128xf32, #tpu.memory_space<vmem>>, vector<8x128xf32>
    %72 = arith.truncf %70 : vector<8x512xf32> to vector<8x512xbf16>
    %c2048_61 = arith.constant 2048 : index
    %c0_62 = arith.constant 0 : index
    %73 = vector.load %arg4[%c2048_61, %c0_62] : memref<4096x128xbf16, #tpu.memory_space<vmem>>, vector<512x128xbf16>
    %cst_63 = arith.constant dense<0.000000e+00> : vector<8x128xf32>
    %74 = tpu.matmul %72, %73, %cst_63 {dimension_numbers = #tpu.dot_dimension_numbers<[1], [0], [0], [1], [0, 0, 1, 1], [], []>} : vector<8x512xbf16>, vector<512x128xbf16>, vector<8x128xf32> -> vector<8x128xf32>
    %75 = arith.addf %71, %74 : vector<8x128xf32>
    %c0_64 = arith.constant 0 : index
    %c0_65 = arith.constant 0 : index
    %76 = vector.load %arg7[%c0_64, %c0_65] : memref<8x128xf32, #tpu.memory_space<vmem>>, vector<8x128xf32>
    tpu.vector_store %arg7[%c0_64, %c0_65], %75 {strides = array<i32>} : memref<8x128xf32, #tpu.memory_space<vmem>>, vector<8x128xf32>,
    %c0_66 = arith.constant 0 : index
    %c2560 = arith.constant 2560 : index
    %77 = vector.load %arg2[%c0_66, %c2560] : memref<256x4096xbf16, #tpu.memory_space<vmem>>, vector<256x512xbf16>
    %cst_67 = arith.constant dense<0.000000e+00> : vector<8x512xf32>
    %78 = tpu.matmul %9, %77, %cst_67 {dimension_numbers = #tpu.dot_dimension_numbers<[1], [0], [0], [1], [0, 0, 1, 1], [], []>} : vector<8x256xbf16>, vector<256x512xbf16>, vector<8x512xf32> -> vector<8x512xf32>
    %c0_68 = arith.constant 0 : index
    %c2560_69 = arith.constant 2560 : index
    %79 = vector.load %arg3[%c0_68, %c2560_69] : memref<1x4096xf32, #tpu.memory_space<vmem>>, vector<1x512xf32>
    %80 = vector.broadcast %79 : vector<1x512xf32> to vector<8x512xf32>
    %81 = arith.addf %78, %80 : vector<8x512xf32>
    %cst_70 = arith.constant 0.000000e+00 : f32
    %82 = vector.broadcast %cst_70 : f32 to vector<8x512xf32>
    %83 = arith.maximumf %81, %82 : vector<8x512xf32>
    %c0_71 = arith.constant 0 : index
    %c0_72 = arith.constant 0 : index
    %84 = vector.load %arg7[%c0_71, %c0_72] : memref<8x128xf32, #tpu.memory_space<vmem>>, vector<8x128xf32>
    %85 = arith.truncf %83 : vector<8x512xf32> to vector<8x512xbf16>
    %c2560_73 = arith.constant 2560 : index
    %c0_74 = arith.constant 0 : index
    %86 = vector.load %arg4[%c2560_73, %c0_74] : memref<4096x128xbf16, #tpu.memory_space<vmem>>, vector<512x128xbf16>
    %cst_75 = arith.constant dense<0.000000e+00> : vector<8x128xf32>
    %87 = tpu.matmul %85, %86, %cst_75 {dimension_numbers = #tpu.dot_dimension_numbers<[1], [0], [0], [1], [0, 0, 1, 1], [], []>} : vector<8x512xbf16>, vector<512x128xbf16>, vector<8x128xf32> -> vector<8x128xf32>
    %88 = arith.addf %84, %87 : vector<8x128xf32>
    %c0_76 = arith.constant 0 : index
    %c0_77 = arith.constant 0 : index
    %89 = vector.load %arg7[%c0_76, %c0_77] : memref<8x128xf32, #tpu.memory_space<vmem>>, vector<8x128xf32>
    tpu.vector_store %arg7[%c0_76, %c0_77], %88 {strides = array<i32>} : memref<8x128xf32, #tpu.memory_space<vmem>>, vector<8x128xf32>,
    %c0_78 = arith.constant 0 : index
    %c3072 = arith.constant 3072 : index
    %90 = vector.load %arg2[%c0_78, %c3072] : memref<256x4096xbf16, #tpu.memory_space<vmem>>, vector<256x512xbf16>
    %cst_79 = arith.constant dense<0.000000e+00> : vector<8x512xf32>
    %91 = tpu.matmul %9, %90, %cst_79 {dimension_numbers = #tpu.dot_dimension_numbers<[1], [0], [0], [1], [0, 0, 1, 1], [], []>} : vector<8x256xbf16>, vector<256x512xbf16>, vector<8x512xf32> -> vector<8x512xf32>
    %c0_80 = arith.constant 0 : index
    %c3072_81 = arith.constant 3072 : index
    %92 = vector.load %arg3[%c0_80, %c3072_81] : memref<1x4096xf32, #tpu.memory_space<vmem>>, vector<1x512xf32>
    %93 = vector.broadcast %92 : vector<1x512xf32> to vector<8x512xf32>
    %94 = arith.addf %91, %93 : vector<8x512xf32>
    %cst_82 = arith.constant 0.000000e+00 : f32
    %95 = vector.broadcast %cst_82 : f32 to vector<8x512xf32>
    %96 = arith.maximumf %94, %95 : vector<8x512xf32>
    %c0_83 = arith.constant 0 : index
    %c0_84 = arith.constant 0 : index
    %97 = vector.load %arg7[%c0_83, %c0_84] : memref<8x128xf32, #tpu.memory_space<vmem>>, vector<8x128xf32>
    %98 = arith.truncf %96 : vector<8x512xf32> to vector<8x512xbf16>
    %c3072_85 = arith.constant 3072 : index
    %c0_86 = arith.constant 0 : index
    %99 = vector.load %arg4[%c3072_85, %c0_86] : memref<4096x128xbf16, #tpu.memory_space<vmem>>, vector<512x128xbf16>
    %cst_87 = arith.constant dense<0.000000e+00> : vector<8x128xf32>
    %100 = tpu.matmul %98, %99, %cst_87 {dimension_numbers = #tpu.dot_dimension_numbers<[1], [0], [0], [1], [0, 0, 1, 1], [], []>} : vector<8x512xbf16>, vector<512x128xbf16>, vector<8x128xf32> -> vector<8x128xf32>
    %101 = arith.addf %97, %100 : vector<8x128xf32>
    %c0_88 = arith.constant 0 : index
    %c0_89 = arith.constant 0 : index
    %102 = vector.load %arg7[%c0_88, %c0_89] : memref<8x128xf32, #tpu.memory_space<vmem>>, vector<8x128xf32>
    tpu.vector_store %arg7[%c0_88, %c0_89], %101 {strides = array<i32>} : memref<8x128xf32, #tpu.memory_space<vmem>>, vector<8x128xf32>,
    %c0_90 = arith.constant 0 : index
    %c3584 = arith.constant 3584 : index
    %103 = vector.load %arg2[%c0_90, %c3584] : memref<256x4096xbf16, #tpu.memory_space<vmem>>, vector<256x512xbf16>
    %cst_91 = arith.constant dense<0.000000e+00> : vector<8x512xf32>
    %104 = tpu.matmul %9, %103, %cst_91 {dimension_numbers = #tpu.dot_dimension_numbers<[1], [0], [0], [1], [0, 0, 1, 1], [], []>} : vector<8x256xbf16>, vector<256x512xbf16>, vector<8x512xf32> -> vector<8x512xf32>
    %c0_92 = arith.constant 0 : index
    %c3584_93 = arith.constant 3584 : index
    %105 = vector.load %arg3[%c0_92, %c3584_93] : memref<1x4096xf32, #tpu.memory_space<vmem>>, vector<1x512xf32>
    %106 = vector.broadcast %105 : vector<1x512xf32> to vector<8x512xf32>
    %107 = arith.addf %104, %106 : vector<8x512xf32>
    %cst_94 = arith.constant 0.000000e+00 : f32
    %108 = vector.broadcast %cst_94 : f32 to vector<8x512xf32>
    %109 = arith.maximumf %107, %108 : vector<8x512xf32>
    %c0_95 = arith.constant 0 : index
    %c0_96 = arith.constant 0 : index
    %110 = vector.load %arg7[%c0_95, %c0_96] : memref<8x128xf32, #tpu.memory_space<vmem>>, vector<8x128xf32>
    %111 = arith.truncf %109 : vector<8x512xf32> to vector<8x512xbf16>
    %c3584_97 = arith.constant 3584 : index
    %c0_98 = arith.constant 0 : index
    %112 = vector.load %arg4[%c3584_97, %c0_98] : memref<4096x128xbf16, #tpu.memory_space<vmem>>, vector<512x128xbf16>
    %cst_99 = arith.constant dense<0.000000e+00> : vector<8x128xf32>
    %113 = tpu.matmul %111, %112, %cst_99 {dimension_numbers = #tpu.dot_dimension_numbers<[1], [0], [0], [1], [0, 0, 1, 1], [], []>} : vector<8x512xbf16>, vector<512x128xbf16>, vector<8x128xf32> -> vector<8x128xf32>
    %114 = arith.addf %110, %113 : vector<8x128xf32>
    %c0_100 = arith.constant 0 : index
    %c0_101 = arith.constant 0 : index
    %115 = vector.load %arg7[%c0_100, %c0_101] : memref<8x128xf32, #tpu.memory_space<vmem>>, vector<8x128xf32>
    tpu.vector_store %arg7[%c0_100, %c0_101], %114 {strides = array<i32>} : memref<8x128xf32, #tpu.memory_space<vmem>>, vector<8x128xf32>,
    %c0_102 = arith.constant 0 : index
    %c0_103 = arith.constant 0 : index
    %116 = vector.load %arg7[%c0_102, %c0_103] : memref<8x128xf32, #tpu.memory_space<vmem>>, vector<8x128xf32>
    %c0_104 = arith.constant 0 : index
    %c0_105 = arith.constant 0 : index
    %117 = vector.load %arg5[%c0_104, %c0_105] : memref<1x128xf32, #tpu.memory_space<vmem>>, vector<1x128xf32>
    %118 = vector.broadcast %117 : vector<1x128xf32> to vector<8x128xf32>
    %119 = arith.addf %116, %118 : vector<8x128xf32>
    %cst_106 = arith.constant 1.000000e+00 : f32
    %120 = vector.broadcast %cst_106 : f32 to vector<8x128xf32>
    %121 = arith.mulf %119, %120 : vector<8x128xf32>
    %122 = math.tanh %121 : vector<8x128xf32>
    %123 = arith.mulf %122, %122 : vector<8x128xf32>
    %cst_107 = arith.constant dense<0.000000e+00> : vector<8xf32>
    %124 = vector.multi_reduction <add>, %123, %cst_107 [1] : vector<8x128xf32> to vector<8xf32>
    %125 = vector.shape_cast %124 : vector<8xf32> to vector<8x1xf32>
    %cst_108 = arith.constant 1.000000e-24 : f32
    %126 = vector.broadcast %cst_108 : f32 to vector<8x1xf32>
    %127 = arith.maximumf %125, %126 : vector<8x1xf32>
    %128 = math.rsqrt %127 : vector<8x1xf32>
    %129 = vector.broadcast %128 : vector<8x1xf32> to vector<8x128xf32>
    %130 = arith.mulf %122, %129 : vector<8x128xf32>
    %c0_109 = arith.constant 0 : index
    %c0_110 = arith.constant 0 : index
    %131 = vector.load %arg6[%c0_109, %c0_110] : memref<8x128xf32, #tpu.memory_space<vmem>>, vector<8x128xf32>
    tpu.vector_store %arg6[%c0_109, %c0_110], %130 {strides = array<i32>} : memref<8x128xf32, #tpu.memory_space<vmem>>, vector<8x128xf32>,
    return
  }
  func.func @transform_0(%arg0: i32) -> (i32, i32) {
    %c0_i32 = arith.constant 0 : i32
    %c0_i32_0 = arith.constant 0 : i32
    return %arg0, %c0_i32 : i32, i32
  }
  func.func @transform_1(%arg0: i32) -> (i32, i32) {
    %c0_i32 = arith.constant 0 : i32
    %c0_i32_0 = arith.constant 0 : i32
    %c0_i32_1 = arith.constant 0 : i32
    return %c0_i32, %c0_i32_0 : i32, i32
  }
  func.func @transform_2(%arg0: i32) -> (i32, i32) {
    %c0_i32 = arith.constant 0 : i32
    %c0_i32_0 = arith.constant 0 : i32
    %c0_i32_1 = arith.constant 0 : i32
    return %c0_i32, %c0_i32_0 : i32, i32
  }
  func.func @transform_3(%arg0: i32) -> (i32, i32) {
    %c0_i32 = arith.constant 0 : i32
    %c0_i32_0 = arith.constant 0 : i32
    %c0_i32_1 = arith.constant 0 : i32
    return %c0_i32, %c0_i32_0 : i32, i32
  }
  func.func @transform_4(%arg0: i32) -> (i32, i32) {
    %c0_i32 = arith.constant 0 : i32
    %c0_i32_0 = arith.constant 0 : i32
    %c0_i32_1 = arith.constant 0 : i32
    return %c0_i32, %c0_i32_0 : i32, i32
  }
  func.func @transform_5(%arg0: i32) -> (i32, i32) {
    %c0_i32 = arith.constant 0 : i32
    %c0_i32_0 = arith.constant 0 : i32
    return %arg0, %c0_i32 : i32, i32
  }
}

</mosaic_0001>

<bundles_post_ra>
// kernel: textmlp_forward.1
= control target key start
LH: loop header
LB: loop body
LE: loop exit
PB: predicated region body
PF: predicated region fallthrough
CT: control target
= control target key end

     0   :  { %s10626_s0 = inlined_call_operand.vmem [shape: f32[8,256], index: 0, kind: input, shape index: {}]   ;;  %s10627_s1 = inlined_call_operand.vmem [shape: bf16[256,4096], index: 1, kind: input, shape index: {}]   ;;  %s10628_s2 = inlined_call_operand.vmem [shape: f32[1,4096], index: 2, kind: input, shape index: {}]   ;;  %s10629_s3 = inlined_call_operand.vmem [shape: bf16[4096,128], index: 3, kind: input, shape index: {}]   ;;  %s10630_s4 = inlined_call_operand.vmem [shape: f32[1,128], index: 4, kind: input, shape index: {}]   ;;  %s10631_s5 = inlined_call_operand.hbm [shape: f32[8,128], index: 5, kind: output, shape index: {}]  }
   0x1   :  { %v22_v0 = vld [vmem:[%s10626_s0] sm:$0xff]  ;;  %v23_v1 = vld [vmem:[%s10626_s0 + $0x8] sm:$0xff] }
   0x2   :  { %v64_v2 = vld [vmem:[%s10627_s1 + $0x700] sm:$0xff]  ;;  %v24_v3 = vmul.f32 %v22_v0, %v22_v0  ;;  %v25_v4 = vmul.f32 %v23_v1, %v23_v1  ;;  %v65_v6 = vld [vmem:[%s10627_s1 + $0x708] sm:$0xff] }
   0x3   :  { %v66_v5 = vld [vmem:[%s10627_s1 + $0x780] sm:$0xff]  ;;  %v67_v7 = vld [vmem:[%s10627_s1 + $0x788] sm:$0xff] }
   0x4   :  { %v6776_v8 = vcombine.high %v64_v2, %v66_v5  ;;  %v6778_v9 = vcombine.high %v65_v6, %v67_v7  ;;  %v6775_v10 = vcombine.low %v64_v2, %v66_v5  ;;  %v6777_v11 = vcombine.low %v65_v6, %v67_v7  ;;  %v60_v12 = vld [vmem:[%s10627_s1 + $0x600] sm:$0xff]  ;;  %v61_v14 = vld [vmem:[%s10627_s1 + $0x608] sm:$0xff] }
   0x5   :  { %v62_v13 = vld [vmem:[%s10627_s1 + $0x680] sm:$0xff]  ;;  %v26_v15 = vadd.f32 %v25_v4, %v24_v3  ;;  %v63_v17 = vld [vmem:[%s10627_s1 + $0x688] sm:$0xff] }
   0x6   :  { %v6772_v16 = vcombine.high %v60_v12, %v62_v13  ;;  %v56_v18 = vld [vmem:[%s10627_s1 + $0x500] sm:$0xff]  ;;  %442 = vmatprep.subr.bf16.mxu0 %v6776_v8  ;;  %483 = vmatprep.subr.bf16.mxu1 %v6778_v9  ;;  %v6774_v20 = vcombine.high %v61_v14, %v63_v17  ;;  %v57_v21 = vld [vmem:[%s10627_s1 + $0x508] sm:$0xff]  ;;  %v6771_v23 = vcombine.low %v60_v12, %v62_v13 }
   0x7   :  { %v58_v19 = vld [vmem:[%s10627_s1 + $0x580] sm:$0xff]  ;;  %v59_v22 = vld [vmem:[%s10627_s1 + $0x588] sm:$0xff]  ;;  %27 = vadd.xlane.f32.xlu0 %v26_v15  ;;  %443 = vmatpush1.bf16.msra.mxu0 %v6775_v10  ;;  %v6773_v24 = vcombine.low %v61_v14, %v63_v17 }
   0x8   :  { %484 = vmatpush1.bf16.msra.mxu1 %v6777_v11  ;;  %444 = vmatprep.subr.bf16.mxu0 %v6772_v16  ;;  %v6768_v25 = vcombine.high %v56_v18, %v58_v19  ;;  %v6770_v26 = vcombine.high %v57_v21, %v59_v22  ;;  %v52_v27 = vld [vmem:[%s10627_s1 + $0x400] sm:$0xff]  ;;  %v53_v29 = vld [vmem:[%s10627_s1 + $0x408] sm:$0xff]  ;;  %v6767_v31 = vcombine.low %v56_v18, %v58_v19 }
   0x9   :  { %485 = vmatprep.subr.bf16.mxu1 %v6774_v20  ;;  %v54_v28 = vld [vmem:[%s10627_s1 + $0x480] sm:$0xff]  ;;  %v55_v30 = vld [vmem:[%s10627_s1 + $0x488] sm:$0xff]  ;;  %v6769_v32 = vcombine.low %v57_v21, %v59_v22 }
   0xa   :  { %v6764_v33 = vcombine.high %v52_v27, %v54_v28  ;;  %v6766_v34 = vcombine.high %v53_v29, %v55_v30  ;;  %v48_v35 = vld [vmem:[%s10627_s1 + $0x300] sm:$0xff]  ;;  %v49_v37 = vld [vmem:[%s10627_s1 + $0x308] sm:$0xff]  ;;  %v6763_v39 = vcombine.low %v52_v27, %v54_v28  ;;  %v6765_v40 = vcombine.low %v53_v29, %v55_v30 }
   0xb   :  { %445 = vmatpush1.bf16.msra.mxu0 %v6771_v23  ;;  %v50_v36 = vld [vmem:[%s10627_s1 + $0x380] sm:$0xff]  ;;  %v51_v38 = vld [vmem:[%s10627_s1 + $0x388] sm:$0xff] }
   0xc   :  { %486 = vmatpush1.bf16.msra.mxu1 %v6773_v24  ;;  %446 = vmatprep.subr.bf16.mxu0 %v6768_v25  ;;  %v6760_v41 = vcombine.high %v48_v35, %v50_v36  ;;  %v6762_v42 = vcombine.high %v49_v37, %v51_v38  ;;  %v44_v43 = vld [vmem:[%s10627_s1 + $0x200] sm:$0xff]  ;;  %v45_v45 = vld [vmem:[%s10627_s1 + $0x208] sm:$0xff]  ;;  %v6759_v47 = vcombine.low %v48_v35, %v50_v36 }
   0xd   :  { %487 = vmatprep.subr.bf16.mxu1 %v6770_v26  ;;  %v46_v44 = vld [vmem:[%s10627_s1 + $0x280] sm:$0xff]  ;;  %v47_v46 = vld [vmem:[%s10627_s1 + $0x288] sm:$0xff]  ;;  %v6761_v50 = vcombine.low %v49_v37, %v51_v38 }
   0xe   :  { %v40_v48 = vld [vmem:[%s10627_s1 + $0x100] sm:$0xff]  ;;  %v6756_v51 = vcombine.high %v44_v43, %v46_v44  ;;  %v41_v52 = vld [vmem:[%s10627_s1 + $0x108] sm:$0xff]  ;;  %v6758_v54 = vcombine.high %v45_v45, %v47_v46  ;;  %v6755_v55 = vcombine.low %v44_v43, %v46_v44  ;;  %v6757_v58 = vcombine.low %v45_v45, %v47_v46 }
   0xf   :  { %447 = vmatpush1.bf16.msra.mxu0 %v6767_v31  ;;  %v42_v49 = vld [vmem:[%s10627_s1 + $0x180] sm:$0xff]  ;;  %v43_v53 = vld [vmem:[%s10627_s1 + $0x188] sm:$0xff] }
  0x10   :  { %488 = vmatpush1.bf16.msra.mxu1 %v6769_v32  ;;  %448 = vmatprep.subr.bf16.mxu0 %v6764_v33  ;;  %v36_v56 = vld [vmem:[%s10627_s1] sm:$0xff]  ;;  %v6752_v59 = vcombine.high %v40_v48, %v42_v49  ;;  %v37_v60 = vld [vmem:[%s10627_s1 + $0x8] sm:$0xff]  ;;  %v6754_v62 = vcombine.high %v41_v52, %v43_v53  ;;  %v6751_v63 = vcombine.low %v40_v48, %v42_v49 }
  0x11   :  { %489 = vmatprep.subr.bf16.mxu1 %v6766_v34  ;;  %v38_v57 = vld [vmem:[%s10627_s1 + $0x80] sm:$0xff]  ;;  %v39_v61 = vld [vmem:[%s10627_s1 + $0x88] sm:$0xff]  ;;  %v6753_v2 = vcombine.low %v41_v52, %v43_v53 }
  0x12   :  { %v96_v0 = vld [vmem:[%s10627_s1 + $0xf00] sm:$0xff]  ;;  %v6748_v3 = vcombine.high %v36_v56, %v38_v57  ;;  %v97_v4 = vld [vmem:[%s10627_s1 + $0xf08] sm:$0xff]  ;;  %v6750_v6 = vcombine.high %v37_v60, %v39_v61  ;;  %v6747_v7 = vcombine.low %v36_v56, %v38_v57  ;;  %v6749_v10 = vcombine.low %v37_v60, %v39_v61 }
  0x13   :  { %449 = vmatpush1.bf16.msra.mxu0 %v6763_v39  ;;  %v98_v1 = vld [vmem:[%s10627_s1 + $0xf80] sm:$0xff]  ;;  %v99_v5 = vld [vmem:[%s10627_s1 + $0xf88] sm:$0xff] }
  0x14   :  { %490 = vmatpush1.bf16.msra.mxu1 %v6765_v40  ;;  %450 = vmatprep.subr.bf16.mxu0 %v6760_v41  ;;  %v92_v8 = vld [vmem:[%s10627_s1 + $0xe00] sm:$0xff]  ;;  %v6808_v11 = vcombine.high %v96_v0, %v98_v1  ;;  %v93_v12 = vld [vmem:[%s10627_s1 + $0xe08] sm:$0xff]  ;;  %v6810_v14 = vcombine.high %v97_v4, %v99_v5  ;;  %v6807_v15 = vcombine.low %v96_v0, %v98_v1 }
  0x15   :  { %491 = vmatprep.subr.bf16.mxu1 %v6762_v42  ;;  %v94_v9 = vld [vmem:[%s10627_s1 + $0xe80] sm:$0xff]  ;;  %v95_v13 = vld [vmem:[%s10627_s1 + $0xe88] sm:$0xff]  ;;  %v6809_v18 = vcombine.low %v97_v4, %v99_v5  ;;  %v7870_v5 = vld [vmem:[%s10629_s3 + $0xf8] sm:$0xff]  }
  0x16   :  { %v88_v16 = vld [vmem:[%s10627_s1 + $0xd00] sm:$0xff]  ;;  %v6804_v19 = vcombine.high %v92_v8, %v94_v9  ;;  %v6806_v20 = vcombine.high %v93_v12, %v95_v13  ;;  %v89_v21 = vld [vmem:[%s10627_s1 + $0xd08] sm:$0xff]  ;;  %v6803_v23 = vcombine.low %v92_v8, %v94_v9  ;;  %v6805_v26 = vcombine.low %v93_v12, %v95_v13 }
  0x17   :  { %451 = vmatpush1.bf16.msra.mxu0 %v6759_v47  ;;  %v90_v17 = vld [vmem:[%s10627_s1 + $0xd80] sm:$0xff]  ;;  %v91_v22 = vld [vmem:[%s10627_s1 + $0xd88] sm:$0xff] }
  0x18   :  { %492 = vmatpush1.bf16.msra.mxu1 %v6761_v50  ;;  %452 = vmatprep.subr.bf16.mxu0 %v6756_v51  ;;  %v84_v24 = vld [vmem:[%s10627_s1 + $0xc00] sm:$0xff]  ;;  %v6800_v27 = vcombine.high %v88_v16, %v90_v17  ;;  %v85_v28 = vld [vmem:[%s10627_s1 + $0xc08] sm:$0xff]  ;;  %v6802_v30 = vcombine.high %v89_v21, %v91_v22  ;;  %v6799_v31 = vcombine.low %v88_v16, %v90_v17  ;;  %v7873_v16 = vld [vmem:[%s10629_s3 + $0x70] sm:$0xff]  }
  0x19   :  { %493 = vmatprep.subr.bf16.mxu1 %v6758_v54  ;;  %v86_v25 = vld [vmem:[%s10627_s1 + $0xc80] sm:$0xff]  ;;  %v87_v29 = vld [vmem:[%s10627_s1 + $0xc88] sm:$0xff]  ;;  %v6801_v34 = vcombine.low %v89_v21, %v91_v22  ;;  %v7874_v17 = vld [vmem:[%s10629_s3 + $0xf0] sm:$0xff]  }
  0x1a   :  { %v80_v32 = vld [vmem:[%s10627_s1 + $0xb00] sm:$0xff]  ;;  %v6796_v35 = vcombine.high %v84_v24, %v86_v25  ;;  %v81_v36 = vld [vmem:[%s10627_s1 + $0xb08] sm:$0xff]  ;;  %v6798_v38 = vcombine.high %v85_v28, %v87_v29  ;;  %v6795_v39 = vcombine.low %v84_v24, %v86_v25  ;;  %v6797_v42 = vcombine.low %v85_v28, %v87_v29  ;;  %v7876_v21 = vld [vmem:[%s10629_s3 + $0xb0] sm:$0xff]  }
  0x1b   :  { %453 = vmatpush1.bf16.msra.mxu0 %v6755_v55  ;;  %v82_v33 = vld [vmem:[%s10627_s1 + $0xb80] sm:$0xff]  ;;  %v83_v37 = vld [vmem:[%s10627_s1 + $0xb88] sm:$0xff] }
  0x1c   :  { %494 = vmatpush1.bf16.msra.mxu1 %v6757_v58  ;;  %454 = vmatprep.subr.bf16.mxu0 %v6752_v59  ;;  %v76_v40 = vld [vmem:[%s10627_s1 + $0xa00] sm:$0xff]  ;;  %v6792_v43 = vcombine.high %v80_v32, %v82_v33  ;;  %v77_v44 = vld [vmem:[%s10627_s1 + $0xa08] sm:$0xff]  ;;  %v6794_v46 = vcombine.high %v81_v36, %v83_v37  ;;  %v6791_v47 = vcombine.low %v80_v32, %v82_v33  ;;  %v7887_v32 = vld [vmem:[%s10629_s3 + $0x18] sm:$0xff]  }
  0x1d   :  { %495 = vmatprep.subr.bf16.mxu1 %v6754_v62  ;;  %v78_v41 = vld [vmem:[%s10627_s1 + $0xa80] sm:$0xff]  ;;  %v79_v45 = vld [vmem:[%s10627_s1 + $0xa88] sm:$0xff]  ;;  %v6793_v50 = vcombine.low %v81_v36, %v83_v37  ;;  %v7888_v33 = vld [vmem:[%s10629_s3 + $0x98] sm:$0xff]  }
  0x1e   :  { %v72_v48 = vld [vmem:[%s10627_s1 + $0x900] sm:$0xff]  ;;  %v6788_v51 = vcombine.high %v76_v40, %v78_v41  ;;  %v73_v52 = vld [vmem:[%s10627_s1 + $0x908] sm:$0xff]  ;;  %v6790_v54 = vcombine.high %v77_v44, %v79_v45  ;;  %v6787_v55 = vcombine.low %v76_v40, %v78_v41  ;;  %v6789_v58 = vcombine.low %v77_v44, %v79_v45  ;;  %v7891_v36 = vld [vmem:[%s10629_s3 + $0x10] sm:$0xff]  }
  0x1f   :  { %455 = vmatpush1.bf16.msra.mxu0 %v6751_v63  ;;  %v74_v49 = vld [vmem:[%s10627_s1 + $0x980] sm:$0xff]  ;;  %v75_v53 = vld [vmem:[%s10627_s1 + $0x988] sm:$0xff]  ;;  %v7892_v37 = vld [vmem:[%s10629_s3 + $0x90] sm:$0xff]  }
  0x20   :  { %496 = vmatpush1.bf16.msra.mxu1 %v6753_v2  ;;  %456 = vmatprep.subr.bf16.mxu0 %v6748_v3  ;;  %v68_v56 = vld [vmem:[%s10627_s1 + $0x800] sm:$0xff]  ;;  %v6784_v59 = vcombine.high %v72_v48, %v74_v49  ;;  %v69_v60 = vld [vmem:[%s10627_s1 + $0x808] sm:$0xff]  ;;  %v6786_v62 = vcombine.high %v73_v52, %v75_v53  ;;  %v6783_v63 = vcombine.low %v72_v48, %v74_v49  ;;  %v7869_v3 = vld [vmem:[%s10629_s3 + $0x78] sm:$0xff]  }
  0x21   :  { %497 = vmatprep.subr.bf16.mxu1 %v6750_v6  ;;  %v70_v57 = vld [vmem:[%s10627_s1 + $0x880] sm:$0xff]  ;;  %v71_v61 = vld [vmem:[%s10627_s1 + $0x888] sm:$0xff]  ;;  %v6785_v0 = vcombine.low %v73_v52, %v75_v53 }
  0x22   :  { %v6780_v1 = vcombine.high %v68_v56, %v70_v57  ;;  %v6782_v2 = vcombine.high %v69_v60, %v71_v61  ;;  %v6779_v4 = vcombine.low %v68_v56, %v70_v57  ;;  %v6781_v6 = vcombine.low %v69_v60, %v71_v61  ;;  %v8132_v12 = vld [vmem:[%s10626_s0 + $0x8] sm:$0xff]  ;;  %v7883_v28 = vld [vmem:[%s10629_s3 + $0x20] sm:$0xff]  }
  0x23   :  { %457 = vmatpush1.bf16.msra.mxu0 %v6747_v7  ;;  %v7877_v22 = vld [vmem:[%s10629_s3 + $0x68] sm:$0xff]   ;;  %v7884_v29 = vld [vmem:[%s10629_s3 + $0xa0] sm:$0xff]  }
  0x24   :  { %498 = vmatpush1.bf16.msra.mxu1 %v6749_v10  ;;  %458 = vmatprep.subr.bf16.mxu0 %v6808_v11  ;;  %v8131_v10 = vld [vmem:[%s10626_s0] sm:$0xff]  ;;  %v7879_v24 = vld [vmem:[%s10629_s3 + $0x28] sm:$0xff]  }
  0x25   :  { %499 = vmatprep.subr.bf16.mxu1 %v6810_v14  ;;  %v7871_v14 = vld [vmem:[%s10629_s3 + $0x38] sm:$0xff]   ;;  %v7880_v25 = vld [vmem:[%s10629_s3 + $0xa8] sm:$0xff]  }
  0x27   :  { %459 = vmatpush2.bf16.msra.mxu0 %v6807_v15  ;;  %v7872_v15 = vld [vmem:[%s10629_s3 + $0xb8] sm:$0xff]  }
  0x28   :  { %500 = vmatpush2.bf16.msra.mxu1 %v6809_v18  ;;  %460 = vmatprep.subr.bf16.mxu0 %v6804_v19 }
  0x29   :  { %501 = vmatprep.subr.bf16.mxu1 %v6806_v20  ;;  %v7875_v20 = vld [vmem:[%s10629_s3 + $0x30] sm:$0xff]  }
  0x2b   :  { %461 = vmatpush2.bf16.msra.mxu0 %v6803_v23  ;;  %v7878_v23 = vld [vmem:[%s10629_s3 + $0xe8] sm:$0xff]  }
  0x2c   :  { %502 = vmatpush2.bf16.msra.mxu1 %v6805_v26  ;;  %462 = vmatprep.subr.bf16.mxu0 %v6800_v27  ;;  %v7881_v26 = vld [vmem:[%s10629_s3 + $0x60] sm:$0xff]  }
  0x2d   :  { %503 = vmatprep.subr.bf16.mxu1 %v6802_v30  ;;  %v7882_v27 = vld [vmem:[%s10629_s3 + $0xe0] sm:$0xff]   ;;  %v7885_v30 = vld [vmem:[%s10629_s3 + $0x58] sm:$0xff]  }
  0x2f   :  { %463 = vmatpush2.bf16.msra.mxu0 %v6799_v31  ;;  %v7886_v31 = vld [vmem:[%s10629_s3 + $0xd8] sm:$0xff]  }
  0x30   :  { %504 = vmatpush2.bf16.msra.mxu1 %v6801_v34  ;;  %464 = vmatprep.subr.bf16.mxu0 %v6796_v35  ;;  %v7889_v34 = vld [vmem:[%s10629_s3 + $0x50] sm:$0xff]  }
  0x31   :  { %505 = vmatprep.subr.bf16.mxu1 %v6798_v38  ;;  %v7890_v35 = vld [vmem:[%s10629_s3 + $0xd0] sm:$0xff]  }
  0x33   :  { %465 = vmatpush2.bf16.msra.mxu0 %v6795_v39 }
  0x34   :  { %506 = vmatpush2.bf16.msra.mxu1 %v6797_v42  ;;  %466 = vmatprep.subr.bf16.mxu0 %v6792_v43 }
  0x35   :  { %507 = vmatprep.subr.bf16.mxu1 %v6794_v46 }
  0x37   :  { %467 = vmatpush2.bf16.msra.mxu0 %v6791_v47 }
  0x38   :  { %508 = vmatpush2.bf16.msra.mxu1 %v6793_v50  ;;  %468 = vmatprep.subr.bf16.mxu0 %v6788_v51 }
  0x39   :  { %509 = vmatprep.subr.bf16.mxu1 %v6790_v54 }
  0x3b   :  { %469 = vmatpush2.bf16.msra.mxu0 %v6787_v55 }
  0x3c   :  { %510 = vmatpush2.bf16.msra.mxu1 %v6789_v58  ;;  %470 = vmatprep.subr.bf16.mxu0 %v6784_v59 }
  0x3d   :  { %511 = vmatprep.subr.bf16.mxu1 %v6786_v62 }
  0x3f   :  { %471 = vmatpush2.bf16.msra.mxu0 %v6783_v63 }
  0x40   :  { %512 = vmatpush2.bf16.msra.mxu1 %v6785_v0  ;;  %472 = vmatprep.subr.bf16.mxu0 %v6780_v1 }
  0x41   :  { %513 = vmatprep.subr.bf16.mxu1 %v6782_v2 }
  0x43   :  { %473 = vmatpush2.bf16.msra.mxu0 %v6779_v4 }
  0x44   :  { %514 = vmatpush2.bf16.msra.mxu1 %v6781_v6  ;;  %7516 = vmatprep.subr.bf16.mxu0 %v7869_v3 }
  0x45   :  { %7538 = vmatprep.subr.bf16.mxu1 %v7870_v5 }
  0x90   :  { %v28_v7 = vpop.xlane.xlu0 %27 }
  0x91   :  { %v29_v8 = vmax.f32 %v28_v7, 1e-24 }
  0x93   :  { %8125 = vrsqrt.f32 %v29_v8 }
  0xa0   :  { %v8126_v9 = vpop.eup %8125 }
  0xa1   :  { %v31_v11 = vmul.f32 %v8131_v10, %v8126_v9  ;;  %v32_v13 = vmul.f32 %v8132_v12, %v8126_v9 }
  0xa3   :  { %v8408_v18 = vpack.c.bf16 %v31_v11, %v31_v11  ;;  %v8410_v19 = vpack.c.bf16 %v32_v13, %v32_v13 }
  0xa5   :  { %474 = vmatprep.mubr.bf16.mxu0 %v8410_v19  ;;  %515 = vmatprep.mubr.bf16.mxu1 %v8410_v19 }
  0xa6   :  { %475 = vmatmul.mubr.bf16.vlgmr.msra.gmra.mxu0 %v8408_v18  ;;  %516 = vmatmul.mubr.bf16.vlgmr.msra.gmra.mxu1 %v8408_v18 }
  0xa7   :  { %7517 = vmatpush3.bf16.msra.mxu0 %v7871_v14  ;;  %7539 = vmatpush3.bf16.msra.mxu1 %v7872_v15 }
  0xa8   :  { %7518 = vmatprep.subr.bf16.mxu0 %v7873_v16  ;;  %7540 = vmatprep.subr.bf16.mxu1 %v7874_v17 }
  0xab   :  { %7519 = vmatpush3.bf16.msra.mxu0 %v7875_v20  ;;  %7541 = vmatpush3.bf16.msra.mxu1 %v7876_v21 }
  0xac   :  { %7520 = vmatprep.subr.bf16.mxu0 %v7877_v22  ;;  %7542 = vmatprep.subr.bf16.mxu1 %v7878_v23 }
  0xaf   :  { %7521 = vmatpush3.bf16.msra.mxu0 %v7879_v24  ;;  %7543 = vmatpush3.bf16.msra.mxu1 %v7880_v25 }
  0xb0   :  { %7522 = vmatprep.subr.bf16.mxu0 %v7881_v26  ;;  %7544 = vmatprep.subr.bf16.mxu1 %v7882_v27 }
  0xb3   :  { %7523 = vmatpush3.bf16.msra.mxu0 %v7883_v28  ;;  %7545 = vmatpush3.bf16.msra.mxu1 %v7884_v29 }
  0xb4   :  { %7524 = vmatprep.subr.bf16.mxu0 %v7885_v30  ;;  %7546 = vmatprep.subr.bf16.mxu1 %v7886_v31 }
  0xb7   :  { %7525 = vmatpush3.bf16.msra.mxu0 %v7887_v32  ;;  %7547 = vmatpush3.bf16.msra.mxu1 %v7888_v33 }
  0xb8   :  { %7526 = vmatprep.subr.bf16.mxu0 %v7889_v34  ;;  %7548 = vmatprep.subr.bf16.mxu1 %v7890_v35 }
  0xbb   :  { %7527 = vmatpush3.bf16.msra.mxu0 %v7891_v36  ;;  %7549 = vmatpush3.bf16.msra.mxu1 %v7892_v37 }
  0xbc   :  { %10 = vsyncpa [#allocation4], 0  ;;  %v7893_v38 = vld [vmem:[%s10629_s3 + $0x48] sm:$0xff]   ;;  %v7897_v42 = vld [vmem:[%s10629_s3 + $0x40] sm:$0xff]   ;;  %v102_v54 = vlaneseq  ;;  %s8155_s20 = smov [#allocation3]  }
  0xbd   :  { %v7894_v39 = vld [vmem:[%s10629_s3 + $0xc8] sm:$0xff]   ;;  %7528 = vmatprep.subr.bf16.mxu0 %v7893_v38  ;;  %v7898_v43 = vld [vmem:[%s10629_s3 + $0xc0] sm:$0xff]   ;;  %v899_v46 = vld [vmem:[%s10627_s1 + $0x710] sm:$0xff]  ;;  %s6739_s21 = sshll.u32 %s8155_s20, 4  ;;  %s6740_s21 = int_to_ptr.vmem [resolvable:$true] %s6739_s21 }
  0xbe   :  { %v7895_v40 = vld [vmem:[%s10629_s3 + $0x8] sm:$0xff]   ;;  %7550 = vmatprep.subr.bf16.mxu1 %v7894_v39  ;;  %v7899_v44 = vld [vmem:[%s10629_s3] sm:$0xff]   ;;  %v901_v47 = vld [vmem:[%s10627_s1 + $0x790] sm:$0xff]  ;;  %v103_v55 = vshrl.u32 %v102_v54, 7  ;;  %s8133_s22 = scalar_lea.vmem %s6740_s21, 128  ;;  %p8138_p1 = scmp.lt.s32.totalorder %s6740_s21, %s6740_s21 }
  0xbf   :  { %v7896_v41 = vld [vmem:[%s10629_s3 + $0x88] sm:$0xff]   ;;  %7529 = vmatpush3.bf16.msra.mxu0 %v7895_v40  ;;  %v7900_v45 = vld [vmem:[%s10629_s3 + $0x80] sm:$0xff]   ;;  %v900_v48 = vld [vmem:[%s10627_s1 + $0x718] sm:$0xff]  ;;  %v6872_v49 = vcombine.high %v899_v46, %v901_v47  ;;  %v6871_v51 = vcombine.low %v899_v46, %v901_v47  ;;  %p8134_p0 = scmp.ne.s32.totalorder %s6740_s21, %s8133_s22  ;;  %p8139_p2 = scmp.lt.s32.totalorder %s8133_s22, %s8133_s22 }
  0xc0   :  { %7551 = vmatpush3.bf16.msra.mxu1 %v7896_v41  ;;  %7530 = vmatprep.subr.bf16.mxu0 %v7897_v42  ;;  %v902_v50 = vld [vmem:[%s10627_s1 + $0x798] sm:$0xff]  ;;  %v8506_v56 = vsub.s32 0, %v103_v55  ;;  %v8508_v57 = vsub.s32 2, %v103_v55  ;;  %v100_v58 = vld [vmem:[%s10628_s2] sm:$0xf]  ;;  %v8513_v59 = vsub.s32 1, %v103_v55 }
  0xc1   :  { %7552 = vmatprep.subr.bf16.mxu1 %v7898_v43  ;;  %v6873_v52 = vcombine.low %v900_v48, %v902_v50  ;;  %v6874_v53 = vcombine.high %v900_v48, %v902_v50  ;;  %v8515_v60 = vsub.s32 3, %v103_v55  ;;  %v895_v15 = vld [vmem:[%s10627_s1 + $0x610] sm:$0xff]  ;;  %v896_v21 = vld [vmem:[%s10627_s1 + $0x618] sm:$0xff]  ;;  %p8140_p3 = por %p8139_p2, %p8138_p1 }
  0xc2   :  { %v105_v61 = vrot.slane %v100_v58, %v8506_v56  ;;  %v113_v62 = vrot.slane %v100_v58, %v8508_v57  ;;  %v109_v63 = vrot.slane %v100_v58, %v8513_v59  ;;  %v897_v20 = vld [vmem:[%s10627_s1 + $0x690] sm:$0xff]  ;;  %v898_v22 = vld [vmem:[%s10627_s1 + $0x698] sm:$0xff] }
  0xc3   :  { %7531 = vmatpush3.bf16.msra.mxu0 %v7899_v44  ;;  %v117_v0 = vrot.slane %v100_v58, %v8515_v60  ;;  %v891_v27 = vld [vmem:[%s10627_s1 + $0x510] sm:$0xff]  ;;  %v6868_v28 = vcombine.high %v895_v15, %v897_v20  ;;  %v6870_v29 = vcombine.high %v896_v21, %v898_v22  ;;  %v892_v31 = vld [vmem:[%s10627_s1 + $0x518] sm:$0xff]  ;;  %v6867_v33 = vcombine.low %v895_v15, %v897_v20  ;;  %p8141_p4 = pnand %p8140_p3, %p8134_p0 }
  0xc4   :  { %7553 = vmatpush3.bf16.msra.mxu1 %v7900_v45  ;;  %1277 = vmatprep.subr.bf16.mxu0 %v6872_v49  ;;  %v893_v30 = vld [vmem:[%s10627_s1 + $0x590] sm:$0xff]  ;;  %v894_v32 = vld [vmem:[%s10627_s1 + $0x598] sm:$0xff]  ;;  %v6869_v34 = vcombine.low %v896_v21, %v898_v22 }
  0xc5   :  { %1318 = vmatprep.subr.bf16.mxu1 %v6874_v53  ;;  %v6864_v35 = vcombine.high %v891_v27, %v893_v30  ;;  %v6866_v36 = vcombine.high %v892_v31, %v894_v32  ;;  %v887_v37 = vld [vmem:[%s10627_s1 + $0x410] sm:$0xff]  ;;  %v888_v39 = vld [vmem:[%s10627_s1 + $0x418] sm:$0xff]  ;;  %v6863_v41 = vcombine.low %v891_v27, %v893_v30  ;;  %v6865_v42 = vcombine.low %v892_v31, %v894_v32 }
  0xc6   :  { %v889_v38 = vld [vmem:[%s10627_s1 + $0x490] sm:$0xff]  ;;  %v890_v40 = vld [vmem:[%s10627_s1 + $0x498] sm:$0xff] }
  0xc7   :  { %v6860_v43 = vcombine.high %v887_v37, %v889_v38  ;;  %v6862_v44 = vcombine.high %v888_v39, %v890_v40  ;;  %v883_v45 = vld [vmem:[%s10627_s1 + $0x310] sm:$0xff]  ;;  %v884_v47 = vld [vmem:[%s10627_s1 + $0x318] sm:$0xff]  ;;  %v6859_v49 = vcombine.low %v887_v37, %v889_v38  ;;  %v6861_v50 = vcombine.low %v888_v39, %v890_v40 }
  0xc8   :  { %v885_v46 = vld [vmem:[%s10627_s1 + $0x390] sm:$0xff]  ;;  %v886_v48 = vld [vmem:[%s10627_s1 + $0x398] sm:$0xff] }
  0xc9   :  { %v879_v53 = vld [vmem:[%s10627_s1 + $0x210] sm:$0xff]  ;;  %v880_v55 = vld [vmem:[%s10627_s1 + $0x218] sm:$0xff] }
  0xca   :  { %v881_v54 = vld [vmem:[%s10627_s1 + $0x290] sm:$0xff]  ;;  %v882_v58 = vld [vmem:[%s10627_s1 + $0x298] sm:$0xff] }
  0xcb   :  { %v933_v20 = vld [vmem:[%s10627_s1 + $0xf90] sm:$0xff]  ;;  %v932_v21 = vld [vmem:[%s10627_s1 + $0xf18] sm:$0xff] }
  0xcc   :  { %v934_v22 = vld [vmem:[%s10627_s1 + $0xf98] sm:$0xff]  ;;  %v927_v27 = vld [vmem:[%s10627_s1 + $0xe10] sm:$0xff] }
  0xcd   :  { %v930_v30 = vld [vmem:[%s10627_s1 + $0xe98] sm:$0xff]  ;;  %v6905_v32 = vcombine.low %v932_v21, %v934_v22 }
  0xce   :  { %v924_v37 = vld [vmem:[%s10627_s1 + $0xd18] sm:$0xff] }
  0xcf   :  { %v926_v38 = vld [vmem:[%s10627_s1 + $0xd98] sm:$0xff] }
 0x166   :  { %v476_v1 = vpop.f32.mrf.mxu0  ;;  %v517_v2 = vpop.f32.mrf.mxu1 }
 0x167   :  { %v477_v3 = vadd.f32 %v476_v1, %v105_v61  ;;  %v518_v4 = vadd.f32 %v517_v2, %v113_v62  ;;  %v6855_v61 = vcombine.low %v883_v45, %v885_v46  ;;  %v6857_v62 = vcombine.low %v884_v47, %v886_v48  ;;  %v875_v1 = vld [vmem:[%s10627_s1 + $0x110] sm:$0xff] }
 0x168   :  { %v478_v5 = vpop.f32.mrf.mxu0  ;;  %v519_v6 = vpop.f32.mrf.mxu1  ;;  %v877_v2 = vld [vmem:[%s10627_s1 + $0x190] sm:$0xff] }
 0x169   :  { %v479_v7 = vadd.f32 %v478_v5, %v109_v63  ;;  %v520_v8 = vadd.f32 %v519_v6, %v117_v0  ;;  %v524_v9 = vmax.f32 %v477_v3, 0.0  ;;  %v526_v10 = vmax.f32 %v518_v4, 0.0  ;;  %v876_v3 = vld [vmem:[%s10627_s1 + $0x118] sm:$0xff] }
 0x16a   :  { %v480_v11 = vpop.f32.mrf.mxu0  ;;  %v521_v12 = vpop.f32.mrf.mxu1  ;;  %v6852_v63 = vcombine.high %v879_v53, %v881_v54  ;;  %v6854_v0 = vcombine.high %v880_v55, %v882_v58  ;;  %v878_v4 = vld [vmem:[%s10627_s1 + $0x198] sm:$0xff]  ;;  %v6851_v5 = vcombine.low %v879_v53, %v881_v54  ;;  %v6853_v6 = vcombine.low %v880_v55, %v882_v58 }
 0x16b   :  { %v525_v13 = vmax.f32 %v479_v7, 0.0  ;;  %v527_v14 = vmax.f32 %v520_v8, 0.0  ;;  %v529_v25 = vpack.c.bf16 %v524_v9, %v524_v9  ;;  %v531_v26 = vpack.c.bf16 %v526_v10, %v526_v10  ;;  %v871_v9 = vld [vmem:[%s10627_s1 + $0x10] sm:$0xff]  ;;  %v872_v11 = vld [vmem:[%s10627_s1 + $0x18] sm:$0xff] }
 0x16c   :  { %v481_v16 = vpop.f32.mrf.mxu0  ;;  %v522_v17 = vpop.f32.mrf.mxu1  ;;  %v6848_v7 = vcombine.high %v875_v1, %v877_v2  ;;  %v6850_v8 = vcombine.high %v876_v3, %v878_v4  ;;  %v873_v10 = vld [vmem:[%s10627_s1 + $0x90] sm:$0xff]  ;;  %v874_v12 = vld [vmem:[%s10627_s1 + $0x98] sm:$0xff] }
 0x16d   :  { %v530_v23 = vpack.c.bf16 %v525_v13, %v525_v13  ;;  %v532_v24 = vpack.c.bf16 %v527_v14, %v527_v14  ;;  %v6847_v13 = vcombine.low %v875_v1, %v877_v2  ;;  %v6849_v14 = vcombine.low %v876_v3, %v878_v4  ;;  %v931_v17 = vld [vmem:[%s10627_s1 + $0xf10] sm:$0xff]  ;;  %v916_v53 = vld [vmem:[%s10627_s1 + $0xb18] sm:$0xff] }
 0x16e   :  { %v6844_v15 = vcombine.high %v871_v9, %v873_v10  ;;  %v6846_v16 = vcombine.high %v872_v11, %v874_v12  ;;  %v6903_v31 = vcombine.low %v931_v17, %v933_v20  ;;  %v918_v54 = vld [vmem:[%s10627_s1 + $0xb98] sm:$0xff] }
 0x16f   :  { %821 = vmatprep.mubr.bf16.mxu0 %v530_v23  ;;  %861 = vmatprep.mubr.bf16.mxu1 %v532_v24  ;;  %v6843_v23 = vcombine.low %v871_v9, %v873_v10  ;;  %v6845_v24 = vcombine.low %v872_v11, %v874_v12  ;;  %v912_v1 = vld [vmem:[%s10627_s1 + $0xa18] sm:$0xff]  ;;  %v6889_v4 = vcombine.low %v916_v53, %v918_v54 }
 0x170   :  { %822 = vmatmul.mubr.bf16.vlgmr.msra.gmra.mxu0 %v529_v25  ;;  %862 = vmatmul.mubr.bf16.vlgmr.msra.gmra.mxu1 %v531_v26  ;;  %v6904_v25 = vcombine.high %v931_v17, %v933_v20  ;;  %v6906_v26 = vcombine.high %v932_v21, %v934_v22  ;;  %v914_v2 = vld [vmem:[%s10627_s1 + $0xa98] sm:$0xff] }
 0x171   :  { %1278 = vmatpush1.bf16.msra.mxu0 %v6871_v51  ;;  %1319 = vmatpush1.bf16.msra.mxu1 %v6873_v52  ;;  %v6856_v51 = vcombine.high %v883_v45, %v885_v46  ;;  %v6858_v52 = vcombine.high %v884_v47, %v886_v48  ;;  %v920_v45 = vld [vmem:[%s10627_s1 + $0xc18] sm:$0xff]  ;;  %v6897_v48 = vcombine.low %v924_v37, %v926_v38 }
 0x172   :  { %1309 = vmatprep.mubr.bf16.mxu0 %v8410_v19  ;;  %1350 = vmatprep.mubr.bf16.mxu1 %v8410_v19  ;;  %v922_v46 = vld [vmem:[%s10627_s1 + $0xc98] sm:$0xff]  ;;  %v6885_v12 = vcombine.low %v912_v1, %v914_v2 }
 0x173   :  { %1279 = vmatprep.subr.bf16.mxu0 %v6868_v28  ;;  %1320 = vmatprep.subr.bf16.mxu1 %v6870_v29  ;;  %v929_v28 = vld [vmem:[%s10627_s1 + $0xe90] sm:$0xff]  ;;  %v928_v29 = vld [vmem:[%s10627_s1 + $0xe18] sm:$0xff]  ;;  %v6893_v58 = vcombine.low %v920_v45, %v922_v46 }
 0x174   :  { %v6899_v39 = vcombine.low %v927_v27, %v929_v28  ;;  %v6901_v40 = vcombine.low %v928_v29, %v930_v30  ;;  %v908_v9 = vld [vmem:[%s10627_s1 + $0x918] sm:$0xff] }
 0x175   :  { %1280 = vmatpush1.bf16.msra.mxu0 %v6867_v33  ;;  %1321 = vmatpush1.bf16.msra.mxu1 %v6869_v34  ;;  %v6900_v33 = vcombine.high %v927_v27, %v929_v28  ;;  %v6902_v34 = vcombine.high %v928_v29, %v930_v30  ;;  %v910_v10 = vld [vmem:[%s10627_s1 + $0x998] sm:$0xff] }
 0x176   :  { %1281 = vmatprep.subr.bf16.mxu0 %v6864_v35  ;;  %1322 = vmatprep.subr.bf16.mxu1 %v6866_v36  ;;  %v923_v35 = vld [vmem:[%s10627_s1 + $0xd10] sm:$0xff]  ;;  %v904_v17 = vld [vmem:[%s10627_s1 + $0x818] sm:$0xff]  ;;  %v6881_v22 = vcombine.low %v908_v9, %v910_v10 }
 0x177   :  { %v925_v36 = vld [vmem:[%s10627_s1 + $0xd90] sm:$0xff]  ;;  %v906_v20 = vld [vmem:[%s10627_s1 + $0x898] sm:$0xff] }
 0x178   :  { %v6895_v47 = vcombine.low %v923_v35, %v925_v36  ;;  %v7901_v27 = vld [vmem:[%s10629_s3 + $0x178] sm:$0xff]  }
 0x179   :  { %1282 = vmatpush1.bf16.msra.mxu0 %v6863_v41  ;;  %1323 = vmatpush1.bf16.msra.mxu1 %v6865_v42  ;;  %v6896_v41 = vcombine.high %v923_v35, %v925_v36  ;;  %v6898_v42 = vcombine.high %v924_v37, %v926_v38  ;;  %v7902_v28 = vld [vmem:[%s10629_s3 + $0x1f8] sm:$0xff]   ;;  %v7909_v35 = vld [vmem:[%s10629_s3 + $0x168] sm:$0xff]  }
 0x17a   :  { %1283 = vmatprep.subr.bf16.mxu0 %v6860_v43  ;;  %1324 = vmatprep.subr.bf16.mxu1 %v6862_v44  ;;  %v919_v43 = vld [vmem:[%s10627_s1 + $0xc10] sm:$0xff]  ;;  %v7903_v29 = vld [vmem:[%s10629_s3 + $0x138] sm:$0xff]   ;;  %v7910_v36 = vld [vmem:[%s10629_s3 + $0x1e8] sm:$0xff]  }
 0x17b   :  { %v921_v44 = vld [vmem:[%s10627_s1 + $0xc90] sm:$0xff]  ;;  %v7904_v30 = vld [vmem:[%s10629_s3 + $0x1b8] sm:$0xff]   ;;  %v7911_v37 = vld [vmem:[%s10629_s3 + $0x128] sm:$0xff]  }
 0x17c   :  { %v6891_v55 = vcombine.low %v919_v43, %v921_v44  ;;  %v7912_v38 = vld [vmem:[%s10629_s3 + $0x1a8] sm:$0xff]  }
 0x17d   :  { %1284 = vmatpush1.bf16.msra.mxu0 %v6859_v49  ;;  %1325 = vmatpush1.bf16.msra.mxu1 %v6861_v50  ;;  %v6892_v49 = vcombine.high %v919_v43, %v921_v44  ;;  %v6894_v50 = vcombine.high %v920_v45, %v922_v46  ;;  %v7917_v43 = vld [vmem:[%s10629_s3 + $0x158] sm:$0xff]  }
 0x17e   :  { %1285 = vmatprep.subr.bf16.mxu0 %v6856_v51  ;;  %1326 = vmatprep.subr.bf16.mxu1 %v6858_v52  ;;  %v915_v51 = vld [vmem:[%s10627_s1 + $0xb10] sm:$0xff]  ;;  %v7918_v44 = vld [vmem:[%s10629_s3 + $0x1d8] sm:$0xff]  }
 0x17f   :  { %v917_v52 = vld [vmem:[%s10627_s1 + $0xb90] sm:$0xff]  ;;  %v7919_v45 = vld [vmem:[%s10629_s3 + $0x118] sm:$0xff]  }
 0x180   :  { %v6887_v3 = vcombine.low %v915_v51, %v917_v52  ;;  %v7920_v46 = vld [vmem:[%s10629_s3 + $0x198] sm:$0xff]  }
 0x181   :  { %1286 = vmatpush1.bf16.msra.mxu0 %v6855_v61  ;;  %1327 = vmatpush1.bf16.msra.mxu1 %v6857_v62  ;;  %v6888_v61 = vcombine.high %v915_v51, %v917_v52  ;;  %v6890_v62 = vcombine.high %v916_v53, %v918_v54  ;;  %v7925_v51 = vld [vmem:[%s10629_s3 + $0x148] sm:$0xff]  }
 0x182   :  { %1287 = vmatprep.subr.bf16.mxu0 %v6852_v63  ;;  %1328 = vmatprep.subr.bf16.mxu1 %v6854_v0  ;;  %v911_v63 = vld [vmem:[%s10627_s1 + $0xa10] sm:$0xff]  ;;  %v7926_v52 = vld [vmem:[%s10629_s3 + $0x1c8] sm:$0xff]  }
 0x183   :  { %v913_v0 = vld [vmem:[%s10627_s1 + $0xa90] sm:$0xff]  ;;  %v7927_v53 = vld [vmem:[%s10629_s3 + $0x108] sm:$0xff]  }
 0x184   :  { %v6883_v11 = vcombine.low %v911_v63, %v913_v0  ;;  %v7928_v54 = vld [vmem:[%s10629_s3 + $0x188] sm:$0xff]  }
 0x185   :  { %1288 = vmatpush1.bf16.msra.mxu0 %v6851_v5  ;;  %1329 = vmatpush1.bf16.msra.mxu1 %v6853_v6  ;;  %v6884_v5 = vcombine.high %v911_v63, %v913_v0  ;;  %v6886_v6 = vcombine.high %v912_v1, %v914_v2  ;;  %v1734_v63 = vld [vmem:[%s10627_s1 + $0x720] sm:$0xff]  ;;  %v1735_v1 = vld [vmem:[%s10627_s1 + $0x728] sm:$0xff] }
 0x186   :  { %1289 = vmatprep.subr.bf16.mxu0 %v6848_v7  ;;  %1330 = vmatprep.subr.bf16.mxu1 %v6850_v8  ;;  %v907_v7 = vld [vmem:[%s10627_s1 + $0x910] sm:$0xff]  ;;  %v1736_v0 = vld [vmem:[%s10627_s1 + $0x7a0] sm:$0xff] }
 0x187   :  { %v909_v8 = vld [vmem:[%s10627_s1 + $0x990] sm:$0xff]  ;;  %v6968_v2 = vcombine.high %v1734_v63, %v1736_v0 }
 0x188   :  { %v6879_v21 = vcombine.low %v907_v7, %v909_v8 }
 0x189   :  { %1290 = vmatpush1.bf16.msra.mxu0 %v6847_v13  ;;  %1331 = vmatpush1.bf16.msra.mxu1 %v6849_v14  ;;  %v6880_v13 = vcombine.high %v907_v7, %v909_v8  ;;  %v6882_v14 = vcombine.high %v908_v9, %v910_v10 }
 0x18a   :  { %1291 = vmatprep.subr.bf16.mxu0 %v6844_v15  ;;  %1332 = vmatprep.subr.bf16.mxu1 %v6846_v16  ;;  %v903_v15 = vld [vmem:[%s10627_s1 + $0x810] sm:$0xff] }
 0x18b   :  { %v905_v16 = vld [vmem:[%s10627_s1 + $0x890] sm:$0xff] }
 0x18d   :  { %1292 = vmatpush1.bf16.msra.mxu0 %v6843_v23  ;;  %1333 = vmatpush1.bf16.msra.mxu1 %v6845_v24  ;;  %v6876_v23 = vcombine.high %v903_v15, %v905_v16  ;;  %v6878_v24 = vcombine.high %v904_v17, %v906_v20 }
 0x18e   :  { %1293 = vmatprep.subr.bf16.mxu0 %v6904_v25  ;;  %1334 = vmatprep.subr.bf16.mxu1 %v6906_v26  ;;  %v6875_v25 = vcombine.low %v903_v15, %v905_v16  ;;  %v6877_v26 = vcombine.low %v904_v17, %v906_v20  ;;  %v935_v20 = vld [vmem:[%s10628_s2 + $0x4] sm:$0xf] }
 0x191   :  { %1294 = vmatpush2.bf16.msra.mxu0 %v6903_v31  ;;  %1335 = vmatpush2.bf16.msra.mxu1 %v6905_v32  ;;  %v7905_v31 = vld [vmem:[%s10629_s3 + $0x170] sm:$0xff]  }
 0x192   :  { %1295 = vmatprep.subr.bf16.mxu0 %v6900_v33  ;;  %1336 = vmatprep.subr.bf16.mxu1 %v6902_v34  ;;  %v7906_v32 = vld [vmem:[%s10629_s3 + $0x1f0] sm:$0xff]  }
 0x193   :  { %v7907_v33 = vld [vmem:[%s10629_s3 + $0x130] sm:$0xff]  }
 0x194   :  { %v7908_v34 = vld [vmem:[%s10629_s3 + $0x1b0] sm:$0xff]  }
 0x195   :  { %1296 = vmatpush2.bf16.msra.mxu0 %v6899_v39  ;;  %1337 = vmatpush2.bf16.msra.mxu1 %v6901_v40  ;;  %v7913_v39 = vld [vmem:[%s10629_s3 + $0x160] sm:$0xff]  }
 0x196   :  { %1297 = vmatprep.subr.bf16.mxu0 %v6896_v41  ;;  %1338 = vmatprep.subr.bf16.mxu1 %v6898_v42  ;;  %v7914_v40 = vld [vmem:[%s10629_s3 + $0x1e0] sm:$0xff]  }
 0x197   :  { %v7915_v41 = vld [vmem:[%s10629_s3 + $0x120] sm:$0xff]  }
 0x198   :  { %v7916_v42 = vld [vmem:[%s10629_s3 + $0x1a0] sm:$0xff]  }
 0x199   :  { %1298 = vmatpush2.bf16.msra.mxu0 %v6895_v47  ;;  %1339 = vmatpush2.bf16.msra.mxu1 %v6897_v48  ;;  %v7921_v47 = vld [vmem:[%s10629_s3 + $0x150] sm:$0xff]  }
 0x19a   :  { %1299 = vmatprep.subr.bf16.mxu0 %v6892_v49  ;;  %1340 = vmatprep.subr.bf16.mxu1 %v6894_v50  ;;  %v7922_v48 = vld [vmem:[%s10629_s3 + $0x1d0] sm:$0xff]  }
 0x19b   :  { %v7923_v49 = vld [vmem:[%s10629_s3 + $0x110] sm:$0xff]  }
 0x19c   :  { %v7924_v50 = vld [vmem:[%s10629_s3 + $0x190] sm:$0xff]  }
 0x19d   :  { %1300 = vmatpush2.bf16.msra.mxu0 %v6891_v55  ;;  %1341 = vmatpush2.bf16.msra.mxu1 %v6893_v58  ;;  %v7929_v55 = vld [vmem:[%s10629_s3 + $0x140] sm:$0xff]  }
 0x19e   :  { %1301 = vmatprep.subr.bf16.mxu0 %v6888_v61  ;;  %1342 = vmatprep.subr.bf16.mxu1 %v6890_v62  ;;  %v7930_v58 = vld [vmem:[%s10629_s3 + $0x1c0] sm:$0xff]  }
 0x19f   :  { %v7931_v61 = vld [vmem:[%s10629_s3 + $0x100] sm:$0xff]  }
 0x1a0   :  { %v7932_v62 = vld [vmem:[%s10629_s3 + $0x180] sm:$0xff]  }
 0x1a1   :  { %1302 = vmatpush2.bf16.msra.mxu0 %v6887_v3  ;;  %1343 = vmatpush2.bf16.msra.mxu1 %v6889_v4  ;;  %v1737_v3 = vld [vmem:[%s10627_s1 + $0x7a8] sm:$0xff]  ;;  %v6967_v4 = vcombine.low %v1734_v63, %v1736_v0  ;;  %v1722_v63 = vld [vmem:[%s10627_s1 + $0x420] sm:$0xff] }
 0x1a2   :  { %1303 = vmatprep.subr.bf16.mxu0 %v6884_v5  ;;  %1344 = vmatprep.subr.bf16.mxu1 %v6886_v6  ;;  %v6969_v5 = vcombine.low %v1735_v1, %v1737_v3  ;;  %v6970_v6 = vcombine.high %v1735_v1, %v1737_v3  ;;  %v1724_v0 = vld [vmem:[%s10627_s1 + $0x4a0] sm:$0xff]  ;;  %v1723_v1 = vld [vmem:[%s10627_s1 + $0x428] sm:$0xff] }
 0x1a5   :  { %1304 = vmatpush2.bf16.msra.mxu0 %v6883_v11  ;;  %1345 = vmatpush2.bf16.msra.mxu1 %v6885_v12 }
 0x1a6   :  { %1305 = vmatprep.subr.bf16.mxu0 %v6880_v13  ;;  %1346 = vmatprep.subr.bf16.mxu1 %v6882_v14 }
 0x1a9   :  { %1306 = vmatpush2.bf16.msra.mxu0 %v6879_v21  ;;  %1347 = vmatpush2.bf16.msra.mxu1 %v6881_v22  ;;  %v940_v21 = vrot.slane %v935_v20, %v8506_v56  ;;  %v948_v22 = vrot.slane %v935_v20, %v8508_v57 }
 0x1aa   :  { %1307 = vmatprep.subr.bf16.mxu0 %v6876_v23  ;;  %1348 = vmatprep.subr.bf16.mxu1 %v6878_v24  ;;  %v944_v23 = vrot.slane %v935_v20, %v8513_v59  ;;  %v952_v24 = vrot.slane %v935_v20, %v8515_v60  ;;  %v1715_v20 = vld [vmem:[%s10627_s1 + $0x228] sm:$0xff] }
 0x1ad   :  { %1308 = vmatpush2.bf16.msra.mxu0 %v6875_v25  ;;  %1349 = vmatpush2.bf16.msra.mxu1 %v6877_v26 }
 0x1ae   :  { %7560 = vmatprep.subr.bf16.mxu0 %v7901_v27  ;;  %7582 = vmatprep.subr.bf16.mxu1 %v7902_v28 }
 0x1b0   :  { %1310 = vmatmul.mubr.bf16.vlgmr.msra.gmra.mxu0 %v8408_v18  ;;  %1351 = vmatmul.mubr.bf16.vlgmr.msra.gmra.mxu1 %v8408_v18 }
 0x1b1   :  { %7561 = vmatpush3.bf16.msra.mxu0 %v7903_v29  ;;  %7583 = vmatpush3.bf16.msra.mxu1 %v7904_v30 }
 0x1b2   :  { %7562 = vmatprep.subr.bf16.mxu0 %v7905_v31  ;;  %7584 = vmatprep.subr.bf16.mxu1 %v7906_v32 }
 0x1b5   :  { %7563 = vmatpush3.bf16.msra.mxu0 %v7907_v33  ;;  %7585 = vmatpush3.bf16.msra.mxu1 %v7908_v34 }
 0x1b6   :  { %7564 = vmatprep.subr.bf16.mxu0 %v7909_v35  ;;  %7586 = vmatprep.subr.bf16.mxu1 %v7910_v36 }
 0x1b9   :  { %7565 = vmatpush3.bf16.msra.mxu0 %v7911_v37  ;;  %7587 = vmatpush3.bf16.msra.mxu1 %v7912_v38 }
 0x1ba   :  { %7566 = vmatprep.subr.bf16.mxu0 %v7913_v39  ;;  %7588 = vmatprep.subr.bf16.mxu1 %v7914_v40  ;;  %v1730_v39 = vld [vmem:[%s10627_s1 + $0x620] sm:$0xff] }
 0x1bd   :  { %7567 = vmatpush3.bf16.msra.mxu0 %v7915_v41  ;;  %7589 = vmatpush3.bf16.msra.mxu1 %v7916_v42  ;;  %v1732_v42 = vld [vmem:[%s10627_s1 + $0x6a0] sm:$0xff] }
 0x1be   :  { %7568 = vmatprep.subr.bf16.mxu0 %v7917_v43  ;;  %7590 = vmatprep.subr.bf16.mxu1 %v7918_v44  ;;  %v1731_v43 = vld [vmem:[%s10627_s1 + $0x628] sm:$0xff] }
 0x1bf   :  { %v1733_v44 = vld [vmem:[%s10627_s1 + $0x6a8] sm:$0xff] }
 0x1c1   :  { %7569 = vmatpush3.bf16.msra.mxu0 %v7919_v45  ;;  %7591 = vmatpush3.bf16.msra.mxu1 %v7920_v46 }
 0x1c2   :  { %7570 = vmatprep.subr.bf16.mxu0 %v7921_v47  ;;  %7592 = vmatprep.subr.bf16.mxu1 %v7922_v48 }
 0x1c5   :  { %7571 = vmatpush3.bf16.msra.mxu0 %v7923_v49  ;;  %7593 = vmatpush3.bf16.msra.mxu1 %v7924_v50  ;;  %v1726_v49 = vld [vmem:[%s10627_s1 + $0x520] sm:$0xff]  ;;  %v6964_v50 = vcombine.high %v1730_v39, %v1732_v42 }
 0x1c6   :  { %7572 = vmatprep.subr.bf16.mxu0 %v7925_v51  ;;  %7594 = vmatprep.subr.bf16.mxu1 %v7926_v52  ;;  %v6966_v51 = vcombine.high %v1731_v43, %v1733_v44  ;;  %v1728_v52 = vld [vmem:[%s10627_s1 + $0x5a0] sm:$0xff] }
 0x1c7   :  { %v6959_v3 = vcombine.low %v1726_v49, %v1728_v52 }
 0x1c9   :  { %7573 = vmatpush3.bf16.msra.mxu0 %v7927_v53  ;;  %7595 = vmatpush3.bf16.msra.mxu1 %v7928_v54  ;;  %v1727_v53 = vld [vmem:[%s10627_s1 + $0x528] sm:$0xff] }
 0x1ca   :  { %7574 = vmatprep.subr.bf16.mxu0 %v7929_v55  ;;  %7596 = vmatprep.subr.bf16.mxu1 %v7930_v58  ;;  %v1729_v54 = vld [vmem:[%s10627_s1 + $0x5a8] sm:$0xff]  ;;  %v6963_v55 = vcombine.low %v1730_v39, %v1732_v42  ;;  %v6965_v58 = vcombine.low %v1731_v43, %v1733_v44  ;;  %v1766_v42 = vld [vmem:[%s10627_s1 + $0xf20] sm:$0xff] }
 0x1cb   :  { %v1768_v43 = vld [vmem:[%s10627_s1 + $0xfa0] sm:$0xff]  ;;  %v1767_v44 = vld [vmem:[%s10627_s1 + $0xf28] sm:$0xff] }
 0x1cd   :  { %7575 = vmatpush3.bf16.msra.mxu0 %v7931_v61  ;;  %7597 = vmatpush3.bf16.msra.mxu1 %v7932_v62  ;;  %v6960_v61 = vcombine.high %v1726_v49, %v1728_v52  ;;  %v6962_v62 = vcombine.high %v1727_v53, %v1729_v54  ;;  %v1763_v52 = vld [vmem:[%s10627_s1 + $0xe28] sm:$0xff] }
 0x1ce   :  { %2112 = vmatprep.subr.bf16.mxu0 %v6968_v2  ;;  %2153 = vmatprep.subr.bf16.mxu1 %v6970_v6  ;;  %v1725_v2 = vld [vmem:[%s10627_s1 + $0x4a8] sm:$0xff] }
 0x1cf   :  { %v6958_v6 = vcombine.high %v1723_v1, %v1725_v2 }
 0x230   :  { %v7532_v7 = vpop.f32.mrf.mxu0  ;;  %v7554_v8 = vpop.f32.mrf.mxu1 }
 0x232   :  { %v7533_v9 = vpop.f32.mrf.mxu0  ;;  %v7555_v10 = vpop.f32.mrf.mxu1 }
 0x233   :  { %v7534_v11 = vadd.f32 %v7533_v9, %v7532_v7  ;;  %v7556_v12 = vadd.f32 %v7555_v10, %v7554_v8  ;;  %v1718_v7 = vld [vmem:[%s10627_s1 + $0x320] sm:$0xff]  ;;  %v1719_v9 = vld [vmem:[%s10627_s1 + $0x328] sm:$0xff] }
 0x234   :  { %v7535_v13 = vpop.f32.mrf.mxu0  ;;  %v7557_v14 = vpop.f32.mrf.mxu1  ;;  %v1720_v8 = vld [vmem:[%s10627_s1 + $0x3a0] sm:$0xff]  ;;  %v1721_v10 = vld [vmem:[%s10627_s1 + $0x3a8] sm:$0xff] }
 0x235   :  { %v8813_v15 = vadd.f32 %v7556_v12, %v7534_v11  ;;  %v6955_v11 = vcombine.low %v1722_v63, %v1724_v0  ;;  %v6957_v12 = vcombine.low %v1723_v1, %v1725_v2  ;;  %v6952_v13 = vcombine.high %v1718_v7, %v1720_v8  ;;  %v1761_v1 = vld [vmem:[%s10627_s1 + $0xda8] sm:$0xff] }
 0x236   :  { %v7536_v16 = vpop.f32.mrf.mxu0  ;;  %v7558_v17 = vpop.f32.mrf.mxu1  ;;  %v6954_v14 = vcombine.high %v1719_v9, %v1721_v10 }
 0x237   :  { %v1714_v16 = vld [vmem:[%s10627_s1 + $0x220] sm:$0xff] }
 0x238   :  { %v1716_v17 = vld [vmem:[%s10627_s1 + $0x2a0] sm:$0xff] }
 0x270   :  { %v1311_v25 = vpop.f32.mrf.mxu0  ;;  %v1352_v26 = vpop.f32.mrf.mxu1 }
 0x271   :  { %v1312_v27 = vadd.f32 %v1311_v25, %v940_v21  ;;  %v1353_v28 = vadd.f32 %v1352_v26, %v948_v22  ;;  %v1717_v21 = vld [vmem:[%s10627_s1 + $0x2a8] sm:$0xff]  ;;  %v6951_v22 = vcombine.low %v1718_v7, %v1720_v8  ;;  %v1710_v26 = vld [vmem:[%s10627_s1 + $0x120] sm:$0xff] }
 0x272   :  { %v1313_v29 = vpop.f32.mrf.mxu0  ;;  %v1354_v30 = vpop.f32.mrf.mxu1  ;;  %v6950_v25 = vcombine.high %v1715_v20, %v1717_v21  ;;  %v1756_v7 = vld [vmem:[%s10627_s1 + $0xca0] sm:$0xff]  ;;  %v1755_v8 = vld [vmem:[%s10627_s1 + $0xc28] sm:$0xff] }
 0x273   :  { %v1314_v31 = vadd.f32 %v1313_v29, %v944_v23  ;;  %v1355_v32 = vadd.f32 %v1354_v30, %v952_v24  ;;  %v1359_v33 = vmax.f32 %v1312_v27, 0.0  ;;  %v1361_v34 = vmax.f32 %v1353_v28, 0.0  ;;  %v1712_v27 = vld [vmem:[%s10627_s1 + $0x1a0] sm:$0xff]  ;;  %v1711_v28 = vld [vmem:[%s10627_s1 + $0x128] sm:$0xff] }
 0x274   :  { %v1315_v35 = vpop.f32.mrf.mxu0  ;;  %v1356_v36 = vpop.f32.mrf.mxu1  ;;  %v6953_v23 = vcombine.low %v1719_v9, %v1721_v10  ;;  %v6948_v24 = vcombine.high %v1714_v16, %v1716_v17  ;;  %v1713_v29 = vld [vmem:[%s10627_s1 + $0x1a8] sm:$0xff]  ;;  %v6947_v30 = vcombine.low %v1714_v16, %v1716_v17  ;;  %v1752_v16 = vld [vmem:[%s10627_s1 + $0xba0] sm:$0xff] }
 0x275   :  { %v1360_v37 = vmax.f32 %v1314_v31, 0.0  ;;  %v1362_v38 = vmax.f32 %v1355_v32, 0.0  ;;  %v1364_v47 = vpack.c.bf16 %v1359_v33, %v1359_v33  ;;  %v1366_v48 = vpack.c.bf16 %v1361_v34, %v1361_v34  ;;  %v1706_v34 = vld [vmem:[%s10627_s1 + $0x20] sm:$0xff]  ;;  %v1707_v36 = vld [vmem:[%s10627_s1 + $0x28] sm:$0xff] }
 0x276   :  { %v1316_v40 = vpop.f32.mrf.mxu0  ;;  %v1357_v41 = vpop.f32.mrf.mxu1  ;;  %v6949_v31 = vcombine.low %v1715_v20, %v1717_v21  ;;  %v6944_v32 = vcombine.high %v1710_v26, %v1712_v27  ;;  %v6946_v33 = vcombine.high %v1711_v28, %v1713_v29  ;;  %v1708_v35 = vld [vmem:[%s10627_s1 + $0xa0] sm:$0xff]  ;;  %v6945_v39 = vcombine.low %v1711_v28, %v1713_v29  ;;  %v1757_v9 = vld [vmem:[%s10627_s1 + $0xca8] sm:$0xff] }
 0x277   :  { %v1365_v45 = vpack.c.bf16 %v1360_v37, %v1360_v37  ;;  %v1367_v46 = vpack.c.bf16 %v1362_v38, %v1362_v38  ;;  %v1709_v37 = vld [vmem:[%s10627_s1 + $0xa8] sm:$0xff]  ;;  %v6943_v38 = vcombine.low %v1710_v26, %v1712_v27  ;;  %v6940_v40 = vcombine.high %v1706_v34, %v1708_v35  ;;  %v1748_v26 = vld [vmem:[%s10627_s1 + $0xaa0] sm:$0xff] }
 0x278   :  { %v6942_v41 = vcombine.high %v1707_v36, %v1709_v37  ;;  %v1751_v17 = vld [vmem:[%s10627_s1 + $0xb28] sm:$0xff] }
 0x279   :  { %1656 = vmatprep.mubr.bf16.mxu0 %v1365_v45  ;;  %1696 = vmatprep.mubr.bf16.mxu1 %v1367_v46  ;;  %v1769_v45 = vld [vmem:[%s10627_s1 + $0xfa8] sm:$0xff]  ;;  %v6939_v46 = vcombine.low %v1706_v34, %v1708_v35  ;;  %v1744_v34 = vld [vmem:[%s10627_s1 + $0x9a0] sm:$0xff] }
 0x27a   :  { %1657 = vmatmul.mubr.bf16.vlgmr.msra.gmra.mxu0 %v1364_v47  ;;  %1697 = vmatmul.mubr.bf16.vlgmr.msra.gmra.mxu1 %v1366_v48  ;;  %v6941_v47 = vcombine.low %v1707_v36, %v1709_v37  ;;  %v7000_v48 = vcombine.high %v1766_v42, %v1768_v43  ;;  %v7002_v49 = vcombine.high %v1767_v44, %v1769_v45  ;;  %v1753_v20 = vld [vmem:[%s10627_s1 + $0xba8] sm:$0xff] }
 0x27b   :  { %2113 = vmatpush1.bf16.msra.mxu0 %v6967_v4  ;;  %2154 = vmatpush1.bf16.msra.mxu1 %v6969_v5  ;;  %v6961_v4 = vcombine.low %v1727_v53, %v1729_v54  ;;  %v6956_v5 = vcombine.high %v1722_v63, %v1724_v0  ;;  %v1765_v53 = vld [vmem:[%s10627_s1 + $0xea8] sm:$0xff]  ;;  %v6999_v54 = vcombine.low %v1766_v42, %v1768_v43  ;;  %v1760_v63 = vld [vmem:[%s10627_s1 + $0xda0] sm:$0xff] }
 0x27c   :  { %2144 = vmatprep.mubr.bf16.mxu0 %v8410_v19  ;;  %2185 = vmatprep.mubr.bf16.mxu1 %v8410_v19  ;;  %v1759_v0 = vld [vmem:[%s10627_s1 + $0xd28] sm:$0xff]  ;;  %v1740_v42 = vld [vmem:[%s10627_s1 + $0x8a0] sm:$0xff] }
 0x27d   :  { %2114 = vmatprep.subr.bf16.mxu0 %v6964_v50  ;;  %2155 = vmatprep.subr.bf16.mxu1 %v6966_v51  ;;  %v1762_v50 = vld [vmem:[%s10627_s1 + $0xe20] sm:$0xff]  ;;  %v1747_v27 = vld [vmem:[%s10627_s1 + $0xa28] sm:$0xff] }
 0x27e   :  { %v1764_v51 = vld [vmem:[%s10627_s1 + $0xea0] sm:$0xff]  ;;  %v1749_v28 = vld [vmem:[%s10627_s1 + $0xaa8] sm:$0xff] }
 0x27f   :  { %2115 = vmatpush1.bf16.msra.mxu0 %v6963_v55  ;;  %2156 = vmatpush1.bf16.msra.mxu1 %v6965_v58  ;;  %v7001_v55 = vcombine.low %v1767_v44, %v1769_v45  ;;  %v6996_v58 = vcombine.high %v1762_v50, %v1764_v51  ;;  %v6995_v2 = vcombine.low %v1762_v50, %v1764_v51  ;;  %v1743_v35 = vld [vmem:[%s10627_s1 + $0x928] sm:$0xff]  ;;  %v7933_v51 = vld [vmem:[%s10629_s3 + $0x278] sm:$0xff]  }
 0x280   :  { %2116 = vmatprep.subr.bf16.mxu0 %v6960_v61  ;;  %2157 = vmatprep.subr.bf16.mxu1 %v6962_v62  ;;  %v6998_v61 = vcombine.high %v1763_v52, %v1765_v53  ;;  %v1758_v62 = vld [vmem:[%s10627_s1 + $0xd20] sm:$0xff]  ;;  %v1745_v36 = vld [vmem:[%s10627_s1 + $0x9a8] sm:$0xff] }
 0x281   :  { %v6991_v10 = vcombine.low %v1758_v62, %v1760_v63  ;;  %v1739_v43 = vld [vmem:[%s10627_s1 + $0x828] sm:$0xff] }
 0x282   :  { %v1741_v44 = vld [vmem:[%s10627_s1 + $0x8a8] sm:$0xff] }
 0x283   :  { %2117 = vmatpush1.bf16.msra.mxu0 %v6959_v3  ;;  %2158 = vmatpush1.bf16.msra.mxu1 %v6961_v4  ;;  %v6997_v3 = vcombine.low %v1763_v52, %v1765_v53  ;;  %v6992_v4 = vcombine.high %v1758_v62, %v1760_v63  ;;  %v6973_v50 = vcombine.low %v1739_v43, %v1741_v44  ;;  %v7934_v52 = vld [vmem:[%s10629_s3 + $0x2f8] sm:$0xff]   ;;  %v7940_v62 = vld [vmem:[%s10629_s3 + $0x2b0] sm:$0xff]   ;;  %v7941_v63 = vld [vmem:[%s10629_s3 + $0x268] sm:$0xff]  }
 0x284   :  { %2118 = vmatprep.subr.bf16.mxu0 %v6956_v5  ;;  %2159 = vmatprep.subr.bf16.mxu1 %v6958_v6  ;;  %v6994_v5 = vcombine.high %v1759_v0, %v1761_v1  ;;  %v1754_v6 = vld [vmem:[%s10627_s1 + $0xc20] sm:$0xff]  ;;  %v7935_v53 = vld [vmem:[%s10629_s3 + $0x238] sm:$0xff]  }
 0x285   :  { %v6987_v21 = vcombine.low %v1754_v6, %v1756_v7 }
 0x287   :  { %2119 = vmatpush1.bf16.msra.mxu0 %v6955_v11  ;;  %2160 = vmatpush1.bf16.msra.mxu1 %v6957_v12  ;;  %v6993_v11 = vcombine.low %v1759_v0, %v1761_v1  ;;  %v6988_v12 = vcombine.high %v1754_v6, %v1756_v7  ;;  %v7942_v0 = vld [vmem:[%s10629_s3 + $0x2e8] sm:$0xff]   ;;  %v7948_v6 = vld [vmem:[%s10629_s3 + $0x2a0] sm:$0xff]   ;;  %v7949_v7 = vld [vmem:[%s10629_s3 + $0x258] sm:$0xff]  }
 0x288   :  { %2120 = vmatprep.subr.bf16.mxu0 %v6952_v13  ;;  %2161 = vmatprep.subr.bf16.mxu1 %v6954_v14  ;;  %v6990_v13 = vcombine.high %v1755_v8, %v1757_v9  ;;  %v1750_v14 = vld [vmem:[%s10627_s1 + $0xb20] sm:$0xff]  ;;  %v7943_v1 = vld [vmem:[%s10629_s3 + $0x228] sm:$0xff]  }
 0x289   :  { %v6983_v29 = vcombine.low %v1750_v14, %v1752_v16 }
 0x28b   :  { %2121 = vmatpush1.bf16.msra.mxu0 %v6951_v22  ;;  %2162 = vmatpush1.bf16.msra.mxu1 %v6953_v23  ;;  %v6989_v22 = vcombine.low %v1755_v8, %v1757_v9  ;;  %v6984_v23 = vcombine.high %v1750_v14, %v1752_v16  ;;  %v7950_v8 = vld [vmem:[%s10629_s3 + $0x2d8] sm:$0xff]   ;;  %v7956_v14 = vld [vmem:[%s10629_s3 + $0x290] sm:$0xff]   ;;  %v7957_v16 = vld [vmem:[%s10629_s3 + $0x248] sm:$0xff]  }
 0x28c   :  { %2122 = vmatprep.subr.bf16.mxu0 %v6948_v24  ;;  %2163 = vmatprep.subr.bf16.mxu1 %v6950_v25  ;;  %v6986_v24 = vcombine.high %v1751_v17, %v1753_v20  ;;  %v1746_v25 = vld [vmem:[%s10627_s1 + $0xa20] sm:$0xff]  ;;  %v7951_v9 = vld [vmem:[%s10629_s3 + $0x218] sm:$0xff]  }
 0x28d   :  { %v6979_v37 = vcombine.low %v1746_v25, %v1748_v26 }
 0x28f   :  { %2123 = vmatpush1.bf16.msra.mxu0 %v6947_v30  ;;  %2164 = vmatpush1.bf16.msra.mxu1 %v6949_v31  ;;  %v6985_v30 = vcombine.low %v1751_v17, %v1753_v20  ;;  %v6980_v31 = vcombine.high %v1746_v25, %v1748_v26  ;;  %v7958_v17 = vld [vmem:[%s10629_s3 + $0x2c8] sm:$0xff]   ;;  %v7964_v25 = vld [vmem:[%s10629_s3 + $0x280] sm:$0xff]   ;;  %v2569_v26 = vld [vmem:[%s10627_s1 + $0x730] sm:$0xff] }
 0x290   :  { %2124 = vmatprep.subr.bf16.mxu0 %v6944_v32  ;;  %2165 = vmatprep.subr.bf16.mxu1 %v6946_v33  ;;  %v6982_v32 = vcombine.high %v1747_v27, %v1749_v28  ;;  %v1742_v33 = vld [vmem:[%s10627_s1 + $0x920] sm:$0xff]  ;;  %v7959_v20 = vld [vmem:[%s10629_s3 + $0x208] sm:$0xff]  }
 0x291   :  { %v6975_v45 = vcombine.low %v1742_v33, %v1744_v34 }
 0x293   :  { %2125 = vmatpush1.bf16.msra.mxu0 %v6943_v38  ;;  %2166 = vmatpush1.bf16.msra.mxu1 %v6945_v39  ;;  %v6981_v38 = vcombine.low %v1747_v27, %v1749_v28  ;;  %v6976_v39 = vcombine.high %v1742_v33, %v1744_v34  ;;  %v2571_v27 = vld [vmem:[%s10627_s1 + $0x7b0] sm:$0xff]  ;;  %v2570_v28 = vld [vmem:[%s10627_s1 + $0x738] sm:$0xff] }
 0x294   :  { %2126 = vmatprep.subr.bf16.mxu0 %v6940_v40  ;;  %2167 = vmatprep.subr.bf16.mxu1 %v6942_v41  ;;  %v6978_v40 = vcombine.high %v1743_v35, %v1745_v36  ;;  %v1738_v41 = vld [vmem:[%s10627_s1 + $0x820] sm:$0xff] }
 0x297   :  { %2127 = vmatpush1.bf16.msra.mxu0 %v6939_v46  ;;  %2168 = vmatpush1.bf16.msra.mxu1 %v6941_v47  ;;  %v6977_v46 = vcombine.low %v1743_v35, %v1745_v36  ;;  %v6972_v47 = vcombine.high %v1738_v41, %v1740_v42 }
 0x298   :  { %2128 = vmatprep.subr.bf16.mxu0 %v7000_v48  ;;  %2169 = vmatprep.subr.bf16.mxu1 %v7002_v49  ;;  %v6974_v48 = vcombine.high %v1739_v43, %v1741_v44  ;;  %v6971_v49 = vcombine.low %v1738_v41, %v1740_v42 }
 0x29b   :  { %2129 = vmatpush2.bf16.msra.mxu0 %v6999_v54  ;;  %2170 = vmatpush2.bf16.msra.mxu1 %v7001_v55  ;;  %v7936_v54 = vld [vmem:[%s10629_s3 + $0x2b8] sm:$0xff]   ;;  %v7937_v55 = vld [vmem:[%s10629_s3 + $0x270] sm:$0xff]  }
 0x29c   :  { %2130 = vmatprep.subr.bf16.mxu0 %v6996_v58  ;;  %2171 = vmatprep.subr.bf16.mxu1 %v6998_v61  ;;  %v7938_v58 = vld [vmem:[%s10629_s3 + $0x2f0] sm:$0xff]  }
 0x29d   :  { %v7939_v61 = vld [vmem:[%s10629_s3 + $0x230] sm:$0xff]  }
 0x29f   :  { %2131 = vmatpush2.bf16.msra.mxu0 %v6995_v2  ;;  %2172 = vmatpush2.bf16.msra.mxu1 %v6997_v3  ;;  %v7944_v2 = vld [vmem:[%s10629_s3 + $0x2a8] sm:$0xff]   ;;  %v7945_v3 = vld [vmem:[%s10629_s3 + $0x260] sm:$0xff]  }
 0x2a0   :  { %2132 = vmatprep.subr.bf16.mxu0 %v6992_v4  ;;  %2173 = vmatprep.subr.bf16.mxu1 %v6994_v5  ;;  %v7946_v4 = vld [vmem:[%s10629_s3 + $0x2e0] sm:$0xff]  }
 0x2a1   :  { %v7947_v5 = vld [vmem:[%s10629_s3 + $0x220] sm:$0xff]  }
 0x2a3   :  { %2133 = vmatpush2.bf16.msra.mxu0 %v6991_v10  ;;  %2174 = vmatpush2.bf16.msra.mxu1 %v6993_v11  ;;  %v7952_v10 = vld [vmem:[%s10629_s3 + $0x298] sm:$0xff]   ;;  %v7953_v11 = vld [vmem:[%s10629_s3 + $0x250] sm:$0xff]  }
 0x2a4   :  { %2134 = vmatprep.subr.bf16.mxu0 %v6988_v12  ;;  %2175 = vmatprep.subr.bf16.mxu1 %v6990_v13  ;;  %v7954_v12 = vld [vmem:[%s10629_s3 + $0x2d0] sm:$0xff]  }
 0x2a5   :  { %v7955_v13 = vld [vmem:[%s10629_s3 + $0x210] sm:$0xff]  }
 0x2a7   :  { %2135 = vmatpush2.bf16.msra.mxu0 %v6987_v21  ;;  %2176 = vmatpush2.bf16.msra.mxu1 %v6989_v22  ;;  %v7960_v21 = vld [vmem:[%s10629_s3 + $0x288] sm:$0xff]   ;;  %v7961_v22 = vld [vmem:[%s10629_s3 + $0x240] sm:$0xff]  }
 0x2a8   :  { %2136 = vmatprep.subr.bf16.mxu0 %v6984_v23  ;;  %2177 = vmatprep.subr.bf16.mxu1 %v6986_v24  ;;  %v7962_v23 = vld [vmem:[%s10629_s3 + $0x2c0] sm:$0xff]  }
 0x2a9   :  { %v7963_v24 = vld [vmem:[%s10629_s3 + $0x200] sm:$0xff]  }
 0x2ab   :  { %2137 = vmatpush2.bf16.msra.mxu0 %v6983_v29  ;;  %2178 = vmatpush2.bf16.msra.mxu1 %v6985_v30  ;;  %v7064_v29 = vcombine.high %v2569_v26, %v2571_v27  ;;  %v2572_v30 = vld [vmem:[%s10627_s1 + $0x7b8] sm:$0xff] }
 0x2ac   :  { %2138 = vmatprep.subr.bf16.mxu0 %v6980_v31  ;;  %2179 = vmatprep.subr.bf16.mxu1 %v6982_v32  ;;  %v7063_v31 = vcombine.low %v2569_v26, %v2571_v27  ;;  %v7065_v32 = vcombine.low %v2570_v28, %v2572_v30  ;;  %v7066_v33 = vcombine.high %v2570_v28, %v2572_v30  ;;  %v2557_v27 = vld [vmem:[%s10627_s1 + $0x430] sm:$0xff]  ;;  %v2560_v30 = vld [vmem:[%s10627_s1 + $0x4b8] sm:$0xff] }
 0x2ad   :  { %v2559_v28 = vld [vmem:[%s10627_s1 + $0x4b0] sm:$0xff] }
 0x2af   :  { %2139 = vmatpush2.bf16.msra.mxu0 %v6979_v37  ;;  %2180 = vmatpush2.bf16.msra.mxu1 %v6981_v38 }
 0x2b0   :  { %2140 = vmatprep.subr.bf16.mxu0 %v6976_v39  ;;  %2181 = vmatprep.subr.bf16.mxu1 %v6978_v40 }
 0x2b3   :  { %2141 = vmatpush2.bf16.msra.mxu0 %v6975_v45  ;;  %2182 = vmatpush2.bf16.msra.mxu1 %v6977_v46  ;;  %v1770_v46 = vld [vmem:[%s10628_s2 + $0x8] sm:$0xf] }
 0x2b4   :  { %2142 = vmatprep.subr.bf16.mxu0 %v6972_v47  ;;  %2183 = vmatprep.subr.bf16.mxu1 %v6974_v48  ;;  %v1775_v47 = vrot.slane %v1770_v46, %v8506_v56  ;;  %v1783_v48 = vrot.slane %v1770_v46, %v8508_v57 }
 0x2b7   :  { %2143 = vmatpush2.bf16.msra.mxu0 %v6971_v49  ;;  %2184 = vmatpush2.bf16.msra.mxu1 %v6973_v50  ;;  %v1779_v49 = vrot.slane %v1770_v46, %v8513_v59  ;;  %v1787_v50 = vrot.slane %v1770_v46, %v8515_v60  ;;  %v2550_v46 = vld [vmem:[%s10627_s1 + $0x238] sm:$0xff] }
 0x2b8   :  { %7604 = vmatprep.subr.bf16.mxu0 %v7933_v51  ;;  %7626 = vmatprep.subr.bf16.mxu1 %v7934_v52 }
 0x2ba   :  { %2145 = vmatmul.mubr.bf16.vlgmr.msra.gmra.mxu0 %v8408_v18  ;;  %2186 = vmatmul.mubr.bf16.vlgmr.msra.gmra.mxu1 %v8408_v18 }
 0x2bb   :  { %7605 = vmatpush3.bf16.msra.mxu0 %v7935_v53  ;;  %7627 = vmatpush3.bf16.msra.mxu1 %v7936_v54 }
 0x2bc   :  { %7606 = vmatprep.subr.bf16.mxu0 %v7937_v55  ;;  %7628 = vmatprep.subr.bf16.mxu1 %v7938_v58 }
 0x2bf   :  { %7607 = vmatpush3.bf16.msra.mxu0 %v7939_v61  ;;  %7629 = vmatpush3.bf16.msra.mxu1 %v7940_v62 }
 0x2c0   :  { %7608 = vmatprep.subr.bf16.mxu0 %v7941_v63  ;;  %7630 = vmatprep.subr.bf16.mxu1 %v7942_v0 }
 0x2c3   :  { %7609 = vmatpush3.bf16.msra.mxu0 %v7943_v1  ;;  %7631 = vmatpush3.bf16.msra.mxu1 %v7944_v2 }
 0x2c4   :  { %7610 = vmatprep.subr.bf16.mxu0 %v7945_v3  ;;  %7632 = vmatprep.subr.bf16.mxu1 %v7946_v4  ;;  %v2565_v4 = vld [vmem:[%s10627_s1 + $0x630] sm:$0xff] }
 0x2c7   :  { %7611 = vmatpush3.bf16.msra.mxu0 %v7947_v5  ;;  %7633 = vmatpush3.bf16.msra.mxu1 %v7948_v6 }
 0x2c8   :  { %7612 = vmatprep.subr.bf16.mxu0 %v7949_v7  ;;  %7634 = vmatprep.subr.bf16.mxu1 %v7950_v8  ;;  %v2567_v7 = vld [vmem:[%s10627_s1 + $0x6b0] sm:$0xff]  ;;  %v2566_v8 = vld [vmem:[%s10627_s1 + $0x638] sm:$0xff] }
 0x2cb   :  { %7613 = vmatpush3.bf16.msra.mxu0 %v7951_v9  ;;  %7635 = vmatpush3.bf16.msra.mxu1 %v7952_v10  ;;  %v2568_v9 = vld [vmem:[%s10627_s1 + $0x6b8] sm:$0xff] }
 0x2cc   :  { %7614 = vmatprep.subr.bf16.mxu0 %v7953_v11  ;;  %7636 = vmatprep.subr.bf16.mxu1 %v7954_v12 }
 0x2cf   :  { %7615 = vmatpush3.bf16.msra.mxu0 %v7955_v13  ;;  %7637 = vmatpush3.bf16.msra.mxu1 %v7956_v14  ;;  %v2561_v14 = vld [vmem:[%s10627_s1 + $0x530] sm:$0xff] }
 0x2d0   :  { %7616 = vmatprep.subr.bf16.mxu0 %v7957_v16  ;;  %7638 = vmatprep.subr.bf16.mxu1 %v7958_v17  ;;  %v7060_v16 = vcombine.high %v2565_v4, %v2567_v7  ;;  %v7062_v17 = vcombine.high %v2566_v8, %v2568_v9 }
 0x2d3   :  { %7617 = vmatpush3.bf16.msra.mxu0 %v7959_v20  ;;  %7639 = vmatpush3.bf16.msra.mxu1 %v7960_v21  ;;  %v2563_v20 = vld [vmem:[%s10627_s1 + $0x5b0] sm:$0xff]  ;;  %v2562_v21 = vld [vmem:[%s10627_s1 + $0x538] sm:$0xff] }
 0x2d4   :  { %7618 = vmatprep.subr.bf16.mxu0 %v7961_v22  ;;  %7640 = vmatprep.subr.bf16.mxu1 %v7962_v23  ;;  %v2564_v22 = vld [vmem:[%s10627_s1 + $0x5b8] sm:$0xff]  ;;  %v7059_v23 = vcombine.low %v2565_v4, %v2567_v7  ;;  %v2601_v7 = vld [vmem:[%s10627_s1 + $0xf30] sm:$0xff] }
 0x2d5   :  { %v7058_v26 = vcombine.high %v2562_v21, %v2564_v22 }
 0x2d7   :  { %7619 = vmatpush3.bf16.msra.mxu0 %v7963_v24  ;;  %7641 = vmatpush3.bf16.msra.mxu1 %v7964_v25  ;;  %v7061_v24 = vcombine.low %v2566_v8, %v2568_v9  ;;  %v7056_v25 = vcombine.high %v2561_v14, %v2563_v20  ;;  %v2603_v8 = vld [vmem:[%s10627_s1 + $0xfb0] sm:$0xff]  ;;  %v2602_v9 = vld [vmem:[%s10627_s1 + $0xf38] sm:$0xff] }
 0x2d8   :  { %2947 = vmatprep.subr.bf16.mxu0 %v7064_v29  ;;  %2988 = vmatprep.subr.bf16.mxu1 %v7066_v33  ;;  %v2558_v29 = vld [vmem:[%s10627_s1 + $0x438] sm:$0xff]  ;;  %v7052_v33 = vcombine.high %v2557_v27, %v2559_v28 }
 0x33a   :  { %v7576_v34 = vpop.f32.mrf.mxu0  ;;  %v7598_v35 = vpop.f32.mrf.mxu1 }
 0x33c   :  { %v7577_v36 = vpop.f32.mrf.mxu0  ;;  %v7599_v37 = vpop.f32.mrf.mxu1 }
 0x33d   :  { %v7578_v38 = vadd.f32 %v7577_v36, %v7576_v34  ;;  %v7600_v39 = vadd.f32 %v7599_v37, %v7598_v35  ;;  %v7054_v34 = vcombine.high %v2558_v29, %v2560_v30  ;;  %v2553_v35 = vld [vmem:[%s10627_s1 + $0x330] sm:$0xff]  ;;  %v2554_v37 = vld [vmem:[%s10627_s1 + $0x338] sm:$0xff] }
 0x33e   :  { %v7579_v40 = vpop.f32.mrf.mxu0  ;;  %v7601_v41 = vpop.f32.mrf.mxu1  ;;  %v2555_v36 = vld [vmem:[%s10627_s1 + $0x3b0] sm:$0xff] }
 0x33f   :  { %v1699_v42 = vadd.f32 %v7600_v39, %v7578_v38  ;;  %v2556_v38 = vld [vmem:[%s10627_s1 + $0x3b8] sm:$0xff]  ;;  %v7051_v39 = vcombine.low %v2557_v27, %v2559_v28  ;;  %v7053_v40 = vcombine.low %v2558_v29, %v2560_v30  ;;  %v7048_v41 = vcombine.high %v2553_v35, %v2555_v36  ;;  %v2595_v27 = vld [vmem:[%s10627_s1 + $0xdb0] sm:$0xff] }
 0x340   :  { %v7580_v43 = vpop.f32.mrf.mxu0  ;;  %v7602_v44 = vpop.f32.mrf.mxu1  ;;  %v2594_v28 = vld [vmem:[%s10627_s1 + $0xd38] sm:$0xff] }
 0x341   :  { %v9115_v45 = vadd.f32 %v1699_v42, %v8813_v15  ;;  %v7050_v42 = vcombine.high %v2554_v37, %v2556_v38  ;;  %v2549_v43 = vld [vmem:[%s10627_s1 + $0x230] sm:$0xff]  ;;  %v2596_v29 = vld [vmem:[%s10627_s1 + $0xdb8] sm:$0xff] }
 0x342   :  { %v2551_v44 = vld [vmem:[%s10627_s1 + $0x2b0] sm:$0xff] }
 0x37a   :  { %v2146_v51 = vpop.f32.mrf.mxu0  ;;  %v2187_v52 = vpop.f32.mrf.mxu1 }
 0x37b   :  { %v2147_v53 = vadd.f32 %v2146_v51, %v1775_v47  ;;  %v2188_v54 = vadd.f32 %v2187_v52, %v1783_v48  ;;  %v2552_v47 = vld [vmem:[%s10627_s1 + $0x2b8] sm:$0xff]  ;;  %v7047_v48 = vcombine.low %v2553_v35, %v2555_v36  ;;  %v2545_v52 = vld [vmem:[%s10627_s1 + $0x130] sm:$0xff] }
 0x37c   :  { %v2148_v55 = vpop.f32.mrf.mxu0  ;;  %v2189_v58 = vpop.f32.mrf.mxu1  ;;  %v7046_v51 = vcombine.high %v2550_v46, %v2552_v47  ;;  %v2591_v35 = vld [vmem:[%s10627_s1 + $0xcb0] sm:$0xff]  ;;  %v2590_v36 = vld [vmem:[%s10627_s1 + $0xc38] sm:$0xff] }
 0x37d   :  { %v2149_v15 = vadd.f32 %v2148_v55, %v1779_v49  ;;  %v2190_v61 = vadd.f32 %v2189_v58, %v1787_v50  ;;  %v2194_v62 = vmax.f32 %v2147_v53, 0.0  ;;  %v2196_v63 = vmax.f32 %v2188_v54, 0.0  ;;  %v2547_v53 = vld [vmem:[%s10627_s1 + $0x1b0] sm:$0xff]  ;;  %v2546_v54 = vld [vmem:[%s10627_s1 + $0x138] sm:$0xff] }
 0x37e   :  { %v2150_v0 = vpop.f32.mrf.mxu0  ;;  %v2191_v1 = vpop.f32.mrf.mxu1  ;;  %v7049_v49 = vcombine.low %v2554_v37, %v2556_v38  ;;  %v7044_v50 = vcombine.high %v2549_v43, %v2551_v44  ;;  %v2548_v55 = vld [vmem:[%s10627_s1 + $0x1b8] sm:$0xff]  ;;  %v7043_v58 = vcombine.low %v2549_v43, %v2551_v44  ;;  %v2587_v43 = vld [vmem:[%s10627_s1 + $0xbb0] sm:$0xff] }
 0x37f   :  { %v2195_v2 = vmax.f32 %v2149_v15, 0.0  ;;  %v2197_v3 = vmax.f32 %v2190_v61, 0.0  ;;  %v2199_v12 = vpack.c.bf16 %v2194_v62, %v2194_v62  ;;  %v2201_v13 = vpack.c.bf16 %v2196_v63, %v2196_v63  ;;  %v2541_v63 = vld [vmem:[%s10627_s1 + $0x30] sm:$0xff]  ;;  %v2542_v1 = vld [vmem:[%s10627_s1 + $0x38] sm:$0xff] }
 0x380   :  { %v2151_v5 = vpop.f32.mrf.mxu0  ;;  %v2192_v6 = vpop.f32.mrf.mxu1  ;;  %v7045_v15 = vcombine.low %v2550_v46, %v2552_v47  ;;  %v7040_v61 = vcombine.high %v2545_v52, %v2547_v53  ;;  %v7042_v62 = vcombine.high %v2546_v54, %v2548_v55  ;;  %v2543_v0 = vld [vmem:[%s10627_s1 + $0xb0] sm:$0xff]  ;;  %v7041_v4 = vcombine.low %v2546_v54, %v2548_v55  ;;  %v2592_v37 = vld [vmem:[%s10627_s1 + $0xcb8] sm:$0xff] }
 0x381   :  { %v2200_v10 = vpack.c.bf16 %v2195_v2, %v2195_v2  ;;  %v2202_v11 = vpack.c.bf16 %v2197_v3, %v2197_v3  ;;  %v2544_v2 = vld [vmem:[%s10627_s1 + $0xb8] sm:$0xff]  ;;  %v7039_v3 = vcombine.low %v2545_v52, %v2547_v53  ;;  %v7036_v5 = vcombine.high %v2541_v63, %v2543_v0  ;;  %v2583_v52 = vld [vmem:[%s10627_s1 + $0xab0] sm:$0xff] }
 0x382   :  { %v7038_v6 = vcombine.high %v2542_v1, %v2544_v2  ;;  %v2586_v44 = vld [vmem:[%s10627_s1 + $0xb38] sm:$0xff] }
 0x383   :  { %2491 = vmatprep.mubr.bf16.mxu0 %v2200_v10  ;;  %2531 = vmatprep.mubr.bf16.mxu1 %v2202_v11  ;;  %v2604_v10 = vld [vmem:[%s10627_s1 + $0xfb8] sm:$0xff]  ;;  %v7035_v11 = vcombine.low %v2541_v63, %v2543_v0  ;;  %v2579_v63 = vld [vmem:[%s10627_s1 + $0x9b0] sm:$0xff] }
 0x384   :  { %2492 = vmatmul.mubr.bf16.vlgmr.msra.gmra.mxu0 %v2199_v12  ;;  %2532 = vmatmul.mubr.bf16.vlgmr.msra.gmra.mxu1 %v2201_v13  ;;  %v7037_v12 = vcombine.low %v2542_v1, %v2544_v2  ;;  %v7096_v13 = vcombine.high %v2601_v7, %v2603_v8  ;;  %v2588_v46 = vld [vmem:[%s10627_s1 + $0xbb8] sm:$0xff] }
 0x385   :  { %2948 = vmatpush1.bf16.msra.mxu0 %v7063_v31  ;;  %2989 = vmatpush1.bf16.msra.mxu1 %v7065_v32  ;;  %v7055_v31 = vcombine.low %v2561_v14, %v2563_v20  ;;  %v7057_v32 = vcombine.low %v2562_v21, %v2564_v22  ;;  %v7098_v14 = vcombine.high %v2602_v9, %v2604_v10  ;;  %v2598_v20 = vld [vmem:[%s10627_s1 + $0xe38] sm:$0xff] }
 0x386   :  { %2979 = vmatprep.mubr.bf16.mxu0 %v8410_v19  ;;  %3020 = vmatprep.mubr.bf16.mxu1 %v8410_v19  ;;  %v2600_v21 = vld [vmem:[%s10627_s1 + $0xeb8] sm:$0xff]  ;;  %v7095_v22 = vcombine.low %v2601_v7, %v2603_v8  ;;  %v2575_v7 = vld [vmem:[%s10627_s1 + $0x8b0] sm:$0xff] }
 0x387   :  { %2949 = vmatprep.subr.bf16.mxu0 %v7060_v16  ;;  %2990 = vmatprep.subr.bf16.mxu1 %v7062_v17  ;;  %v2597_v16 = vld [vmem:[%s10627_s1 + $0xe30] sm:$0xff]  ;;  %v2582_v53 = vld [vmem:[%s10627_s1 + $0xa38] sm:$0xff] }
 0x388   :  { %v2599_v17 = vld [vmem:[%s10627_s1 + $0xeb0] sm:$0xff]  ;;  %v2584_v54 = vld [vmem:[%s10627_s1 + $0xab8] sm:$0xff] }
 0x389   :  { %2950 = vmatpush1.bf16.msra.mxu0 %v7059_v23  ;;  %2991 = vmatpush1.bf16.msra.mxu1 %v7061_v24  ;;  %v7097_v23 = vcombine.low %v2602_v9, %v2604_v10  ;;  %v7092_v24 = vcombine.high %v2597_v16, %v2599_v17  ;;  %v7091_v30 = vcombine.low %v2597_v16, %v2599_v17  ;;  %v2578_v0 = vld [vmem:[%s10627_s1 + $0x938] sm:$0xff] }
 0x38a   :  { %2951 = vmatprep.subr.bf16.mxu0 %v7056_v25  ;;  %2992 = vmatprep.subr.bf16.mxu1 %v7058_v26  ;;  %v7094_v25 = vcombine.high %v2598_v20, %v2600_v21  ;;  %v2593_v26 = vld [vmem:[%s10627_s1 + $0xd30] sm:$0xff]  ;;  %v2580_v1 = vld [vmem:[%s10627_s1 + $0x9b8] sm:$0xff] }
 0x38b   :  { %v7087_v38 = vcombine.low %v2593_v26, %v2595_v27  ;;  %v2574_v8 = vld [vmem:[%s10627_s1 + $0x838] sm:$0xff] }
 0x38c   :  { %v2576_v9 = vld [vmem:[%s10627_s1 + $0x8b8] sm:$0xff] }
 0x38d   :  { %2952 = vmatpush1.bf16.msra.mxu0 %v7055_v31  ;;  %2993 = vmatpush1.bf16.msra.mxu1 %v7057_v32  ;;  %v7093_v31 = vcombine.low %v2598_v20, %v2600_v21  ;;  %v7088_v32 = vcombine.high %v2593_v26, %v2595_v27  ;;  %v7069_v16 = vcombine.low %v2574_v8, %v2576_v9  ;;  %v7965_v17 = vld [vmem:[%s10629_s3 + $0x378] sm:$0xff]   ;;  %v7972_v26 = vld [vmem:[%s10629_s3 + $0x3b0] sm:$0xff]   ;;  %v7973_v27 = vld [vmem:[%s10629_s3 + $0x368] sm:$0xff]  }
 0x38e   :  { %2953 = vmatprep.subr.bf16.mxu0 %v7052_v33  ;;  %2994 = vmatprep.subr.bf16.mxu1 %v7054_v34  ;;  %v7090_v33 = vcombine.high %v2594_v28, %v2596_v29  ;;  %v2589_v34 = vld [vmem:[%s10627_s1 + $0xc30] sm:$0xff]  ;;  %v7966_v20 = vld [vmem:[%s10629_s3 + $0x3f8] sm:$0xff]  }
 0x38f   :  { %v7083_v47 = vcombine.low %v2589_v34, %v2591_v35  ;;  %v7967_v21 = vld [vmem:[%s10629_s3 + $0x338] sm:$0xff]  }
 0x391   :  { %2954 = vmatpush1.bf16.msra.mxu0 %v7051_v39  ;;  %2995 = vmatpush1.bf16.msra.mxu1 %v7053_v40  ;;  %v7089_v39 = vcombine.low %v2594_v28, %v2596_v29  ;;  %v7084_v40 = vcombine.high %v2589_v34, %v2591_v35  ;;  %v7974_v28 = vld [vmem:[%s10629_s3 + $0x3e8] sm:$0xff]   ;;  %v7980_v34 = vld [vmem:[%s10629_s3 + $0x3a0] sm:$0xff]   ;;  %v7981_v35 = vld [vmem:[%s10629_s3 + $0x358] sm:$0xff]  }
 0x392   :  { %2955 = vmatprep.subr.bf16.mxu0 %v7048_v41  ;;  %2996 = vmatprep.subr.bf16.mxu1 %v7050_v42  ;;  %v7086_v41 = vcombine.high %v2590_v36, %v2592_v37  ;;  %v2585_v42 = vld [vmem:[%s10627_s1 + $0xb30] sm:$0xff]  ;;  %v7975_v29 = vld [vmem:[%s10629_s3 + $0x328] sm:$0xff]  }
 0x393   :  { %v7079_v55 = vcombine.low %v2585_v42, %v2587_v43 }
 0x395   :  { %2956 = vmatpush1.bf16.msra.mxu0 %v7047_v48  ;;  %2997 = vmatpush1.bf16.msra.mxu1 %v7049_v49  ;;  %v7085_v48 = vcombine.low %v2590_v36, %v2592_v37  ;;  %v7080_v49 = vcombine.high %v2585_v42, %v2587_v43  ;;  %v7982_v36 = vld [vmem:[%s10629_s3 + $0x3d8] sm:$0xff]   ;;  %v7988_v42 = vld [vmem:[%s10629_s3 + $0x390] sm:$0xff]   ;;  %v7989_v43 = vld [vmem:[%s10629_s3 + $0x348] sm:$0xff]  }
 0x396   :  { %2957 = vmatprep.subr.bf16.mxu0 %v7044_v50  ;;  %2998 = vmatprep.subr.bf16.mxu1 %v7046_v51  ;;  %v7082_v50 = vcombine.high %v2586_v44, %v2588_v46  ;;  %v2581_v51 = vld [vmem:[%s10627_s1 + $0xa30] sm:$0xff]  ;;  %v7983_v37 = vld [vmem:[%s10629_s3 + $0x318] sm:$0xff]  }
 0x397   :  { %v7075_v2 = vcombine.low %v2581_v51, %v2583_v52 }
 0x399   :  { %2958 = vmatpush1.bf16.msra.mxu0 %v7043_v58  ;;  %2999 = vmatpush1.bf16.msra.mxu1 %v7045_v15  ;;  %v7081_v58 = vcombine.low %v2586_v44, %v2588_v46  ;;  %v7076_v15 = vcombine.high %v2581_v51, %v2583_v52  ;;  %v7990_v44 = vld [vmem:[%s10629_s3 + $0x3c8] sm:$0xff]   ;;  %v7996_v51 = vld [vmem:[%s10629_s3 + $0x380] sm:$0xff]  }
 0x39a   :  { %2959 = vmatprep.subr.bf16.mxu0 %v7040_v61  ;;  %3000 = vmatprep.subr.bf16.mxu1 %v7042_v62  ;;  %v7078_v61 = vcombine.high %v2582_v53, %v2584_v54  ;;  %v2577_v62 = vld [vmem:[%s10627_s1 + $0x930] sm:$0xff]  ;;  %v7991_v46 = vld [vmem:[%s10629_s3 + $0x308] sm:$0xff]   ;;  %v3404_v52 = vld [vmem:[%s10627_s1 + $0x740] sm:$0xff] }
 0x39b   :  { %v7071_v10 = vcombine.low %v2577_v62, %v2579_v63 }
 0x39d   :  { %2960 = vmatpush1.bf16.msra.mxu0 %v7039_v3  ;;  %3001 = vmatpush1.bf16.msra.mxu1 %v7041_v4  ;;  %v7077_v3 = vcombine.low %v2582_v53, %v2584_v54  ;;  %v7072_v4 = vcombine.high %v2577_v62, %v2579_v63  ;;  %v3406_v53 = vld [vmem:[%s10627_s1 + $0x7c0] sm:$0xff]  ;;  %v3405_v54 = vld [vmem:[%s10627_s1 + $0x748] sm:$0xff] }
 0x39e   :  { %2961 = vmatprep.subr.bf16.mxu0 %v7036_v5  ;;  %3002 = vmatprep.subr.bf16.mxu1 %v7038_v6  ;;  %v7074_v5 = vcombine.high %v2578_v0, %v2580_v1  ;;  %v2573_v6 = vld [vmem:[%s10627_s1 + $0x830] sm:$0xff] }
 0x3a1   :  { %2962 = vmatpush1.bf16.msra.mxu0 %v7035_v11  ;;  %3003 = vmatpush1.bf16.msra.mxu1 %v7037_v12  ;;  %v7073_v11 = vcombine.low %v2578_v0, %v2580_v1  ;;  %v7068_v12 = vcombine.high %v2573_v6, %v2575_v7 }
 0x3a2   :  { %2963 = vmatprep.subr.bf16.mxu0 %v7096_v13  ;;  %3004 = vmatprep.subr.bf16.mxu1 %v7098_v14  ;;  %v7070_v13 = vcombine.high %v2574_v8, %v2576_v9  ;;  %v7067_v14 = vcombine.low %v2573_v6, %v2575_v7 }
 0x3a5   :  { %2964 = vmatpush2.bf16.msra.mxu0 %v7095_v22  ;;  %3005 = vmatpush2.bf16.msra.mxu1 %v7097_v23  ;;  %v7968_v22 = vld [vmem:[%s10629_s3 + $0x3b8] sm:$0xff]   ;;  %v7969_v23 = vld [vmem:[%s10629_s3 + $0x370] sm:$0xff]  }
 0x3a6   :  { %2965 = vmatprep.subr.bf16.mxu0 %v7092_v24  ;;  %3006 = vmatprep.subr.bf16.mxu1 %v7094_v25  ;;  %v7970_v24 = vld [vmem:[%s10629_s3 + $0x3f0] sm:$0xff]  }
 0x3a7   :  { %v7971_v25 = vld [vmem:[%s10629_s3 + $0x330] sm:$0xff]  }
 0x3a9   :  { %2966 = vmatpush2.bf16.msra.mxu0 %v7091_v30  ;;  %3007 = vmatpush2.bf16.msra.mxu1 %v7093_v31  ;;  %v7976_v30 = vld [vmem:[%s10629_s3 + $0x3a8] sm:$0xff]   ;;  %v7977_v31 = vld [vmem:[%s10629_s3 + $0x360] sm:$0xff]  }
 0x3aa   :  { %2967 = vmatprep.subr.bf16.mxu0 %v7088_v32  ;;  %3008 = vmatprep.subr.bf16.mxu1 %v7090_v33  ;;  %v7978_v32 = vld [vmem:[%s10629_s3 + $0x3e0] sm:$0xff]  }
 0x3ab   :  { %v7979_v33 = vld [vmem:[%s10629_s3 + $0x320] sm:$0xff]  }
 0x3ad   :  { %2968 = vmatpush2.bf16.msra.mxu0 %v7087_v38  ;;  %3009 = vmatpush2.bf16.msra.mxu1 %v7089_v39  ;;  %v7984_v38 = vld [vmem:[%s10629_s3 + $0x398] sm:$0xff]   ;;  %v7985_v39 = vld [vmem:[%s10629_s3 + $0x350] sm:$0xff]  }
 0x3ae   :  { %2969 = vmatprep.subr.bf16.mxu0 %v7084_v40  ;;  %3010 = vmatprep.subr.bf16.mxu1 %v7086_v41  ;;  %v7986_v40 = vld [vmem:[%s10629_s3 + $0x3d0] sm:$0xff]  }
 0x3af   :  { %v7987_v41 = vld [vmem:[%s10629_s3 + $0x310] sm:$0xff]  }
 0x3b1   :  { %2970 = vmatpush2.bf16.msra.mxu0 %v7083_v47  ;;  %3011 = vmatpush2.bf16.msra.mxu1 %v7085_v48  ;;  %v7992_v47 = vld [vmem:[%s10629_s3 + $0x388] sm:$0xff]   ;;  %v7993_v48 = vld [vmem:[%s10629_s3 + $0x340] sm:$0xff]  }
 0x3b2   :  { %2971 = vmatprep.subr.bf16.mxu0 %v7080_v49  ;;  %3012 = vmatprep.subr.bf16.mxu1 %v7082_v50  ;;  %v7994_v49 = vld [vmem:[%s10629_s3 + $0x3c0] sm:$0xff]  }
 0x3b3   :  { %v7995_v50 = vld [vmem:[%s10629_s3 + $0x300] sm:$0xff]  }
 0x3b5   :  { %2972 = vmatpush2.bf16.msra.mxu0 %v7079_v55  ;;  %3013 = vmatpush2.bf16.msra.mxu1 %v7081_v58  ;;  %v7160_v55 = vcombine.high %v3404_v52, %v3406_v53  ;;  %v3407_v58 = vld [vmem:[%s10627_s1 + $0x7c8] sm:$0xff] }
 0x3b6   :  { %2973 = vmatprep.subr.bf16.mxu0 %v7076_v15  ;;  %3014 = vmatprep.subr.bf16.mxu1 %v7078_v61  ;;  %v7159_v15 = vcombine.low %v3404_v52, %v3406_v53  ;;  %v7161_v61 = vcombine.low %v3405_v54, %v3407_v58  ;;  %v7162_v62 = vcombine.high %v3405_v54, %v3407_v58  ;;  %v3392_v53 = vld [vmem:[%s10627_s1 + $0x440] sm:$0xff]  ;;  %v3395_v58 = vld [vmem:[%s10627_s1 + $0x4c8] sm:$0xff] }
 0x3b7   :  { %v3394_v54 = vld [vmem:[%s10627_s1 + $0x4c0] sm:$0xff] }
 0x3b9   :  { %2974 = vmatpush2.bf16.msra.mxu0 %v7075_v2  ;;  %3015 = vmatpush2.bf16.msra.mxu1 %v7077_v3 }
 0x3ba   :  { %2975 = vmatprep.subr.bf16.mxu0 %v7072_v4  ;;  %3016 = vmatprep.subr.bf16.mxu1 %v7074_v5 }
 0x3bd   :  { %2976 = vmatpush2.bf16.msra.mxu0 %v7071_v10  ;;  %3017 = vmatpush2.bf16.msra.mxu1 %v7073_v11  ;;  %v2605_v11 = vld [vmem:[%s10628_s2 + $0xc] sm:$0xf] }
 0x3be   :  { %2977 = vmatprep.subr.bf16.mxu0 %v7068_v12  ;;  %3018 = vmatprep.subr.bf16.mxu1 %v7070_v13  ;;  %v2610_v12 = vrot.slane %v2605_v11, %v8506_v56  ;;  %v2618_v13 = vrot.slane %v2605_v11, %v8508_v57 }
 0x3c1   :  { %2978 = vmatpush2.bf16.msra.mxu0 %v7067_v14  ;;  %3019 = vmatpush2.bf16.msra.mxu1 %v7069_v16  ;;  %v2614_v14 = vrot.slane %v2605_v11, %v8513_v59  ;;  %v2622_v16 = vrot.slane %v2605_v11, %v8515_v60  ;;  %v3385_v11 = vld [vmem:[%s10627_s1 + $0x248] sm:$0xff] }
 0x3c2   :  { %7648 = vmatprep.subr.bf16.mxu0 %v7965_v17  ;;  %7670 = vmatprep.subr.bf16.mxu1 %v7966_v20 }
 0x3c4   :  { %2980 = vmatmul.mubr.bf16.vlgmr.msra.gmra.mxu0 %v8408_v18  ;;  %3021 = vmatmul.mubr.bf16.vlgmr.msra.gmra.mxu1 %v8408_v18 }
 0x3c5   :  { %7649 = vmatpush3.bf16.msra.mxu0 %v7967_v21  ;;  %7671 = vmatpush3.bf16.msra.mxu1 %v7968_v22 }
 0x3c6   :  { %7650 = vmatprep.subr.bf16.mxu0 %v7969_v23  ;;  %7672 = vmatprep.subr.bf16.mxu1 %v7970_v24 }
 0x3c9   :  { %7651 = vmatpush3.bf16.msra.mxu0 %v7971_v25  ;;  %7673 = vmatpush3.bf16.msra.mxu1 %v7972_v26 }
 0x3ca   :  { %7652 = vmatprep.subr.bf16.mxu0 %v7973_v27  ;;  %7674 = vmatprep.subr.bf16.mxu1 %v7974_v28 }
 0x3cd   :  { %7653 = vmatpush3.bf16.msra.mxu0 %v7975_v29  ;;  %7675 = vmatpush3.bf16.msra.mxu1 %v7976_v30 }
 0x3ce   :  { %7654 = vmatprep.subr.bf16.mxu0 %v7977_v31  ;;  %7676 = vmatprep.subr.bf16.mxu1 %v7978_v32  ;;  %v3400_v32 = vld [vmem:[%s10627_s1 + $0x640] sm:$0xff] }
 0x3d1   :  { %7655 = vmatpush3.bf16.msra.mxu0 %v7979_v33  ;;  %7677 = vmatpush3.bf16.msra.mxu1 %v7980_v34 }
 0x3d2   :  { %7656 = vmatprep.subr.bf16.mxu0 %v7981_v35  ;;  %7678 = vmatprep.subr.bf16.mxu1 %v7982_v36  ;;  %v3402_v35 = vld [vmem:[%s10627_s1 + $0x6c0] sm:$0xff]  ;;  %v3401_v36 = vld [vmem:[%s10627_s1 + $0x648] sm:$0xff] }
 0x3d5   :  { %7657 = vmatpush3.bf16.msra.mxu0 %v7983_v37  ;;  %7679 = vmatpush3.bf16.msra.mxu1 %v7984_v38  ;;  %v3403_v37 = vld [vmem:[%s10627_s1 + $0x6c8] sm:$0xff] }
 0x3d6   :  { %7658 = vmatprep.subr.bf16.mxu0 %v7985_v39  ;;  %7680 = vmatprep.subr.bf16.mxu1 %v7986_v40 }
 0x3d9   :  { %7659 = vmatpush3.bf16.msra.mxu0 %v7987_v41  ;;  %7681 = vmatpush3.bf16.msra.mxu1 %v7988_v42  ;;  %v3396_v42 = vld [vmem:[%s10627_s1 + $0x540] sm:$0xff] }
 0x3da   :  { %7660 = vmatprep.subr.bf16.mxu0 %v7989_v43  ;;  %7682 = vmatprep.subr.bf16.mxu1 %v7990_v44  ;;  %v7156_v43 = vcombine.high %v3400_v32, %v3402_v35  ;;  %v7158_v44 = vcombine.high %v3401_v36, %v3403_v37 }
 0x3dd   :  { %7661 = vmatpush3.bf16.msra.mxu0 %v7991_v46  ;;  %7683 = vmatpush3.bf16.msra.mxu1 %v7992_v47  ;;  %v3398_v46 = vld [vmem:[%s10627_s1 + $0x5c0] sm:$0xff]  ;;  %v3397_v47 = vld [vmem:[%s10627_s1 + $0x548] sm:$0xff] }
 0x3de   :  { %7662 = vmatprep.subr.bf16.mxu0 %v7993_v48  ;;  %7684 = vmatprep.subr.bf16.mxu1 %v7994_v49  ;;  %v3399_v48 = vld [vmem:[%s10627_s1 + $0x5c8] sm:$0xff]  ;;  %v7155_v49 = vcombine.low %v3400_v32, %v3402_v35  ;;  %v3436_v35 = vld [vmem:[%s10627_s1 + $0xf40] sm:$0xff] }
 0x3df   :  { %v7154_v52 = vcombine.high %v3397_v47, %v3399_v48 }
 0x3e1   :  { %7663 = vmatpush3.bf16.msra.mxu0 %v7995_v50  ;;  %7685 = vmatpush3.bf16.msra.mxu1 %v7996_v51  ;;  %v7157_v50 = vcombine.low %v3401_v36, %v3403_v37  ;;  %v7152_v51 = vcombine.high %v3396_v42, %v3398_v46  ;;  %v3438_v36 = vld [vmem:[%s10627_s1 + $0xfc0] sm:$0xff]  ;;  %v3437_v37 = vld [vmem:[%s10627_s1 + $0xf48] sm:$0xff] }
 0x3e2   :  { %3782 = vmatprep.subr.bf16.mxu0 %v7160_v55  ;;  %3823 = vmatprep.subr.bf16.mxu1 %v7162_v62  ;;  %v3393_v55 = vld [vmem:[%s10627_s1 + $0x448] sm:$0xff]  ;;  %v7148_v62 = vcombine.high %v3392_v53, %v3394_v54 }
 0x444   :  { %v7620_v63 = vpop.f32.mrf.mxu0  ;;  %v7642_v0 = vpop.f32.mrf.mxu1 }
 0x446   :  { %v7621_v1 = vpop.f32.mrf.mxu0  ;;  %v7643_v2 = vpop.f32.mrf.mxu1 }
 0x447   :  { %v7622_v3 = vadd.f32 %v7621_v1, %v7620_v63  ;;  %v7644_v4 = vadd.f32 %v7643_v2, %v7642_v0  ;;  %v7150_v63 = vcombine.high %v3393_v55, %v3395_v58  ;;  %v3388_v0 = vld [vmem:[%s10627_s1 + $0x340] sm:$0xff]  ;;  %v3389_v2 = vld [vmem:[%s10627_s1 + $0x348] sm:$0xff] }
 0x448   :  { %v7623_v5 = vpop.f32.mrf.mxu0  ;;  %v7645_v6 = vpop.f32.mrf.mxu1  ;;  %v3390_v1 = vld [vmem:[%s10627_s1 + $0x3c0] sm:$0xff] }
 0x449   :  { %v2534_v7 = vadd.f32 %v7644_v4, %v7622_v3  ;;  %v3391_v3 = vld [vmem:[%s10627_s1 + $0x3c8] sm:$0xff]  ;;  %v7147_v4 = vcombine.low %v3392_v53, %v3394_v54  ;;  %v7149_v5 = vcombine.low %v3393_v55, %v3395_v58  ;;  %v7144_v6 = vcombine.high %v3388_v0, %v3390_v1  ;;  %v3430_v53 = vld [vmem:[%s10627_s1 + $0xdc0] sm:$0xff] }
 0x44a   :  { %v7624_v8 = vpop.f32.mrf.mxu0  ;;  %v7646_v9 = vpop.f32.mrf.mxu1  ;;  %v3429_v54 = vld [vmem:[%s10627_s1 + $0xd48] sm:$0xff] }
 0x44b   :  { %v9417_v10 = vadd.f32 %v2534_v7, %v9115_v45  ;;  %v7146_v7 = vcombine.high %v3389_v2, %v3391_v3  ;;  %v3384_v8 = vld [vmem:[%s10627_s1 + $0x240] sm:$0xff]  ;;  %v3431_v55 = vld [vmem:[%s10627_s1 + $0xdc8] sm:$0xff] }
 0x44c   :  { %v3386_v9 = vld [vmem:[%s10627_s1 + $0x2c0] sm:$0xff] }
 0x484   :  { %v2981_v17 = vpop.f32.mrf.mxu0  ;;  %v3022_v20 = vpop.f32.mrf.mxu1 }
 0x485   :  { %v2982_v21 = vadd.f32 %v2981_v17, %v2610_v12  ;;  %v3023_v22 = vadd.f32 %v3022_v20, %v2618_v13  ;;  %v3387_v12 = vld [vmem:[%s10627_s1 + $0x2c8] sm:$0xff]  ;;  %v7143_v13 = vcombine.low %v3388_v0, %v3390_v1  ;;  %v3380_v20 = vld [vmem:[%s10627_s1 + $0x140] sm:$0xff] }
 0x486   :  { %v2983_v23 = vpop.f32.mrf.mxu0  ;;  %v3024_v24 = vpop.f32.mrf.mxu1  ;;  %v7142_v17 = vcombine.high %v3385_v11, %v3387_v12  ;;  %v3426_v0 = vld [vmem:[%s10627_s1 + $0xcc0] sm:$0xff]  ;;  %v3425_v1 = vld [vmem:[%s10627_s1 + $0xc48] sm:$0xff] }
 0x487   :  { %v2984_v45 = vadd.f32 %v2983_v23, %v2614_v14  ;;  %v3025_v25 = vadd.f32 %v3024_v24, %v2622_v16  ;;  %v3029_v26 = vmax.f32 %v2982_v21, 0.0  ;;  %v3031_v27 = vmax.f32 %v3023_v22, 0.0  ;;  %v3382_v21 = vld [vmem:[%s10627_s1 + $0x1c0] sm:$0xff]  ;;  %v3381_v22 = vld [vmem:[%s10627_s1 + $0x148] sm:$0xff] }
 0x488   :  { %v2985_v28 = vpop.f32.mrf.mxu0  ;;  %v3026_v29 = vpop.f32.mrf.mxu1  ;;  %v7145_v14 = vcombine.low %v3389_v2, %v3391_v3  ;;  %v7140_v16 = vcombine.high %v3384_v8, %v3386_v9  ;;  %v3383_v23 = vld [vmem:[%s10627_s1 + $0x1c8] sm:$0xff]  ;;  %v7139_v24 = vcombine.low %v3384_v8, %v3386_v9  ;;  %v3422_v8 = vld [vmem:[%s10627_s1 + $0xbc0] sm:$0xff] }
 0x489   :  { %v3030_v30 = vmax.f32 %v2984_v45, 0.0  ;;  %v3032_v31 = vmax.f32 %v3025_v25, 0.0  ;;  %v3034_v40 = vpack.c.bf16 %v3029_v26, %v3029_v26  ;;  %v3036_v41 = vpack.c.bf16 %v3031_v27, %v3031_v27  ;;  %v3376_v27 = vld [vmem:[%s10627_s1 + $0x40] sm:$0xff]  ;;  %v3377_v29 = vld [vmem:[%s10627_s1 + $0x48] sm:$0xff] }
 0x48a   :  { %v2986_v33 = vpop.f32.mrf.mxu0  ;;  %v3027_v34 = vpop.f32.mrf.mxu1  ;;  %v7141_v45 = vcombine.low %v3385_v11, %v3387_v12  ;;  %v7136_v25 = vcombine.high %v3380_v20, %v3382_v21  ;;  %v7138_v26 = vcombine.high %v3381_v22, %v3383_v23  ;;  %v3378_v28 = vld [vmem:[%s10627_s1 + $0xc0] sm:$0xff]  ;;  %v7137_v32 = vcombine.low %v3381_v22, %v3383_v23  ;;  %v3427_v2 = vld [vmem:[%s10627_s1 + $0xcc8] sm:$0xff] }
 0x48b   :  { %v3035_v38 = vpack.c.bf16 %v3030_v30, %v3030_v30  ;;  %v3037_v39 = vpack.c.bf16 %v3032_v31, %v3032_v31  ;;  %v3379_v30 = vld [vmem:[%s10627_s1 + $0xc8] sm:$0xff]  ;;  %v7135_v31 = vcombine.low %v3380_v20, %v3382_v21  ;;  %v7132_v33 = vcombine.high %v3376_v27, %v3378_v28  ;;  %v3418_v20 = vld [vmem:[%s10627_s1 + $0xac0] sm:$0xff] }
 0x48c   :  { %v7134_v34 = vcombine.high %v3377_v29, %v3379_v30  ;;  %v3421_v9 = vld [vmem:[%s10627_s1 + $0xb48] sm:$0xff] }
 0x48d   :  { %3326 = vmatprep.mubr.bf16.mxu0 %v3035_v38  ;;  %3366 = vmatprep.mubr.bf16.mxu1 %v3037_v39  ;;  %v3439_v38 = vld [vmem:[%s10627_s1 + $0xfc8] sm:$0xff]  ;;  %v7131_v39 = vcombine.low %v3376_v27, %v3378_v28  ;;  %v3414_v27 = vld [vmem:[%s10627_s1 + $0x9c0] sm:$0xff] }
 0x48e   :  { %3327 = vmatmul.mubr.bf16.vlgmr.msra.gmra.mxu0 %v3034_v40  ;;  %3367 = vmatmul.mubr.bf16.vlgmr.msra.gmra.mxu1 %v3036_v41  ;;  %v7133_v40 = vcombine.low %v3377_v29, %v3379_v30  ;;  %v7192_v41 = vcombine.high %v3436_v35, %v3438_v36  ;;  %v3423_v11 = vld [vmem:[%s10627_s1 + $0xbc8] sm:$0xff] }
 0x48f   :  { %3783 = vmatpush1.bf16.msra.mxu0 %v7159_v15  ;;  %3824 = vmatpush1.bf16.msra.mxu1 %v7161_v61  ;;  %v7151_v15 = vcombine.low %v3396_v42, %v3398_v46  ;;  %v7153_v61 = vcombine.low %v3397_v47, %v3399_v48  ;;  %v7194_v42 = vcombine.high %v3437_v37, %v3439_v38  ;;  %v3433_v46 = vld [vmem:[%s10627_s1 + $0xe48] sm:$0xff] }
 0x490   :  { %3814 = vmatprep.mubr.bf16.mxu0 %v8410_v19  ;;  %3855 = vmatprep.mubr.bf16.mxu1 %v8410_v19  ;;  %v3435_v47 = vld [vmem:[%s10627_s1 + $0xec8] sm:$0xff]  ;;  %v7191_v48 = vcombine.low %v3436_v35, %v3438_v36  ;;  %v3410_v35 = vld [vmem:[%s10627_s1 + $0x8c0] sm:$0xff] }
 0x491   :  { %3784 = vmatprep.subr.bf16.mxu0 %v7156_v43  ;;  %3825 = vmatprep.subr.bf16.mxu1 %v7158_v44  ;;  %v3432_v43 = vld [vmem:[%s10627_s1 + $0xe40] sm:$0xff]  ;;  %v3417_v21 = vld [vmem:[%s10627_s1 + $0xa48] sm:$0xff] }
 0x492   :  { %v3434_v44 = vld [vmem:[%s10627_s1 + $0xec0] sm:$0xff]  ;;  %v3419_v22 = vld [vmem:[%s10627_s1 + $0xac8] sm:$0xff] }
 0x493   :  { %3785 = vmatpush1.bf16.msra.mxu0 %v7155_v49  ;;  %3826 = vmatpush1.bf16.msra.mxu1 %v7157_v50  ;;  %v7193_v49 = vcombine.low %v3437_v37, %v3439_v38  ;;  %v7188_v50 = vcombine.high %v3432_v43, %v3434_v44  ;;  %v7187_v58 = vcombine.low %v3432_v43, %v3434_v44  ;;  %v3413_v28 = vld [vmem:[%s10627_s1 + $0x948] sm:$0xff]  ;;  %v7997_v44 = vld [vmem:[%s10629_s3 + $0x478] sm:$0xff]  }
 0x494   :  { %3786 = vmatprep.subr.bf16.mxu0 %v7152_v51  ;;  %3827 = vmatprep.subr.bf16.mxu1 %v7154_v52  ;;  %v7190_v51 = vcombine.high %v3433_v46, %v3435_v47  ;;  %v3428_v52 = vld [vmem:[%s10627_s1 + $0xd40] sm:$0xff]  ;;  %v3415_v29 = vld [vmem:[%s10627_s1 + $0x9c8] sm:$0xff] }
 0x495   :  { %v7183_v3 = vcombine.low %v3428_v52, %v3430_v53  ;;  %v3409_v36 = vld [vmem:[%s10627_s1 + $0x848] sm:$0xff] }
 0x496   :  { %v3411_v37 = vld [vmem:[%s10627_s1 + $0x8c8] sm:$0xff] }
 0x497   :  { %3787 = vmatpush1.bf16.msra.mxu0 %v7151_v15  ;;  %3828 = vmatpush1.bf16.msra.mxu1 %v7153_v61  ;;  %v7189_v15 = vcombine.low %v3433_v46, %v3435_v47  ;;  %v7184_v61 = vcombine.high %v3428_v52, %v3430_v53  ;;  %v7165_v43 = vcombine.low %v3409_v36, %v3411_v37  ;;  %v7998_v46 = vld [vmem:[%s10629_s3 + $0x4f8] sm:$0xff]   ;;  %v8004_v52 = vld [vmem:[%s10629_s3 + $0x4b0] sm:$0xff]   ;;  %v8005_v53 = vld [vmem:[%s10629_s3 + $0x468] sm:$0xff]  }
 0x498   :  { %3788 = vmatprep.subr.bf16.mxu0 %v7148_v62  ;;  %3829 = vmatprep.subr.bf16.mxu1 %v7150_v63  ;;  %v7186_v62 = vcombine.high %v3429_v54, %v3431_v55  ;;  %v3424_v63 = vld [vmem:[%s10627_s1 + $0xc40] sm:$0xff]  ;;  %v7999_v47 = vld [vmem:[%s10629_s3 + $0x438] sm:$0xff]  }
 0x499   :  { %v7179_v12 = vcombine.low %v3424_v63, %v3426_v0 }
 0x49b   :  { %3789 = vmatpush1.bf16.msra.mxu0 %v7147_v4  ;;  %3830 = vmatpush1.bf16.msra.mxu1 %v7149_v5  ;;  %v7185_v4 = vcombine.low %v3429_v54, %v3431_v55  ;;  %v7180_v5 = vcombine.high %v3424_v63, %v3426_v0  ;;  %v8006_v54 = vld [vmem:[%s10629_s3 + $0x4e8] sm:$0xff]   ;;  %v8012_v63 = vld [vmem:[%s10629_s3 + $0x4a0] sm:$0xff]   ;;  %v8013_v0 = vld [vmem:[%s10629_s3 + $0x458] sm:$0xff]  }
 0x49c   :  { %3790 = vmatprep.subr.bf16.mxu0 %v7144_v6  ;;  %3831 = vmatprep.subr.bf16.mxu1 %v7146_v7  ;;  %v7182_v6 = vcombine.high %v3425_v1, %v3427_v2  ;;  %v3420_v7 = vld [vmem:[%s10627_s1 + $0xb40] sm:$0xff]  ;;  %v8007_v55 = vld [vmem:[%s10629_s3 + $0x428] sm:$0xff]  }
 0x49d   :  { %v7175_v23 = vcombine.low %v3420_v7, %v3422_v8 }
 0x49f   :  { %3791 = vmatpush1.bf16.msra.mxu0 %v7143_v13  ;;  %3832 = vmatpush1.bf16.msra.mxu1 %v7145_v14  ;;  %v7181_v13 = vcombine.low %v3425_v1, %v3427_v2  ;;  %v7176_v14 = vcombine.high %v3420_v7, %v3422_v8  ;;  %v8014_v1 = vld [vmem:[%s10629_s3 + $0x4d8] sm:$0xff]   ;;  %v8020_v7 = vld [vmem:[%s10629_s3 + $0x490] sm:$0xff]   ;;  %v8021_v8 = vld [vmem:[%s10629_s3 + $0x448] sm:$0xff]  }
 0x4a0   :  { %3792 = vmatprep.subr.bf16.mxu0 %v7140_v16  ;;  %3833 = vmatprep.subr.bf16.mxu1 %v7142_v17  ;;  %v7178_v16 = vcombine.high %v3421_v9, %v3423_v11  ;;  %v3416_v17 = vld [vmem:[%s10627_s1 + $0xa40] sm:$0xff]  ;;  %v8015_v2 = vld [vmem:[%s10629_s3 + $0x418] sm:$0xff]  }
 0x4a1   :  { %v7171_v30 = vcombine.low %v3416_v17, %v3418_v20 }
 0x4a3   :  { %3793 = vmatpush1.bf16.msra.mxu0 %v7139_v24  ;;  %3834 = vmatpush1.bf16.msra.mxu1 %v7141_v45  ;;  %v7177_v24 = vcombine.low %v3421_v9, %v3423_v11  ;;  %v7172_v45 = vcombine.high %v3416_v17, %v3418_v20  ;;  %v8022_v9 = vld [vmem:[%s10629_s3 + $0x4c8] sm:$0xff]   ;;  %v8028_v17 = vld [vmem:[%s10629_s3 + $0x480] sm:$0xff]   ;;  %v4239_v20 = vld [vmem:[%s10627_s1 + $0x750] sm:$0xff] }
 0x4a4   :  { %3794 = vmatprep.subr.bf16.mxu0 %v7136_v25  ;;  %3835 = vmatprep.subr.bf16.mxu1 %v7138_v26  ;;  %v7174_v25 = vcombine.high %v3417_v21, %v3419_v22  ;;  %v3412_v26 = vld [vmem:[%s10627_s1 + $0x940] sm:$0xff]  ;;  %v8023_v11 = vld [vmem:[%s10629_s3 + $0x408] sm:$0xff]  }
 0x4a5   :  { %v7167_v38 = vcombine.low %v3412_v26, %v3414_v27 }
 0x4a7   :  { %3795 = vmatpush1.bf16.msra.mxu0 %v7135_v31  ;;  %3836 = vmatpush1.bf16.msra.mxu1 %v7137_v32  ;;  %v7173_v31 = vcombine.low %v3417_v21, %v3419_v22  ;;  %v7168_v32 = vcombine.high %v3412_v26, %v3414_v27  ;;  %v4241_v21 = vld [vmem:[%s10627_s1 + $0x7d0] sm:$0xff]  ;;  %v4240_v22 = vld [vmem:[%s10627_s1 + $0x758] sm:$0xff] }
 0x4a8   :  { %3796 = vmatprep.subr.bf16.mxu0 %v7132_v33  ;;  %3837 = vmatprep.subr.bf16.mxu1 %v7134_v34  ;;  %v7170_v33 = vcombine.high %v3413_v28, %v3415_v29  ;;  %v3408_v34 = vld [vmem:[%s10627_s1 + $0x840] sm:$0xff] }
 0x4ab   :  { %3797 = vmatpush1.bf16.msra.mxu0 %v7131_v39  ;;  %3838 = vmatpush1.bf16.msra.mxu1 %v7133_v40  ;;  %v7169_v39 = vcombine.low %v3413_v28, %v3415_v29  ;;  %v7164_v40 = vcombine.high %v3408_v34, %v3410_v35 }
 0x4ac   :  { %3798 = vmatprep.subr.bf16.mxu0 %v7192_v41  ;;  %3839 = vmatprep.subr.bf16.mxu1 %v7194_v42  ;;  %v7166_v41 = vcombine.high %v3409_v36, %v3411_v37  ;;  %v7163_v42 = vcombine.low %v3408_v34, %v3410_v35 }
 0x4af   :  { %3799 = vmatpush2.bf16.msra.mxu0 %v7191_v48  ;;  %3840 = vmatpush2.bf16.msra.mxu1 %v7193_v49  ;;  %v8000_v48 = vld [vmem:[%s10629_s3 + $0x4b8] sm:$0xff]   ;;  %v8001_v49 = vld [vmem:[%s10629_s3 + $0x470] sm:$0xff]  }
 0x4b0   :  { %3800 = vmatprep.subr.bf16.mxu0 %v7188_v50  ;;  %3841 = vmatprep.subr.bf16.mxu1 %v7190_v51  ;;  %v8002_v50 = vld [vmem:[%s10629_s3 + $0x4f0] sm:$0xff]  }
 0x4b1   :  { %v8003_v51 = vld [vmem:[%s10629_s3 + $0x430] sm:$0xff]  }
 0x4b3   :  { %3801 = vmatpush2.bf16.msra.mxu0 %v7187_v58  ;;  %3842 = vmatpush2.bf16.msra.mxu1 %v7189_v15  ;;  %v8008_v58 = vld [vmem:[%s10629_s3 + $0x4a8] sm:$0xff]   ;;  %v8009_v15 = vld [vmem:[%s10629_s3 + $0x460] sm:$0xff]  }
 0x4b4   :  { %3802 = vmatprep.subr.bf16.mxu0 %v7184_v61  ;;  %3843 = vmatprep.subr.bf16.mxu1 %v7186_v62  ;;  %v8010_v61 = vld [vmem:[%s10629_s3 + $0x4e0] sm:$0xff]  }
 0x4b5   :  { %v8011_v62 = vld [vmem:[%s10629_s3 + $0x420] sm:$0xff]  }
 0x4b7   :  { %3803 = vmatpush2.bf16.msra.mxu0 %v7183_v3  ;;  %3844 = vmatpush2.bf16.msra.mxu1 %v7185_v4  ;;  %v8016_v3 = vld [vmem:[%s10629_s3 + $0x498] sm:$0xff]   ;;  %v8017_v4 = vld [vmem:[%s10629_s3 + $0x450] sm:$0xff]  }
 0x4b8   :  { %3804 = vmatprep.subr.bf16.mxu0 %v7180_v5  ;;  %3845 = vmatprep.subr.bf16.mxu1 %v7182_v6  ;;  %v8018_v5 = vld [vmem:[%s10629_s3 + $0x4d0] sm:$0xff]  }
 0x4b9   :  { %v8019_v6 = vld [vmem:[%s10629_s3 + $0x410] sm:$0xff]  }
 0x4bb   :  { %3805 = vmatpush2.bf16.msra.mxu0 %v7179_v12  ;;  %3846 = vmatpush2.bf16.msra.mxu1 %v7181_v13  ;;  %v8024_v12 = vld [vmem:[%s10629_s3 + $0x488] sm:$0xff]   ;;  %v8025_v13 = vld [vmem:[%s10629_s3 + $0x440] sm:$0xff]  }
 0x4bc   :  { %3806 = vmatprep.subr.bf16.mxu0 %v7176_v14  ;;  %3847 = vmatprep.subr.bf16.mxu1 %v7178_v16  ;;  %v8026_v14 = vld [vmem:[%s10629_s3 + $0x4c0] sm:$0xff]  }
 0x4bd   :  { %v8027_v16 = vld [vmem:[%s10629_s3 + $0x400] sm:$0xff]  }
 0x4bf   :  { %3807 = vmatpush2.bf16.msra.mxu0 %v7175_v23  ;;  %3848 = vmatpush2.bf16.msra.mxu1 %v7177_v24  ;;  %v7256_v23 = vcombine.high %v4239_v20, %v4241_v21  ;;  %v4242_v24 = vld [vmem:[%s10627_s1 + $0x7d8] sm:$0xff] }
 0x4c0   :  { %3808 = vmatprep.subr.bf16.mxu0 %v7172_v45  ;;  %3849 = vmatprep.subr.bf16.mxu1 %v7174_v25  ;;  %v7255_v45 = vcombine.low %v4239_v20, %v4241_v21  ;;  %v7257_v25 = vcombine.low %v4240_v22, %v4242_v24  ;;  %v7258_v26 = vcombine.high %v4240_v22, %v4242_v24  ;;  %v4227_v21 = vld [vmem:[%s10627_s1 + $0x450] sm:$0xff]  ;;  %v4230_v24 = vld [vmem:[%s10627_s1 + $0x4d8] sm:$0xff] }
 0x4c1   :  { %v4229_v22 = vld [vmem:[%s10627_s1 + $0x4d0] sm:$0xff] }
 0x4c3   :  { %3809 = vmatpush2.bf16.msra.mxu0 %v7171_v30  ;;  %3850 = vmatpush2.bf16.msra.mxu1 %v7173_v31 }
 0x4c4   :  { %3810 = vmatprep.subr.bf16.mxu0 %v7168_v32  ;;  %3851 = vmatprep.subr.bf16.mxu1 %v7170_v33 }
 0x4c7   :  { %3811 = vmatpush2.bf16.msra.mxu0 %v7167_v38  ;;  %3852 = vmatpush2.bf16.msra.mxu1 %v7169_v39  ;;  %v3440_v39 = vld [vmem:[%s10628_s2 + $0x10] sm:$0xf] }
 0x4c8   :  { %3812 = vmatprep.subr.bf16.mxu0 %v7164_v40  ;;  %3853 = vmatprep.subr.bf16.mxu1 %v7166_v41  ;;  %v3445_v40 = vrot.slane %v3440_v39, %v8506_v56  ;;  %v3453_v41 = vrot.slane %v3440_v39, %v8508_v57 }
 0x4cb   :  { %3813 = vmatpush2.bf16.msra.mxu0 %v7163_v42  ;;  %3854 = vmatpush2.bf16.msra.mxu1 %v7165_v43  ;;  %v3449_v42 = vrot.slane %v3440_v39, %v8513_v59  ;;  %v3457_v43 = vrot.slane %v3440_v39, %v8515_v60  ;;  %v4220_v39 = vld [vmem:[%s10627_s1 + $0x258] sm:$0xff] }
 0x4cc   :  { %7692 = vmatprep.subr.bf16.mxu0 %v7997_v44  ;;  %7714 = vmatprep.subr.bf16.mxu1 %v7998_v46 }
 0x4ce   :  { %3815 = vmatmul.mubr.bf16.vlgmr.msra.gmra.mxu0 %v8408_v18  ;;  %3856 = vmatmul.mubr.bf16.vlgmr.msra.gmra.mxu1 %v8408_v18 }
 0x4cf   :  { %7693 = vmatpush3.bf16.msra.mxu0 %v7999_v47  ;;  %7715 = vmatpush3.bf16.msra.mxu1 %v8000_v48 }
 0x4d0   :  { %7694 = vmatprep.subr.bf16.mxu0 %v8001_v49  ;;  %7716 = vmatprep.subr.bf16.mxu1 %v8002_v50 }
 0x4d3   :  { %7695 = vmatpush3.bf16.msra.mxu0 %v8003_v51  ;;  %7717 = vmatpush3.bf16.msra.mxu1 %v8004_v52 }
 0x4d4   :  { %7696 = vmatprep.subr.bf16.mxu0 %v8005_v53  ;;  %7718 = vmatprep.subr.bf16.mxu1 %v8006_v54 }
 0x4d7   :  { %7697 = vmatpush3.bf16.msra.mxu0 %v8007_v55  ;;  %7719 = vmatpush3.bf16.msra.mxu1 %v8008_v58 }
 0x4d8   :  { %7698 = vmatprep.subr.bf16.mxu0 %v8009_v15  ;;  %7720 = vmatprep.subr.bf16.mxu1 %v8010_v61  ;;  %v4235_v61 = vld [vmem:[%s10627_s1 + $0x650] sm:$0xff] }
 0x4db   :  { %7699 = vmatpush3.bf16.msra.mxu0 %v8011_v62  ;;  %7721 = vmatpush3.bf16.msra.mxu1 %v8012_v63 }
 0x4dc   :  { %7700 = vmatprep.subr.bf16.mxu0 %v8013_v0  ;;  %7722 = vmatprep.subr.bf16.mxu1 %v8014_v1  ;;  %v4237_v0 = vld [vmem:[%s10627_s1 + $0x6d0] sm:$0xff]  ;;  %v4236_v1 = vld [vmem:[%s10627_s1 + $0x658] sm:$0xff] }
 0x4df   :  { %7701 = vmatpush3.bf16.msra.mxu0 %v8015_v2  ;;  %7723 = vmatpush3.bf16.msra.mxu1 %v8016_v3  ;;  %v4238_v2 = vld [vmem:[%s10627_s1 + $0x6d8] sm:$0xff] }
 0x4e0   :  { %7702 = vmatprep.subr.bf16.mxu0 %v8017_v4  ;;  %7724 = vmatprep.subr.bf16.mxu1 %v8018_v5 }
 0x4e3   :  { %7703 = vmatpush3.bf16.msra.mxu0 %v8019_v6  ;;  %7725 = vmatpush3.bf16.msra.mxu1 %v8020_v7  ;;  %v4231_v7 = vld [vmem:[%s10627_s1 + $0x550] sm:$0xff] }
 0x4e4   :  { %7704 = vmatprep.subr.bf16.mxu0 %v8021_v8  ;;  %7726 = vmatprep.subr.bf16.mxu1 %v8022_v9  ;;  %v7252_v8 = vcombine.high %v4235_v61, %v4237_v0  ;;  %v7254_v9 = vcombine.high %v4236_v1, %v4238_v2 }
 0x4e7   :  { %7705 = vmatpush3.bf16.msra.mxu0 %v8023_v11  ;;  %7727 = vmatpush3.bf16.msra.mxu1 %v8024_v12  ;;  %v4233_v11 = vld [vmem:[%s10627_s1 + $0x5d0] sm:$0xff]  ;;  %v4232_v12 = vld [vmem:[%s10627_s1 + $0x558] sm:$0xff] }
 0x4e8   :  { %7706 = vmatprep.subr.bf16.mxu0 %v8025_v13  ;;  %7728 = vmatprep.subr.bf16.mxu1 %v8026_v14  ;;  %v4234_v13 = vld [vmem:[%s10627_s1 + $0x5d8] sm:$0xff]  ;;  %v7251_v14 = vcombine.low %v4235_v61, %v4237_v0  ;;  %v4271_v0 = vld [vmem:[%s10627_s1 + $0xf50] sm:$0xff] }
 0x4e9   :  { %v7250_v20 = vcombine.high %v4232_v12, %v4234_v13 }
 0x4eb   :  { %7707 = vmatpush3.bf16.msra.mxu0 %v8027_v16  ;;  %7729 = vmatpush3.bf16.msra.mxu1 %v8028_v17  ;;  %v7253_v16 = vcombine.low %v4236_v1, %v4238_v2  ;;  %v7248_v17 = vcombine.high %v4231_v7, %v4233_v11  ;;  %v4273_v1 = vld [vmem:[%s10627_s1 + $0xfd0] sm:$0xff]  ;;  %v4272_v2 = vld [vmem:[%s10627_s1 + $0xf58] sm:$0xff] }
 0x4ec   :  { %4617 = vmatprep.subr.bf16.mxu0 %v7256_v23  ;;  %4658 = vmatprep.subr.bf16.mxu1 %v7258_v26  ;;  %v4228_v23 = vld [vmem:[%s10627_s1 + $0x458] sm:$0xff]  ;;  %v7244_v26 = vcombine.high %v4227_v21, %v4229_v22 }
 0x54e   :  { %v7664_v27 = vpop.f32.mrf.mxu0  ;;  %v7686_v28 = vpop.f32.mrf.mxu1 }
 0x550   :  { %v7665_v29 = vpop.f32.mrf.mxu0  ;;  %v7687_v30 = vpop.f32.mrf.mxu1 }
 0x551   :  { %v7666_v31 = vadd.f32 %v7665_v29, %v7664_v27  ;;  %v7688_v32 = vadd.f32 %v7687_v30, %v7686_v28  ;;  %v7246_v27 = vcombine.high %v4228_v23, %v4230_v24  ;;  %v4223_v28 = vld [vmem:[%s10627_s1 + $0x350] sm:$0xff]  ;;  %v4224_v30 = vld [vmem:[%s10627_s1 + $0x358] sm:$0xff] }
 0x552   :  { %v7667_v33 = vpop.f32.mrf.mxu0  ;;  %v7689_v34 = vpop.f32.mrf.mxu1  ;;  %v4225_v29 = vld [vmem:[%s10627_s1 + $0x3d0] sm:$0xff] }
 0x553   :  { %v3369_v35 = vadd.f32 %v7688_v32, %v7666_v31  ;;  %v4226_v31 = vld [vmem:[%s10627_s1 + $0x3d8] sm:$0xff]  ;;  %v7243_v32 = vcombine.low %v4227_v21, %v4229_v22  ;;  %v7245_v33 = vcombine.low %v4228_v23, %v4230_v24  ;;  %v7240_v34 = vcombine.high %v4223_v28, %v4225_v29  ;;  %v4265_v21 = vld [vmem:[%s10627_s1 + $0xdd0] sm:$0xff] }
 0x554   :  { %v7668_v36 = vpop.f32.mrf.mxu0  ;;  %v7690_v37 = vpop.f32.mrf.mxu1  ;;  %v4264_v22 = vld [vmem:[%s10627_s1 + $0xd58] sm:$0xff] }
 0x555   :  { %v9719_v38 = vadd.f32 %v3369_v35, %v9417_v10  ;;  %v7242_v35 = vcombine.high %v4224_v30, %v4226_v31  ;;  %v4219_v36 = vld [vmem:[%s10627_s1 + $0x250] sm:$0xff]  ;;  %v4266_v23 = vld [vmem:[%s10627_s1 + $0xdd8] sm:$0xff] }
 0x556   :  { %v4221_v37 = vld [vmem:[%s10627_s1 + $0x2d0] sm:$0xff] }
 0x58e   :  { %v3816_v44 = vpop.f32.mrf.mxu0  ;;  %v3857_v46 = vpop.f32.mrf.mxu1 }
 0x58f   :  { %v3817_v47 = vadd.f32 %v3816_v44, %v3445_v40  ;;  %v3858_v48 = vadd.f32 %v3857_v46, %v3453_v41  ;;  %v4222_v40 = vld [vmem:[%s10627_s1 + $0x2d8] sm:$0xff]  ;;  %v7239_v41 = vcombine.low %v4223_v28, %v4225_v29  ;;  %v4215_v46 = vld [vmem:[%s10627_s1 + $0x150] sm:$0xff] }
 0x590   :  { %v3818_v49 = vpop.f32.mrf.mxu0  ;;  %v3859_v50 = vpop.f32.mrf.mxu1  ;;  %v7238_v44 = vcombine.high %v4220_v39, %v4222_v40  ;;  %v4261_v28 = vld [vmem:[%s10627_s1 + $0xcd0] sm:$0xff]  ;;  %v4260_v29 = vld [vmem:[%s10627_s1 + $0xc58] sm:$0xff] }
 0x591   :  { %v3819_v10 = vadd.f32 %v3818_v49, %v3449_v42  ;;  %v3860_v51 = vadd.f32 %v3859_v50, %v3457_v43  ;;  %v3864_v52 = vmax.f32 %v3817_v47, 0.0  ;;  %v3866_v53 = vmax.f32 %v3858_v48, 0.0  ;;  %v4217_v47 = vld [vmem:[%s10627_s1 + $0x1d0] sm:$0xff]  ;;  %v4216_v48 = vld [vmem:[%s10627_s1 + $0x158] sm:$0xff] }
 0x592   :  { %v3820_v54 = vpop.f32.mrf.mxu0  ;;  %v3861_v55 = vpop.f32.mrf.mxu1  ;;  %v7241_v42 = vcombine.low %v4224_v30, %v4226_v31  ;;  %v7236_v43 = vcombine.high %v4219_v36, %v4221_v37  ;;  %v4218_v49 = vld [vmem:[%s10627_s1 + $0x1d8] sm:$0xff]  ;;  %v7235_v50 = vcombine.low %v4219_v36, %v4221_v37  ;;  %v4257_v36 = vld [vmem:[%s10627_s1 + $0xbd0] sm:$0xff] }
 0x593   :  { %v3865_v58 = vmax.f32 %v3819_v10, 0.0  ;;  %v3867_v15 = vmax.f32 %v3860_v51, 0.0  ;;  %v3869_v5 = vpack.c.bf16 %v3864_v52, %v3864_v52  ;;  %v3871_v6 = vpack.c.bf16 %v3866_v53, %v3866_v53  ;;  %v4211_v53 = vld [vmem:[%s10627_s1 + $0x50] sm:$0xff]  ;;  %v4212_v55 = vld [vmem:[%s10627_s1 + $0x58] sm:$0xff] }
 0x594   :  { %v3821_v62 = vpop.f32.mrf.mxu0  ;;  %v3862_v63 = vpop.f32.mrf.mxu1  ;;  %v7237_v10 = vcombine.low %v4220_v39, %v4222_v40  ;;  %v7232_v51 = vcombine.high %v4215_v46, %v4217_v47  ;;  %v7234_v52 = vcombine.high %v4216_v48, %v4218_v49  ;;  %v4213_v54 = vld [vmem:[%s10627_s1 + $0xd0] sm:$0xff]  ;;  %v7233_v61 = vcombine.low %v4216_v48, %v4218_v49  ;;  %v4262_v30 = vld [vmem:[%s10627_s1 + $0xcd8] sm:$0xff] }
 0x595   :  { %v3870_v3 = vpack.c.bf16 %v3865_v58, %v3865_v58  ;;  %v3872_v4 = vpack.c.bf16 %v3867_v15, %v3867_v15  ;;  %v4214_v58 = vld [vmem:[%s10627_s1 + $0xd8] sm:$0xff]  ;;  %v7231_v15 = vcombine.low %v4215_v46, %v4217_v47  ;;  %v7228_v62 = vcombine.high %v4211_v53, %v4213_v54  ;;  %v4253_v46 = vld [vmem:[%s10627_s1 + $0xad0] sm:$0xff] }
 0x596   :  { %v7230_v63 = vcombine.high %v4212_v55, %v4214_v58  ;;  %v4256_v37 = vld [vmem:[%s10627_s1 + $0xb58] sm:$0xff] }
 0x597   :  { %4161 = vmatprep.mubr.bf16.mxu0 %v3870_v3  ;;  %4201 = vmatprep.mubr.bf16.mxu1 %v3872_v4  ;;  %v4274_v3 = vld [vmem:[%s10627_s1 + $0xfd8] sm:$0xff]  ;;  %v7227_v4 = vcombine.low %v4211_v53, %v4213_v54  ;;  %v4249_v53 = vld [vmem:[%s10627_s1 + $0x9d0] sm:$0xff] }
 0x598   :  { %4162 = vmatmul.mubr.bf16.vlgmr.msra.gmra.mxu0 %v3869_v5  ;;  %4202 = vmatmul.mubr.bf16.vlgmr.msra.gmra.mxu1 %v3871_v6  ;;  %v7229_v5 = vcombine.low %v4212_v55, %v4214_v58  ;;  %v7288_v6 = vcombine.high %v4271_v0, %v4273_v1  ;;  %v4258_v39 = vld [vmem:[%s10627_s1 + $0xbd8] sm:$0xff] }
 0x599   :  { %4618 = vmatpush1.bf16.msra.mxu0 %v7255_v45  ;;  %4659 = vmatpush1.bf16.msra.mxu1 %v7257_v25  ;;  %v7247_v45 = vcombine.low %v4231_v7, %v4233_v11  ;;  %v7249_v25 = vcombine.low %v4232_v12, %v4234_v13  ;;  %v7290_v7 = vcombine.high %v4272_v2, %v4274_v3  ;;  %v4268_v11 = vld [vmem:[%s10627_s1 + $0xe58] sm:$0xff] }
 0x59a   :  { %4649 = vmatprep.mubr.bf16.mxu0 %v8410_v19  ;;  %4690 = vmatprep.mubr.bf16.mxu1 %v8410_v19  ;;  %v4270_v12 = vld [vmem:[%s10627_s1 + $0xed8] sm:$0xff]  ;;  %v7287_v13 = vcombine.low %v4271_v0, %v4273_v1  ;;  %v4245_v0 = vld [vmem:[%s10627_s1 + $0x8d0] sm:$0xff] }
 0x59b   :  { %4619 = vmatprep.subr.bf16.mxu0 %v7252_v8  ;;  %4660 = vmatprep.subr.bf16.mxu1 %v7254_v9  ;;  %v4267_v8 = vld [vmem:[%s10627_s1 + $0xe50] sm:$0xff]  ;;  %v4252_v47 = vld [vmem:[%s10627_s1 + $0xa58] sm:$0xff] }
 0x59c   :  { %v4269_v9 = vld [vmem:[%s10627_s1 + $0xed0] sm:$0xff]  ;;  %v4254_v48 = vld [vmem:[%s10627_s1 + $0xad8] sm:$0xff] }
 0x59d   :  { %4620 = vmatpush1.bf16.msra.mxu0 %v7251_v14  ;;  %4661 = vmatpush1.bf16.msra.mxu1 %v7253_v16  ;;  %v7289_v14 = vcombine.low %v4272_v2, %v4274_v3  ;;  %v7284_v16 = vcombine.high %v4267_v8, %v4269_v9  ;;  %v7283_v24 = vcombine.low %v4267_v8, %v4269_v9  ;;  %v4248_v54 = vld [vmem:[%s10627_s1 + $0x958] sm:$0xff] }
 0x59e   :  { %4621 = vmatprep.subr.bf16.mxu0 %v7248_v17  ;;  %4662 = vmatprep.subr.bf16.mxu1 %v7250_v20  ;;  %v7286_v17 = vcombine.high %v4268_v11, %v4270_v12  ;;  %v4263_v20 = vld [vmem:[%s10627_s1 + $0xd50] sm:$0xff]  ;;  %v4250_v55 = vld [vmem:[%s10627_s1 + $0x9d8] sm:$0xff] }
 0x59f   :  { %v7279_v31 = vcombine.low %v4263_v20, %v4265_v21  ;;  %v4244_v1 = vld [vmem:[%s10627_s1 + $0x858] sm:$0xff] }
 0x5a0   :  { %v4246_v2 = vld [vmem:[%s10627_s1 + $0x8d8] sm:$0xff] }
 0x5a1   :  { %4622 = vmatpush1.bf16.msra.mxu0 %v7247_v45  ;;  %4663 = vmatpush1.bf16.msra.mxu1 %v7249_v25  ;;  %v7285_v45 = vcombine.low %v4268_v11, %v4270_v12  ;;  %v7280_v25 = vcombine.high %v4263_v20, %v4265_v21  ;;  %v7261_v8 = vcombine.low %v4244_v1, %v4246_v2  ;;  %v8029_v9 = vld [vmem:[%s10629_s3 + $0x578] sm:$0xff]   ;;  %v8036_v20 = vld [vmem:[%s10629_s3 + $0x5b0] sm:$0xff]   ;;  %v8037_v21 = vld [vmem:[%s10629_s3 + $0x568] sm:$0xff]  }
 0x5a2   :  { %4623 = vmatprep.subr.bf16.mxu0 %v7244_v26  ;;  %4664 = vmatprep.subr.bf16.mxu1 %v7246_v27  ;;  %v7282_v26 = vcombine.high %v4264_v22, %v4266_v23  ;;  %v4259_v27 = vld [vmem:[%s10627_s1 + $0xc50] sm:$0xff]  ;;  %v8030_v11 = vld [vmem:[%s10629_s3 + $0x5f8] sm:$0xff]  }
 0x5a3   :  { %v7275_v40 = vcombine.low %v4259_v27, %v4261_v28  ;;  %v8031_v12 = vld [vmem:[%s10629_s3 + $0x538] sm:$0xff]  }
 0x5a5   :  { %4624 = vmatpush1.bf16.msra.mxu0 %v7243_v32  ;;  %4665 = vmatpush1.bf16.msra.mxu1 %v7245_v33  ;;  %v7281_v32 = vcombine.low %v4264_v22, %v4266_v23  ;;  %v7276_v33 = vcombine.high %v4259_v27, %v4261_v28  ;;  %v8038_v22 = vld [vmem:[%s10629_s3 + $0x5e8] sm:$0xff]   ;;  %v8044_v27 = vld [vmem:[%s10629_s3 + $0x5a0] sm:$0xff]   ;;  %v8045_v28 = vld [vmem:[%s10629_s3 + $0x558] sm:$0xff]  }
 0x5a6   :  { %4625 = vmatprep.subr.bf16.mxu0 %v7240_v34  ;;  %4666 = vmatprep.subr.bf16.mxu1 %v7242_v35  ;;  %v7278_v34 = vcombine.high %v4260_v29, %v4262_v30  ;;  %v4255_v35 = vld [vmem:[%s10627_s1 + $0xb50] sm:$0xff]  ;;  %v8039_v23 = vld [vmem:[%s10629_s3 + $0x528] sm:$0xff]  }
 0x5a7   :  { %v7271_v49 = vcombine.low %v4255_v35, %v4257_v36 }
 0x5a9   :  { %4626 = vmatpush1.bf16.msra.mxu0 %v7239_v41  ;;  %4667 = vmatpush1.bf16.msra.mxu1 %v7241_v42  ;;  %v7277_v41 = vcombine.low %v4260_v29, %v4262_v30  ;;  %v7272_v42 = vcombine.high %v4255_v35, %v4257_v36  ;;  %v8046_v29 = vld [vmem:[%s10629_s3 + $0x5d8] sm:$0xff]   ;;  %v8052_v35 = vld [vmem:[%s10629_s3 + $0x590] sm:$0xff]   ;;  %v8053_v36 = vld [vmem:[%s10629_s3 + $0x548] sm:$0xff]  }
 0x5aa   :  { %4627 = vmatprep.subr.bf16.mxu0 %v7236_v43  ;;  %4668 = vmatprep.subr.bf16.mxu1 %v7238_v44  ;;  %v7274_v43 = vcombine.high %v4256_v37, %v4258_v39  ;;  %v4251_v44 = vld [vmem:[%s10627_s1 + $0xa50] sm:$0xff]  ;;  %v8047_v30 = vld [vmem:[%s10629_s3 + $0x518] sm:$0xff]  }
 0x5ab   :  { %v7267_v58 = vcombine.low %v4251_v44, %v4253_v46 }
 0x5ad   :  { %4628 = vmatpush1.bf16.msra.mxu0 %v7235_v50  ;;  %4669 = vmatpush1.bf16.msra.mxu1 %v7237_v10  ;;  %v7273_v50 = vcombine.low %v4256_v37, %v4258_v39  ;;  %v7268_v10 = vcombine.high %v4251_v44, %v4253_v46  ;;  %v8054_v37 = vld [vmem:[%s10629_s3 + $0x5c8] sm:$0xff]   ;;  %v8060_v44 = vld [vmem:[%s10629_s3 + $0x580] sm:$0xff]  }
 0x5ae   :  { %4629 = vmatprep.subr.bf16.mxu0 %v7232_v51  ;;  %4670 = vmatprep.subr.bf16.mxu1 %v7234_v52  ;;  %v7270_v51 = vcombine.high %v4252_v47, %v4254_v48  ;;  %v4247_v52 = vld [vmem:[%s10627_s1 + $0x950] sm:$0xff]  ;;  %v8055_v39 = vld [vmem:[%s10629_s3 + $0x508] sm:$0xff]   ;;  %v5074_v46 = vld [vmem:[%s10627_s1 + $0x760] sm:$0xff] }
 0x5af   :  { %v7263_v3 = vcombine.low %v4247_v52, %v4249_v53 }
 0x5b1   :  { %4630 = vmatpush1.bf16.msra.mxu0 %v7231_v15  ;;  %4671 = vmatpush1.bf16.msra.mxu1 %v7233_v61  ;;  %v7269_v15 = vcombine.low %v4252_v47, %v4254_v48  ;;  %v7264_v61 = vcombine.high %v4247_v52, %v4249_v53  ;;  %v5076_v47 = vld [vmem:[%s10627_s1 + $0x7e0] sm:$0xff]  ;;  %v5075_v48 = vld [vmem:[%s10627_s1 + $0x768] sm:$0xff] }
 0x5b2   :  { %4631 = vmatprep.subr.bf16.mxu0 %v7228_v62  ;;  %4672 = vmatprep.subr.bf16.mxu1 %v7230_v63  ;;  %v7266_v62 = vcombine.high %v4248_v54, %v4250_v55  ;;  %v4243_v63 = vld [vmem:[%s10627_s1 + $0x850] sm:$0xff] }
 0x5b5   :  { %4632 = vmatpush1.bf16.msra.mxu0 %v7227_v4  ;;  %4673 = vmatpush1.bf16.msra.mxu1 %v7229_v5  ;;  %v7265_v4 = vcombine.low %v4248_v54, %v4250_v55  ;;  %v7260_v5 = vcombine.high %v4243_v63, %v4245_v0 }
 0x5b6   :  { %4633 = vmatprep.subr.bf16.mxu0 %v7288_v6  ;;  %4674 = vmatprep.subr.bf16.mxu1 %v7290_v7  ;;  %v7262_v6 = vcombine.high %v4244_v1, %v4246_v2  ;;  %v7259_v7 = vcombine.low %v4243_v63, %v4245_v0 }
 0x5b9   :  { %4634 = vmatpush2.bf16.msra.mxu0 %v7287_v13  ;;  %4675 = vmatpush2.bf16.msra.mxu1 %v7289_v14  ;;  %v8032_v13 = vld [vmem:[%s10629_s3 + $0x5b8] sm:$0xff]   ;;  %v8033_v14 = vld [vmem:[%s10629_s3 + $0x570] sm:$0xff]  }
 0x5ba   :  { %4635 = vmatprep.subr.bf16.mxu0 %v7284_v16  ;;  %4676 = vmatprep.subr.bf16.mxu1 %v7286_v17  ;;  %v8034_v16 = vld [vmem:[%s10629_s3 + $0x5f0] sm:$0xff]  }
 0x5bb   :  { %v8035_v17 = vld [vmem:[%s10629_s3 + $0x530] sm:$0xff]  }
 0x5bd   :  { %4636 = vmatpush2.bf16.msra.mxu0 %v7283_v24  ;;  %4677 = vmatpush2.bf16.msra.mxu1 %v7285_v45  ;;  %v8040_v24 = vld [vmem:[%s10629_s3 + $0x5a8] sm:$0xff]   ;;  %v8041_v45 = vld [vmem:[%s10629_s3 + $0x560] sm:$0xff]  }
 0x5be   :  { %4637 = vmatprep.subr.bf16.mxu0 %v7280_v25  ;;  %4678 = vmatprep.subr.bf16.mxu1 %v7282_v26  ;;  %v8042_v25 = vld [vmem:[%s10629_s3 + $0x5e0] sm:$0xff]  }
 0x5bf   :  { %v8043_v26 = vld [vmem:[%s10629_s3 + $0x520] sm:$0xff]  }
 0x5c1   :  { %4638 = vmatpush2.bf16.msra.mxu0 %v7279_v31  ;;  %4679 = vmatpush2.bf16.msra.mxu1 %v7281_v32  ;;  %v8048_v31 = vld [vmem:[%s10629_s3 + $0x598] sm:$0xff]   ;;  %v8049_v32 = vld [vmem:[%s10629_s3 + $0x550] sm:$0xff]  }
 0x5c2   :  { %4639 = vmatprep.subr.bf16.mxu0 %v7276_v33  ;;  %4680 = vmatprep.subr.bf16.mxu1 %v7278_v34  ;;  %v8050_v33 = vld [vmem:[%s10629_s3 + $0x5d0] sm:$0xff]  }
 0x5c3   :  { %v8051_v34 = vld [vmem:[%s10629_s3 + $0x510] sm:$0xff]  }
 0x5c5   :  { %4640 = vmatpush2.bf16.msra.mxu0 %v7275_v40  ;;  %4681 = vmatpush2.bf16.msra.mxu1 %v7277_v41  ;;  %v8056_v40 = vld [vmem:[%s10629_s3 + $0x588] sm:$0xff]   ;;  %v8057_v41 = vld [vmem:[%s10629_s3 + $0x540] sm:$0xff]  }
 0x5c6   :  { %4641 = vmatprep.subr.bf16.mxu0 %v7272_v42  ;;  %4682 = vmatprep.subr.bf16.mxu1 %v7274_v43  ;;  %v8058_v42 = vld [vmem:[%s10629_s3 + $0x5c0] sm:$0xff]  }
 0x5c7   :  { %v8059_v43 = vld [vmem:[%s10629_s3 + $0x500] sm:$0xff]  }
 0x5c9   :  { %4642 = vmatpush2.bf16.msra.mxu0 %v7271_v49  ;;  %4683 = vmatpush2.bf16.msra.mxu1 %v7273_v50  ;;  %v7352_v49 = vcombine.high %v5074_v46, %v5076_v47  ;;  %v5077_v50 = vld [vmem:[%s10627_s1 + $0x7e8] sm:$0xff] }
 0x5ca   :  { %4643 = vmatprep.subr.bf16.mxu0 %v7268_v10  ;;  %4684 = vmatprep.subr.bf16.mxu1 %v7270_v51  ;;  %v7351_v10 = vcombine.low %v5074_v46, %v5076_v47  ;;  %v7353_v51 = vcombine.low %v5075_v48, %v5077_v50  ;;  %v7354_v52 = vcombine.high %v5075_v48, %v5077_v50  ;;  %v5062_v47 = vld [vmem:[%s10627_s1 + $0x460] sm:$0xff]  ;;  %v5065_v50 = vld [vmem:[%s10627_s1 + $0x4e8] sm:$0xff] }
 0x5cb   :  { %v5064_v48 = vld [vmem:[%s10627_s1 + $0x4e0] sm:$0xff] }
 0x5cd   :  { %4644 = vmatpush2.bf16.msra.mxu0 %v7267_v58  ;;  %4685 = vmatpush2.bf16.msra.mxu1 %v7269_v15 }
 0x5ce   :  { %4645 = vmatprep.subr.bf16.mxu0 %v7264_v61  ;;  %4686 = vmatprep.subr.bf16.mxu1 %v7266_v62 }
 0x5d1   :  { %4646 = vmatpush2.bf16.msra.mxu0 %v7263_v3  ;;  %4687 = vmatpush2.bf16.msra.mxu1 %v7265_v4  ;;  %v4275_v4 = vld [vmem:[%s10628_s2 + $0x14] sm:$0xf] }
 0x5d2   :  { %4647 = vmatprep.subr.bf16.mxu0 %v7260_v5  ;;  %4688 = vmatprep.subr.bf16.mxu1 %v7262_v6  ;;  %v4280_v5 = vrot.slane %v4275_v4, %v8506_v56  ;;  %v4288_v6 = vrot.slane %v4275_v4, %v8508_v57 }
 0x5d5   :  { %4648 = vmatpush2.bf16.msra.mxu0 %v7259_v7  ;;  %4689 = vmatpush2.bf16.msra.mxu1 %v7261_v8  ;;  %v4284_v7 = vrot.slane %v4275_v4, %v8513_v59  ;;  %v4292_v8 = vrot.slane %v4275_v4, %v8515_v60  ;;  %v5055_v4 = vld [vmem:[%s10627_s1 + $0x268] sm:$0xff] }
 0x5d6   :  { %7736 = vmatprep.subr.bf16.mxu0 %v8029_v9  ;;  %7758 = vmatprep.subr.bf16.mxu1 %v8030_v11 }
 0x5d8   :  { %4650 = vmatmul.mubr.bf16.vlgmr.msra.gmra.mxu0 %v8408_v18  ;;  %4691 = vmatmul.mubr.bf16.vlgmr.msra.gmra.mxu1 %v8408_v18 }
 0x5d9   :  { %7737 = vmatpush3.bf16.msra.mxu0 %v8031_v12  ;;  %7759 = vmatpush3.bf16.msra.mxu1 %v8032_v13 }
 0x5da   :  { %7738 = vmatprep.subr.bf16.mxu0 %v8033_v14  ;;  %7760 = vmatprep.subr.bf16.mxu1 %v8034_v16 }
 0x5dd   :  { %7739 = vmatpush3.bf16.msra.mxu0 %v8035_v17  ;;  %7761 = vmatpush3.bf16.msra.mxu1 %v8036_v20 }
 0x5de   :  { %7740 = vmatprep.subr.bf16.mxu0 %v8037_v21  ;;  %7762 = vmatprep.subr.bf16.mxu1 %v8038_v22 }
 0x5e1   :  { %7741 = vmatpush3.bf16.msra.mxu0 %v8039_v23  ;;  %7763 = vmatpush3.bf16.msra.mxu1 %v8040_v24 }
 0x5e2   :  { %7742 = vmatprep.subr.bf16.mxu0 %v8041_v45  ;;  %7764 = vmatprep.subr.bf16.mxu1 %v8042_v25  ;;  %v5070_v25 = vld [vmem:[%s10627_s1 + $0x660] sm:$0xff] }
 0x5e5   :  { %7743 = vmatpush3.bf16.msra.mxu0 %v8043_v26  ;;  %7765 = vmatpush3.bf16.msra.mxu1 %v8044_v27 }
 0x5e6   :  { %7744 = vmatprep.subr.bf16.mxu0 %v8045_v28  ;;  %7766 = vmatprep.subr.bf16.mxu1 %v8046_v29  ;;  %v5072_v28 = vld [vmem:[%s10627_s1 + $0x6e0] sm:$0xff]  ;;  %v5071_v29 = vld [vmem:[%s10627_s1 + $0x668] sm:$0xff] }
 0x5e9   :  { %7745 = vmatpush3.bf16.msra.mxu0 %v8047_v30  ;;  %7767 = vmatpush3.bf16.msra.mxu1 %v8048_v31  ;;  %v5073_v30 = vld [vmem:[%s10627_s1 + $0x6e8] sm:$0xff] }
 0x5ea   :  { %7746 = vmatprep.subr.bf16.mxu0 %v8049_v32  ;;  %7768 = vmatprep.subr.bf16.mxu1 %v8050_v33 }
 0x5ed   :  { %7747 = vmatpush3.bf16.msra.mxu0 %v8051_v34  ;;  %7769 = vmatpush3.bf16.msra.mxu1 %v8052_v35  ;;  %v5066_v35 = vld [vmem:[%s10627_s1 + $0x560] sm:$0xff] }
 0x5ee   :  { %7748 = vmatprep.subr.bf16.mxu0 %v8053_v36  ;;  %7770 = vmatprep.subr.bf16.mxu1 %v8054_v37  ;;  %v7348_v36 = vcombine.high %v5070_v25, %v5072_v28  ;;  %v7350_v37 = vcombine.high %v5071_v29, %v5073_v30 }
 0x5f1   :  { %7749 = vmatpush3.bf16.msra.mxu0 %v8055_v39  ;;  %7771 = vmatpush3.bf16.msra.mxu1 %v8056_v40  ;;  %v5068_v39 = vld [vmem:[%s10627_s1 + $0x5e0] sm:$0xff]  ;;  %v5067_v40 = vld [vmem:[%s10627_s1 + $0x568] sm:$0xff] }
 0x5f2   :  { %7750 = vmatprep.subr.bf16.mxu0 %v8057_v41  ;;  %7772 = vmatprep.subr.bf16.mxu1 %v8058_v42  ;;  %v5069_v41 = vld [vmem:[%s10627_s1 + $0x5e8] sm:$0xff]  ;;  %v7347_v42 = vcombine.low %v5070_v25, %v5072_v28  ;;  %v5106_v28 = vld [vmem:[%s10627_s1 + $0xf60] sm:$0xff] }
 0x5f3   :  { %v7346_v46 = vcombine.high %v5067_v40, %v5069_v41 }
 0x5f5   :  { %7751 = vmatpush3.bf16.msra.mxu0 %v8059_v43  ;;  %7773 = vmatpush3.bf16.msra.mxu1 %v8060_v44  ;;  %v7349_v43 = vcombine.low %v5071_v29, %v5073_v30  ;;  %v7344_v44 = vcombine.high %v5066_v35, %v5068_v39  ;;  %v5108_v29 = vld [vmem:[%s10627_s1 + $0xfe0] sm:$0xff]  ;;  %v5107_v30 = vld [vmem:[%s10627_s1 + $0xf68] sm:$0xff] }
 0x5f6   :  { %5452 = vmatprep.subr.bf16.mxu0 %v7352_v49  ;;  %5493 = vmatprep.subr.bf16.mxu1 %v7354_v52  ;;  %v5063_v49 = vld [vmem:[%s10627_s1 + $0x468] sm:$0xff]  ;;  %v7340_v52 = vcombine.high %v5062_v47, %v5064_v48 }
 0x658   :  { %v7708_v53 = vpop.f32.mrf.mxu0  ;;  %v7730_v54 = vpop.f32.mrf.mxu1 }
 0x65a   :  { %v7709_v55 = vpop.f32.mrf.mxu0  ;;  %v7731_v58 = vpop.f32.mrf.mxu1 }
 0x65b   :  { %v7710_v15 = vadd.f32 %v7709_v55, %v7708_v53  ;;  %v7732_v61 = vadd.f32 %v7731_v58, %v7730_v54  ;;  %v7342_v53 = vcombine.high %v5063_v49, %v5065_v50  ;;  %v5058_v54 = vld [vmem:[%s10627_s1 + $0x360] sm:$0xff]  ;;  %v5059_v58 = vld [vmem:[%s10627_s1 + $0x368] sm:$0xff] }
 0x65c   :  { %v7711_v62 = vpop.f32.mrf.mxu0  ;;  %v7733_v63 = vpop.f32.mrf.mxu1  ;;  %v5060_v55 = vld [vmem:[%s10627_s1 + $0x3e0] sm:$0xff] }
 0x65d   :  { %v4204_v0 = vadd.f32 %v7732_v61, %v7710_v15  ;;  %v5061_v15 = vld [vmem:[%s10627_s1 + $0x3e8] sm:$0xff]  ;;  %v7339_v61 = vcombine.low %v5062_v47, %v5064_v48  ;;  %v7341_v62 = vcombine.low %v5063_v49, %v5065_v50  ;;  %v7336_v63 = vcombine.high %v5058_v54, %v5060_v55  ;;  %v5100_v47 = vld [vmem:[%s10627_s1 + $0xde0] sm:$0xff] }
 0x65e   :  { %v7712_v1 = vpop.f32.mrf.mxu0  ;;  %v7734_v2 = vpop.f32.mrf.mxu1  ;;  %v5099_v48 = vld [vmem:[%s10627_s1 + $0xd68] sm:$0xff] }
 0x65f   :  { %v10021_v3 = vadd.f32 %v4204_v0, %v9719_v38  ;;  %v7338_v0 = vcombine.high %v5059_v58, %v5061_v15  ;;  %v5054_v1 = vld [vmem:[%s10627_s1 + $0x260] sm:$0xff]  ;;  %v5101_v49 = vld [vmem:[%s10627_s1 + $0xde8] sm:$0xff] }
 0x660   :  { %v5056_v2 = vld [vmem:[%s10627_s1 + $0x2e0] sm:$0xff] }
 0x698   :  { %v4651_v9 = vpop.f32.mrf.mxu0  ;;  %v4692_v11 = vpop.f32.mrf.mxu1 }
 0x699   :  { %v4652_v12 = vadd.f32 %v4651_v9, %v4280_v5  ;;  %v4693_v13 = vadd.f32 %v4692_v11, %v4288_v6  ;;  %v5057_v5 = vld [vmem:[%s10627_s1 + $0x2e8] sm:$0xff]  ;;  %v7335_v6 = vcombine.low %v5058_v54, %v5060_v55  ;;  %v5050_v11 = vld [vmem:[%s10627_s1 + $0x160] sm:$0xff] }
 0x69a   :  { %v4653_v14 = vpop.f32.mrf.mxu0  ;;  %v4694_v16 = vpop.f32.mrf.mxu1  ;;  %v7334_v9 = vcombine.high %v5055_v4, %v5057_v5  ;;  %v5096_v54 = vld [vmem:[%s10627_s1 + $0xce0] sm:$0xff]  ;;  %v5095_v55 = vld [vmem:[%s10627_s1 + $0xc68] sm:$0xff] }
 0x69b   :  { %v4654_v38 = vadd.f32 %v4653_v14, %v4284_v7  ;;  %v4695_v17 = vadd.f32 %v4694_v16, %v4292_v8  ;;  %v4699_v20 = vmax.f32 %v4652_v12, 0.0  ;;  %v4701_v21 = vmax.f32 %v4693_v13, 0.0  ;;  %v5052_v12 = vld [vmem:[%s10627_s1 + $0x1e0] sm:$0xff]  ;;  %v5051_v13 = vld [vmem:[%s10627_s1 + $0x168] sm:$0xff] }
 0x69c   :  { %v4655_v22 = vpop.f32.mrf.mxu0  ;;  %v4696_v23 = vpop.f32.mrf.mxu1  ;;  %v7337_v7 = vcombine.low %v5059_v58, %v5061_v15  ;;  %v7332_v8 = vcombine.high %v5054_v1, %v5056_v2  ;;  %v5053_v14 = vld [vmem:[%s10627_s1 + $0x1e8] sm:$0xff]  ;;  %v7331_v16 = vcombine.low %v5054_v1, %v5056_v2  ;;  %v5092_v1 = vld [vmem:[%s10627_s1 + $0xbe0] sm:$0xff] }
 0x69d   :  { %v4700_v24 = vmax.f32 %v4654_v38, 0.0  ;;  %v4702_v45 = vmax.f32 %v4695_v17, 0.0  ;;  %v4704_v33 = vpack.c.bf16 %v4699_v20, %v4699_v20  ;;  %v4706_v34 = vpack.c.bf16 %v4701_v21, %v4701_v21  ;;  %v5046_v21 = vld [vmem:[%s10627_s1 + $0x60] sm:$0xff]  ;;  %v5047_v23 = vld [vmem:[%s10627_s1 + $0x68] sm:$0xff] }
 0x69e   :  { %v4656_v26 = vpop.f32.mrf.mxu0  ;;  %v4697_v27 = vpop.f32.mrf.mxu1  ;;  %v7333_v38 = vcombine.low %v5055_v4, %v5057_v5  ;;  %v7328_v17 = vcombine.high %v5050_v11, %v5052_v12  ;;  %v7330_v20 = vcombine.high %v5051_v13, %v5053_v14  ;;  %v5048_v22 = vld [vmem:[%s10627_s1 + $0xe0] sm:$0xff]  ;;  %v7329_v25 = vcombine.low %v5051_v13, %v5053_v14  ;;  %v5097_v58 = vld [vmem:[%s10627_s1 + $0xce8] sm:$0xff] }
 0x69f   :  { %v4705_v31 = vpack.c.bf16 %v4700_v24, %v4700_v24  ;;  %v4707_v32 = vpack.c.bf16 %v4702_v45, %v4702_v45  ;;  %v5049_v24 = vld [vmem:[%s10627_s1 + $0xe8] sm:$0xff]  ;;  %v7327_v45 = vcombine.low %v5050_v11, %v5052_v12  ;;  %v7324_v26 = vcombine.high %v5046_v21, %v5048_v22  ;;  %v5088_v11 = vld [vmem:[%s10627_s1 + $0xae0] sm:$0xff] }
 0x6a0   :  { %v7326_v27 = vcombine.high %v5047_v23, %v5049_v24  ;;  %v5091_v2 = vld [vmem:[%s10627_s1 + $0xb68] sm:$0xff] }
 0x6a1   :  { %4996 = vmatprep.mubr.bf16.mxu0 %v4705_v31  ;;  %5036 = vmatprep.mubr.bf16.mxu1 %v4707_v32  ;;  %v5109_v31 = vld [vmem:[%s10627_s1 + $0xfe8] sm:$0xff]  ;;  %v7323_v32 = vcombine.low %v5046_v21, %v5048_v22  ;;  %v5084_v21 = vld [vmem:[%s10627_s1 + $0x9e0] sm:$0xff] }
 0x6a2   :  { %4997 = vmatmul.mubr.bf16.vlgmr.msra.gmra.mxu0 %v4704_v33  ;;  %5037 = vmatmul.mubr.bf16.vlgmr.msra.gmra.mxu1 %v4706_v34  ;;  %v7325_v33 = vcombine.low %v5047_v23, %v5049_v24  ;;  %v7384_v34 = vcombine.high %v5106_v28, %v5108_v29  ;;  %v5093_v4 = vld [vmem:[%s10627_s1 + $0xbe8] sm:$0xff] }
 0x6a3   :  { %5453 = vmatpush1.bf16.msra.mxu0 %v7351_v10  ;;  %5494 = vmatpush1.bf16.msra.mxu1 %v7353_v51  ;;  %v7343_v10 = vcombine.low %v5066_v35, %v5068_v39  ;;  %v7345_v51 = vcombine.low %v5067_v40, %v5069_v41  ;;  %v7386_v35 = vcombine.high %v5107_v30, %v5109_v31  ;;  %v5103_v39 = vld [vmem:[%s10627_s1 + $0xe68] sm:$0xff] }
 0x6a4   :  { %5484 = vmatprep.mubr.bf16.mxu0 %v8410_v19  ;;  %5525 = vmatprep.mubr.bf16.mxu1 %v8410_v19  ;;  %v5105_v40 = vld [vmem:[%s10627_s1 + $0xee8] sm:$0xff]  ;;  %v7383_v41 = vcombine.low %v5106_v28, %v5108_v29  ;;  %v5080_v28 = vld [vmem:[%s10627_s1 + $0x8e0] sm:$0xff] }
 0x6a5   :  { %5454 = vmatprep.subr.bf16.mxu0 %v7348_v36  ;;  %5495 = vmatprep.subr.bf16.mxu1 %v7350_v37  ;;  %v5102_v36 = vld [vmem:[%s10627_s1 + $0xe60] sm:$0xff]  ;;  %v5087_v12 = vld [vmem:[%s10627_s1 + $0xa68] sm:$0xff] }
 0x6a6   :  { %v5104_v37 = vld [vmem:[%s10627_s1 + $0xee0] sm:$0xff]  ;;  %v5089_v13 = vld [vmem:[%s10627_s1 + $0xae8] sm:$0xff] }
 0x6a7   :  { %5455 = vmatpush1.bf16.msra.mxu0 %v7347_v42  ;;  %5496 = vmatpush1.bf16.msra.mxu1 %v7349_v43  ;;  %v7385_v42 = vcombine.low %v5107_v30, %v5109_v31  ;;  %v7380_v43 = vcombine.high %v5102_v36, %v5104_v37  ;;  %v7379_v50 = vcombine.low %v5102_v36, %v5104_v37  ;;  %v5083_v22 = vld [vmem:[%s10627_s1 + $0x968] sm:$0xff]  ;;  %v8061_v37 = vld [vmem:[%s10629_s3 + $0x678] sm:$0xff]  }
 0x6a8   :  { %5456 = vmatprep.subr.bf16.mxu0 %v7344_v44  ;;  %5497 = vmatprep.subr.bf16.mxu1 %v7346_v46  ;;  %v7382_v44 = vcombine.high %v5103_v39, %v5105_v40  ;;  %v5098_v46 = vld [vmem:[%s10627_s1 + $0xd60] sm:$0xff]  ;;  %v5085_v23 = vld [vmem:[%s10627_s1 + $0x9e8] sm:$0xff] }
 0x6a9   :  { %v7375_v15 = vcombine.low %v5098_v46, %v5100_v47  ;;  %v5079_v29 = vld [vmem:[%s10627_s1 + $0x868] sm:$0xff] }
 0x6aa   :  { %v5081_v30 = vld [vmem:[%s10627_s1 + $0x8e8] sm:$0xff] }
 0x6ab   :  { %5457 = vmatpush1.bf16.msra.mxu0 %v7343_v10  ;;  %5498 = vmatpush1.bf16.msra.mxu1 %v7345_v51  ;;  %v7381_v10 = vcombine.low %v5103_v39, %v5105_v40  ;;  %v7376_v51 = vcombine.high %v5098_v46, %v5100_v47  ;;  %v7357_v36 = vcombine.low %v5079_v29, %v5081_v30  ;;  %v8062_v39 = vld [vmem:[%s10629_s3 + $0x6f8] sm:$0xff]   ;;  %v8068_v46 = vld [vmem:[%s10629_s3 + $0x6b0] sm:$0xff]   ;;  %v8069_v47 = vld [vmem:[%s10629_s3 + $0x668] sm:$0xff]  }
 0x6ac   :  { %5458 = vmatprep.subr.bf16.mxu0 %v7340_v52  ;;  %5499 = vmatprep.subr.bf16.mxu1 %v7342_v53  ;;  %v7378_v52 = vcombine.high %v5099_v48, %v5101_v49  ;;  %v5094_v53 = vld [vmem:[%s10627_s1 + $0xc60] sm:$0xff]  ;;  %v8063_v40 = vld [vmem:[%s10629_s3 + $0x638] sm:$0xff]  }
 0x6ad   :  { %v7371_v5 = vcombine.low %v5094_v53, %v5096_v54 }
 0x6af   :  { %5459 = vmatpush1.bf16.msra.mxu0 %v7339_v61  ;;  %5500 = vmatpush1.bf16.msra.mxu1 %v7341_v62  ;;  %v7377_v61 = vcombine.low %v5099_v48, %v5101_v49  ;;  %v7372_v62 = vcombine.high %v5094_v53, %v5096_v54  ;;  %v8070_v48 = vld [vmem:[%s10629_s3 + $0x6e8] sm:$0xff]   ;;  %v8076_v53 = vld [vmem:[%s10629_s3 + $0x6a0] sm:$0xff]   ;;  %v8077_v54 = vld [vmem:[%s10629_s3 + $0x658] sm:$0xff]  }
 0x6b0   :  { %5460 = vmatprep.subr.bf16.mxu0 %v7336_v63  ;;  %5501 = vmatprep.subr.bf16.mxu1 %v7338_v0  ;;  %v7374_v63 = vcombine.high %v5095_v55, %v5097_v58  ;;  %v5090_v0 = vld [vmem:[%s10627_s1 + $0xb60] sm:$0xff]  ;;  %v8071_v49 = vld [vmem:[%s10629_s3 + $0x628] sm:$0xff]  }
 0x6b1   :  { %v7367_v14 = vcombine.low %v5090_v0, %v5092_v1 }
 0x6b3   :  { %5461 = vmatpush1.bf16.msra.mxu0 %v7335_v6  ;;  %5502 = vmatpush1.bf16.msra.mxu1 %v7337_v7  ;;  %v7373_v6 = vcombine.low %v5095_v55, %v5097_v58  ;;  %v7368_v7 = vcombine.high %v5090_v0, %v5092_v1  ;;  %v8078_v55 = vld [vmem:[%s10629_s3 + $0x6d8] sm:$0xff]   ;;  %v8084_v0 = vld [vmem:[%s10629_s3 + $0x690] sm:$0xff]   ;;  %v8085_v1 = vld [vmem:[%s10629_s3 + $0x648] sm:$0xff]  }
 0x6b4   :  { %5462 = vmatprep.subr.bf16.mxu0 %v7332_v8  ;;  %5503 = vmatprep.subr.bf16.mxu1 %v7334_v9  ;;  %v7370_v8 = vcombine.high %v5091_v2, %v5093_v4  ;;  %v5086_v9 = vld [vmem:[%s10627_s1 + $0xa60] sm:$0xff]  ;;  %v8079_v58 = vld [vmem:[%s10629_s3 + $0x618] sm:$0xff]  }
 0x6b5   :  { %v7363_v24 = vcombine.low %v5086_v9, %v5088_v11 }
 0x6b7   :  { %5463 = vmatpush1.bf16.msra.mxu0 %v7331_v16  ;;  %5504 = vmatpush1.bf16.msra.mxu1 %v7333_v38  ;;  %v7369_v16 = vcombine.low %v5091_v2, %v5093_v4  ;;  %v7364_v38 = vcombine.high %v5086_v9, %v5088_v11  ;;  %v8086_v2 = vld [vmem:[%s10629_s3 + $0x6c8] sm:$0xff]   ;;  %v8092_v9 = vld [vmem:[%s10629_s3 + $0x680] sm:$0xff]   ;;  %v5909_v11 = vld [vmem:[%s10627_s1 + $0x770] sm:$0xff] }
 0x6b8   :  { %5464 = vmatprep.subr.bf16.mxu0 %v7328_v17  ;;  %5505 = vmatprep.subr.bf16.mxu1 %v7330_v20  ;;  %v7366_v17 = vcombine.high %v5087_v12, %v5089_v13  ;;  %v5082_v20 = vld [vmem:[%s10627_s1 + $0x960] sm:$0xff]  ;;  %v8087_v4 = vld [vmem:[%s10629_s3 + $0x608] sm:$0xff]  }
 0x6b9   :  { %v7359_v31 = vcombine.low %v5082_v20, %v5084_v21 }
 0x6bb   :  { %5465 = vmatpush1.bf16.msra.mxu0 %v7327_v45  ;;  %5506 = vmatpush1.bf16.msra.mxu1 %v7329_v25  ;;  %v7365_v45 = vcombine.low %v5087_v12, %v5089_v13  ;;  %v7360_v25 = vcombine.high %v5082_v20, %v5084_v21  ;;  %v5911_v12 = vld [vmem:[%s10627_s1 + $0x7f0] sm:$0xff]  ;;  %v5910_v13 = vld [vmem:[%s10627_s1 + $0x778] sm:$0xff] }
 0x6bc   :  { %5466 = vmatprep.subr.bf16.mxu0 %v7324_v26  ;;  %5507 = vmatprep.subr.bf16.mxu1 %v7326_v27  ;;  %v7362_v26 = vcombine.high %v5083_v22, %v5085_v23  ;;  %v5078_v27 = vld [vmem:[%s10627_s1 + $0x860] sm:$0xff] }
 0x6bf   :  { %5467 = vmatpush1.bf16.msra.mxu0 %v7323_v32  ;;  %5508 = vmatpush1.bf16.msra.mxu1 %v7325_v33  ;;  %v7361_v32 = vcombine.low %v5083_v22, %v5085_v23  ;;  %v7356_v33 = vcombine.high %v5078_v27, %v5080_v28 }
 0x6c0   :  { %5468 = vmatprep.subr.bf16.mxu0 %v7384_v34  ;;  %5509 = vmatprep.subr.bf16.mxu1 %v7386_v35  ;;  %v7358_v34 = vcombine.high %v5079_v29, %v5081_v30  ;;  %v7355_v35 = vcombine.low %v5078_v27, %v5080_v28 }
 0x6c3   :  { %5469 = vmatpush2.bf16.msra.mxu0 %v7383_v41  ;;  %5510 = vmatpush2.bf16.msra.mxu1 %v7385_v42  ;;  %v8064_v41 = vld [vmem:[%s10629_s3 + $0x6b8] sm:$0xff]   ;;  %v8065_v42 = vld [vmem:[%s10629_s3 + $0x670] sm:$0xff]  }
 0x6c4   :  { %5470 = vmatprep.subr.bf16.mxu0 %v7380_v43  ;;  %5511 = vmatprep.subr.bf16.mxu1 %v7382_v44  ;;  %v8066_v43 = vld [vmem:[%s10629_s3 + $0x6f0] sm:$0xff]  }
 0x6c5   :  { %v8067_v44 = vld [vmem:[%s10629_s3 + $0x630] sm:$0xff]  }
 0x6c7   :  { %5471 = vmatpush2.bf16.msra.mxu0 %v7379_v50  ;;  %5512 = vmatpush2.bf16.msra.mxu1 %v7381_v10  ;;  %v8072_v50 = vld [vmem:[%s10629_s3 + $0x6a8] sm:$0xff]   ;;  %v8073_v10 = vld [vmem:[%s10629_s3 + $0x660] sm:$0xff]  }
 0x6c8   :  { %5472 = vmatprep.subr.bf16.mxu0 %v7376_v51  ;;  %5513 = vmatprep.subr.bf16.mxu1 %v7378_v52  ;;  %v8074_v51 = vld [vmem:[%s10629_s3 + $0x6e0] sm:$0xff]  }
 0x6c9   :  { %v8075_v52 = vld [vmem:[%s10629_s3 + $0x620] sm:$0xff]  }
 0x6cb   :  { %5473 = vmatpush2.bf16.msra.mxu0 %v7375_v15  ;;  %5514 = vmatpush2.bf16.msra.mxu1 %v7377_v61  ;;  %v8080_v15 = vld [vmem:[%s10629_s3 + $0x698] sm:$0xff]   ;;  %v8081_v61 = vld [vmem:[%s10629_s3 + $0x650] sm:$0xff]  }
 0x6cc   :  { %5474 = vmatprep.subr.bf16.mxu0 %v7372_v62  ;;  %5515 = vmatprep.subr.bf16.mxu1 %v7374_v63  ;;  %v8082_v62 = vld [vmem:[%s10629_s3 + $0x6d0] sm:$0xff]  }
 0x6cd   :  { %v8083_v63 = vld [vmem:[%s10629_s3 + $0x610] sm:$0xff]  }
 0x6cf   :  { %5475 = vmatpush2.bf16.msra.mxu0 %v7371_v5  ;;  %5516 = vmatpush2.bf16.msra.mxu1 %v7373_v6  ;;  %v8088_v5 = vld [vmem:[%s10629_s3 + $0x688] sm:$0xff]   ;;  %v8089_v6 = vld [vmem:[%s10629_s3 + $0x640] sm:$0xff]  }
 0x6d0   :  { %5476 = vmatprep.subr.bf16.mxu0 %v7368_v7  ;;  %5517 = vmatprep.subr.bf16.mxu1 %v7370_v8  ;;  %v8090_v7 = vld [vmem:[%s10629_s3 + $0x6c0] sm:$0xff]  }
 0x6d1   :  { %v8091_v8 = vld [vmem:[%s10629_s3 + $0x600] sm:$0xff]  }
 0x6d3   :  { %5477 = vmatpush2.bf16.msra.mxu0 %v7367_v14  ;;  %5518 = vmatpush2.bf16.msra.mxu1 %v7369_v16  ;;  %v7448_v14 = vcombine.high %v5909_v11, %v5911_v12  ;;  %v5912_v16 = vld [vmem:[%s10627_s1 + $0x7f8] sm:$0xff] }
 0x6d4   :  { %5478 = vmatprep.subr.bf16.mxu0 %v7364_v38  ;;  %5519 = vmatprep.subr.bf16.mxu1 %v7366_v17  ;;  %v7447_v38 = vcombine.low %v5909_v11, %v5911_v12  ;;  %v7449_v17 = vcombine.low %v5910_v13, %v5912_v16  ;;  %v7450_v20 = vcombine.high %v5910_v13, %v5912_v16  ;;  %v5897_v12 = vld [vmem:[%s10627_s1 + $0x470] sm:$0xff] }
 0x6d5   :  { %v5899_v13 = vld [vmem:[%s10627_s1 + $0x4f0] sm:$0xff] }
 0x6d7   :  { %5479 = vmatpush2.bf16.msra.mxu0 %v7363_v24  ;;  %5520 = vmatpush2.bf16.msra.mxu1 %v7365_v45 }
 0x6d8   :  { %5480 = vmatprep.subr.bf16.mxu0 %v7360_v25  ;;  %5521 = vmatprep.subr.bf16.mxu1 %v7362_v26 }
 0x6db   :  { %5481 = vmatpush2.bf16.msra.mxu0 %v7359_v31  ;;  %5522 = vmatpush2.bf16.msra.mxu1 %v7361_v32  ;;  %v5110_v32 = vld [vmem:[%s10628_s2 + $0x18] sm:$0xf] }
 0x6dc   :  { %5482 = vmatprep.subr.bf16.mxu0 %v7356_v33  ;;  %5523 = vmatprep.subr.bf16.mxu1 %v7358_v34  ;;  %v5115_v33 = vrot.slane %v5110_v32, %v8506_v56  ;;  %v5123_v34 = vrot.slane %v5110_v32, %v8508_v57 }
 0x6df   :  { %5483 = vmatpush2.bf16.msra.mxu0 %v7355_v35  ;;  %5524 = vmatpush2.bf16.msra.mxu1 %v7357_v36  ;;  %v5119_v35 = vrot.slane %v5110_v32, %v8513_v59  ;;  %v5127_v36 = vrot.slane %v5110_v32, %v8515_v60  ;;  %v5892_v32 = vld [vmem:[%s10627_s1 + $0x2f8] sm:$0xff] }
 0x6e0   :  { %7780 = vmatprep.subr.bf16.mxu0 %v8061_v37  ;;  %7802 = vmatprep.subr.bf16.mxu1 %v8062_v39 }
 0x6e2   :  { %5485 = vmatmul.mubr.bf16.vlgmr.msra.gmra.mxu0 %v8408_v18  ;;  %5526 = vmatmul.mubr.bf16.vlgmr.msra.gmra.mxu1 %v8408_v18 }
 0x6e3   :  { %7781 = vmatpush3.bf16.msra.mxu0 %v8063_v40  ;;  %7803 = vmatpush3.bf16.msra.mxu1 %v8064_v41 }
 0x6e4   :  { %7782 = vmatprep.subr.bf16.mxu0 %v8065_v42  ;;  %7804 = vmatprep.subr.bf16.mxu1 %v8066_v43 }
 0x6e7   :  { %7783 = vmatpush3.bf16.msra.mxu0 %v8067_v44  ;;  %7805 = vmatpush3.bf16.msra.mxu1 %v8068_v46 }
 0x6e8   :  { %7784 = vmatprep.subr.bf16.mxu0 %v8069_v47  ;;  %7806 = vmatprep.subr.bf16.mxu1 %v8070_v48 }
 0x6eb   :  { %7785 = vmatpush3.bf16.msra.mxu0 %v8071_v49  ;;  %7807 = vmatpush3.bf16.msra.mxu1 %v8072_v50 }
 0x6ec   :  { %7786 = vmatprep.subr.bf16.mxu0 %v8073_v10  ;;  %7808 = vmatprep.subr.bf16.mxu1 %v8074_v51  ;;  %v5905_v51 = vld [vmem:[%s10627_s1 + $0x670] sm:$0xff] }
 0x6ef   :  { %7787 = vmatpush3.bf16.msra.mxu0 %v8075_v52  ;;  %7809 = vmatpush3.bf16.msra.mxu1 %v8076_v53 }
 0x6f0   :  { %7788 = vmatprep.subr.bf16.mxu0 %v8077_v54  ;;  %7810 = vmatprep.subr.bf16.mxu1 %v8078_v55  ;;  %v5907_v54 = vld [vmem:[%s10627_s1 + $0x6f0] sm:$0xff]  ;;  %v5906_v55 = vld [vmem:[%s10627_s1 + $0x678] sm:$0xff] }
 0x6f3   :  { %7789 = vmatpush3.bf16.msra.mxu0 %v8079_v58  ;;  %7811 = vmatpush3.bf16.msra.mxu1 %v8080_v15  ;;  %v5908_v58 = vld [vmem:[%s10627_s1 + $0x6f8] sm:$0xff] }
 0x6f4   :  { %7790 = vmatprep.subr.bf16.mxu0 %v8081_v61  ;;  %7812 = vmatprep.subr.bf16.mxu1 %v8082_v62 }
 0x6f7   :  { %7791 = vmatpush3.bf16.msra.mxu0 %v8083_v63  ;;  %7813 = vmatpush3.bf16.msra.mxu1 %v8084_v0  ;;  %v5901_v0 = vld [vmem:[%s10627_s1 + $0x570] sm:$0xff] }
 0x6f8   :  { %7792 = vmatprep.subr.bf16.mxu0 %v8085_v1  ;;  %7814 = vmatprep.subr.bf16.mxu1 %v8086_v2  ;;  %v7444_v1 = vcombine.high %v5905_v51, %v5907_v54  ;;  %v7446_v2 = vcombine.high %v5906_v55, %v5908_v58 }
 0x6fb   :  { %7793 = vmatpush3.bf16.msra.mxu0 %v8087_v4  ;;  %7815 = vmatpush3.bf16.msra.mxu1 %v8088_v5  ;;  %v5903_v4 = vld [vmem:[%s10627_s1 + $0x5f0] sm:$0xff]  ;;  %v5902_v5 = vld [vmem:[%s10627_s1 + $0x578] sm:$0xff] }
 0x6fc   :  { %7794 = vmatprep.subr.bf16.mxu0 %v8089_v6  ;;  %7816 = vmatprep.subr.bf16.mxu1 %v8090_v7  ;;  %v5904_v6 = vld [vmem:[%s10627_s1 + $0x5f8] sm:$0xff]  ;;  %v7443_v7 = vcombine.low %v5905_v51, %v5907_v54  ;;  %v7439_v16 = vcombine.low %v5901_v0, %v5903_v4  ;;  %v5943_v54 = vld [vmem:[%s10627_s1 + $0xff0] sm:$0xff] }
 0x6fd   :  { %v7442_v11 = vcombine.high %v5902_v5, %v5904_v6 }
 0x6ff   :  { %7795 = vmatpush3.bf16.msra.mxu0 %v8091_v8  ;;  %7817 = vmatpush3.bf16.msra.mxu1 %v8092_v9  ;;  %v7445_v8 = vcombine.low %v5906_v55, %v5908_v58  ;;  %v7440_v9 = vcombine.high %v5901_v0, %v5903_v4  ;;  %v5942_v55 = vld [vmem:[%s10627_s1 + $0xf78] sm:$0xff]  ;;  %v5937_v0 = vld [vmem:[%s10627_s1 + $0xe70] sm:$0xff] }
 0x700   :  { %6287 = vmatprep.subr.bf16.mxu0 %v7448_v14  ;;  %6328 = vmatprep.subr.bf16.mxu1 %v7450_v20  ;;  %v5898_v14 = vld [vmem:[%s10627_s1 + $0x478] sm:$0xff] }
 0x701   :  { %v5944_v58 = vld [vmem:[%s10627_s1 + $0xff8] sm:$0xff] }
 0x702   :  { %v5940_v4 = vld [vmem:[%s10627_s1 + $0xef8] sm:$0xff] }
 0x762   :  { %v7752_v21 = vpop.f32.mrf.mxu0  ;;  %v7774_v22 = vpop.f32.mrf.mxu1 }
 0x764   :  { %v7753_v23 = vpop.f32.mrf.mxu0  ;;  %v7775_v24 = vpop.f32.mrf.mxu1 }
 0x765   :  { %v7754_v45 = vadd.f32 %v7753_v23, %v7752_v21  ;;  %v7776_v25 = vadd.f32 %v7775_v24, %v7774_v22  ;;  %v5893_v21 = vld [vmem:[%s10627_s1 + $0x370] sm:$0xff]  ;;  %v5894_v23 = vld [vmem:[%s10627_s1 + $0x378] sm:$0xff] }
 0x766   :  { %v7755_v26 = vpop.f32.mrf.mxu0  ;;  %v7777_v27 = vpop.f32.mrf.mxu1  ;;  %v5895_v22 = vld [vmem:[%s10627_s1 + $0x3f0] sm:$0xff]  ;;  %v5896_v24 = vld [vmem:[%s10627_s1 + $0x3f8] sm:$0xff] }
 0x767   :  { %v5039_v28 = vadd.f32 %v7776_v25, %v7754_v45  ;;  %v7435_v45 = vcombine.low %v5897_v12, %v5899_v13  ;;  %v7432_v26 = vcombine.high %v5893_v21, %v5895_v22  ;;  %v7434_v27 = vcombine.high %v5894_v23, %v5896_v24 }
 0x768   :  { %v7756_v29 = vpop.f32.mrf.mxu0  ;;  %v7778_v30 = vpop.f32.mrf.mxu1 }
 0x769   :  { %v10323_v31 = vadd.f32 %v5039_v28, %v10021_v3  ;;  %v5889_v28 = vld [vmem:[%s10627_s1 + $0x270] sm:$0xff]  ;;  %v5890_v30 = vld [vmem:[%s10627_s1 + $0x278] sm:$0xff] }
 0x76a   :  { %v5891_v29 = vld [vmem:[%s10627_s1 + $0x2f0] sm:$0xff] }
 0x7a2   :  { %v5486_v37 = vpop.f32.mrf.mxu0  ;;  %v5527_v39 = vpop.f32.mrf.mxu1 }
 0x7a3   :  { %v5487_v40 = vadd.f32 %v5486_v37, %v5115_v33  ;;  %v5528_v41 = vadd.f32 %v5527_v39, %v5123_v34  ;;  %v7431_v33 = vcombine.low %v5893_v21, %v5895_v22  ;;  %v7433_v34 = vcombine.low %v5894_v23, %v5896_v24  ;;  %v5885_v37 = vld [vmem:[%s10627_s1 + $0x170] sm:$0xff]  ;;  %v5930_v21 = vld [vmem:[%s10627_s1 + $0xc78] sm:$0xff] }
 0x7a4   :  { %v5488_v42 = vpop.f32.mrf.mxu0  ;;  %v5529_v43 = vpop.f32.mrf.mxu1  ;;  %v5887_v39 = vld [vmem:[%s10627_s1 + $0x1f0] sm:$0xff]  ;;  %v5932_v22 = vld [vmem:[%s10627_s1 + $0xcf8] sm:$0xff] }
 0x7a5   :  { %v5489_v3 = vadd.f32 %v5488_v42, %v5119_v35  ;;  %v5530_v44 = vadd.f32 %v5529_v43, %v5127_v36  ;;  %v5534_v46 = vmax.f32 %v5487_v40, 0.0  ;;  %v5536_v47 = vmax.f32 %v5528_v41, 0.0  ;;  %v5886_v40 = vld [vmem:[%s10627_s1 + $0x178] sm:$0xff] }
 0x7a6   :  { %v5490_v48 = vpop.f32.mrf.mxu0  ;;  %v5531_v49 = vpop.f32.mrf.mxu1  ;;  %v7428_v35 = vcombine.high %v5889_v28, %v5891_v29  ;;  %v7430_v36 = vcombine.high %v5890_v30, %v5892_v32  ;;  %v5888_v41 = vld [vmem:[%s10627_s1 + $0x1f8] sm:$0xff]  ;;  %v7427_v42 = vcombine.low %v5889_v28, %v5891_v29  ;;  %v7429_v43 = vcombine.low %v5890_v30, %v5892_v32 }
 0x7a7   :  { %v5535_v50 = vmax.f32 %v5489_v3, 0.0  ;;  %v5537_v10 = vmax.f32 %v5530_v44, 0.0  ;;  %v5539_v62 = vpack.c.bf16 %v5534_v46, %v5534_v46  ;;  %v5541_v63 = vpack.c.bf16 %v5536_v47, %v5536_v47  ;;  %v5881_v46 = vld [vmem:[%s10627_s1 + $0x70] sm:$0xff]  ;;  %v5882_v48 = vld [vmem:[%s10627_s1 + $0x78] sm:$0xff] }
 0x7a8   :  { %v5491_v52 = vpop.f32.mrf.mxu0  ;;  %v5532_v53 = vpop.f32.mrf.mxu1  ;;  %v7424_v3 = vcombine.high %v5885_v37, %v5887_v39  ;;  %v7426_v44 = vcombine.high %v5886_v40, %v5888_v41  ;;  %v5883_v47 = vld [vmem:[%s10627_s1 + $0xf0] sm:$0xff]  ;;  %v5884_v49 = vld [vmem:[%s10627_s1 + $0xf8] sm:$0xff]  ;;  %v7469_v32 = vcombine.low %v5930_v21, %v5932_v22 }
 0x7a9   :  { %v5540_v15 = vpack.c.bf16 %v5535_v50, %v5535_v50  ;;  %v5542_v61 = vpack.c.bf16 %v5537_v10, %v5537_v10  ;;  %v7423_v50 = vcombine.low %v5885_v37, %v5887_v39  ;;  %v7425_v10 = vcombine.low %v5886_v40, %v5888_v41  ;;  %v5941_v53 = vld [vmem:[%s10627_s1 + $0xf70] sm:$0xff]  ;;  %v5926_v28 = vld [vmem:[%s10627_s1 + $0xb78] sm:$0xff] }
 0x7aa   :  { %v7420_v51 = vcombine.high %v5881_v46, %v5883_v47  ;;  %v7422_v52 = vcombine.high %v5882_v48, %v5884_v49  ;;  %v5928_v29 = vld [vmem:[%s10627_s1 + $0xbf8] sm:$0xff] }
 0x7ab   :  { %5831 = vmatprep.mubr.bf16.mxu0 %v5540_v15  ;;  %5871 = vmatprep.mubr.bf16.mxu1 %v5542_v61  ;;  %v7419_v15 = vcombine.low %v5881_v46, %v5883_v47  ;;  %v7421_v61 = vcombine.low %v5882_v48, %v5884_v49  ;;  %v5922_v37 = vld [vmem:[%s10627_s1 + $0xa78] sm:$0xff]  ;;  %v7465_v41 = vcombine.low %v5926_v28, %v5928_v29 }
 0x7ac   :  { %5832 = vmatmul.mubr.bf16.vlgmr.msra.gmra.mxu0 %v5539_v62  ;;  %5872 = vmatmul.mubr.bf16.vlgmr.msra.gmra.mxu1 %v5541_v63  ;;  %v7480_v62 = vcombine.high %v5941_v53, %v5943_v54  ;;  %v7482_v63 = vcombine.high %v5942_v55, %v5944_v58  ;;  %v5924_v39 = vld [vmem:[%s10627_s1 + $0xaf8] sm:$0xff] }
 0x7ad   :  { %6288 = vmatpush1.bf16.msra.mxu0 %v7447_v38  ;;  %6329 = vmatpush1.bf16.msra.mxu1 %v7449_v17  ;;  %v7441_v38 = vcombine.low %v5902_v5, %v5904_v6  ;;  %v7436_v17 = vcombine.high %v5897_v12, %v5899_v13  ;;  %v7479_v5 = vcombine.low %v5941_v53, %v5943_v54  ;;  %v5934_v12 = vld [vmem:[%s10627_s1 + $0xd78] sm:$0xff] }
 0x7ae   :  { %6319 = vmatprep.mubr.bf16.mxu0 %v8410_v19  ;;  %6360 = vmatprep.mubr.bf16.mxu1 %v8410_v19  ;;  %v5900_v19 = vld [vmem:[%s10627_s1 + $0x4f8] sm:$0xff]  ;;  %v7481_v6 = vcombine.low %v5942_v55, %v5944_v58  ;;  %v7461_v49 = vcombine.low %v5922_v37, %v5924_v39 }
 0x7af   :  { %6289 = vmatprep.subr.bf16.mxu0 %v7444_v1  ;;  %6330 = vmatprep.subr.bf16.mxu1 %v7446_v2  ;;  %v7438_v20 = vcombine.high %v5898_v14, %v5900_v19  ;;  %v7437_v25 = vcombine.low %v5898_v14, %v5900_v19  ;;  %v5939_v1 = vld [vmem:[%s10627_s1 + $0xef0] sm:$0xff]  ;;  %v5938_v2 = vld [vmem:[%s10627_s1 + $0xe78] sm:$0xff] }
 0x7b0   :  { %v5936_v13 = vld [vmem:[%s10627_s1 + $0xdf8] sm:$0xff]  ;;  %v7475_v14 = vcombine.low %v5937_v0, %v5939_v1  ;;  %v7477_v19 = vcombine.low %v5938_v2, %v5940_v4 }
 0x7b1   :  { %6290 = vmatpush1.bf16.msra.mxu0 %v7443_v7  ;;  %6331 = vmatpush1.bf16.msra.mxu1 %v7445_v8  ;;  %v7476_v7 = vcombine.high %v5937_v0, %v5939_v1  ;;  %v7478_v8 = vcombine.high %v5938_v2, %v5940_v4  ;;  %v7473_v24 = vcombine.low %v5934_v12, %v5936_v13  ;;  %v5918_v46 = vld [vmem:[%s10627_s1 + $0x978] sm:$0xff] }
 0x7b2   :  { %6291 = vmatprep.subr.bf16.mxu0 %v7440_v9  ;;  %6332 = vmatprep.subr.bf16.mxu1 %v7442_v11  ;;  %v5933_v9 = vld [vmem:[%s10627_s1 + $0xd70] sm:$0xff]  ;;  %v5920_v47 = vld [vmem:[%s10627_s1 + $0x9f8] sm:$0xff] }
 0x7b3   :  { %v5935_v11 = vld [vmem:[%s10627_s1 + $0xdf0] sm:$0xff]  ;;  %v5914_v53 = vld [vmem:[%s10627_s1 + $0x878] sm:$0xff]  ;;  %v7457_v58 = vcombine.low %v5918_v46, %v5920_v47 }
 0x7b4   :  { %v7471_v23 = vcombine.low %v5933_v9, %v5935_v11  ;;  %v5916_v54 = vld [vmem:[%s10627_s1 + $0x8f8] sm:$0xff] }
 0x7b5   :  { %6292 = vmatpush1.bf16.msra.mxu0 %v7439_v16  ;;  %6333 = vmatpush1.bf16.msra.mxu1 %v7441_v38  ;;  %v7472_v16 = vcombine.high %v5933_v9, %v5935_v11  ;;  %v7474_v38 = vcombine.high %v5934_v12, %v5936_v13  ;;  %v8093_v0 = vld [vmem:[%s10629_s3 + $0x778] sm:$0xff]   ;;  %v8102_v9 = vld [vmem:[%s10629_s3 + $0x7e8] sm:$0xff]   ;;  %v8105_v13 = vld [vmem:[%s10629_s3 + $0x760] sm:$0xff]  }
 0x7b6   :  { %6293 = vmatprep.subr.bf16.mxu0 %v7436_v17  ;;  %6334 = vmatprep.subr.bf16.mxu1 %v7438_v20  ;;  %v5929_v17 = vld [vmem:[%s10627_s1 + $0xc70] sm:$0xff]  ;;  %v8094_v1 = vld [vmem:[%s10629_s3 + $0x7f8] sm:$0xff]   ;;  %v8103_v11 = vld [vmem:[%s10629_s3 + $0x728] sm:$0xff]  }
 0x7b7   :  { %v5931_v20 = vld [vmem:[%s10627_s1 + $0xcf0] sm:$0xff]  ;;  %v8095_v2 = vld [vmem:[%s10629_s3 + $0x738] sm:$0xff]   ;;  %v8104_v12 = vld [vmem:[%s10629_s3 + $0x7a8] sm:$0xff]  }
 0x7b8   :  { %v7467_v30 = vcombine.low %v5929_v17, %v5931_v20  ;;  %v8096_v4 = vld [vmem:[%s10629_s3 + $0x7b8] sm:$0xff]  }
 0x7b9   :  { %6294 = vmatpush1.bf16.msra.mxu0 %v7435_v45  ;;  %6335 = vmatpush1.bf16.msra.mxu1 %v7437_v25  ;;  %v7468_v45 = vcombine.high %v5929_v17, %v5931_v20  ;;  %v7470_v25 = vcombine.high %v5930_v21, %v5932_v22  ;;  %v8110_v17 = vld [vmem:[%s10629_s3 + $0x7d8] sm:$0xff]   ;;  %v8113_v22 = vld [vmem:[%s10629_s3 + $0x750] sm:$0xff]  }
 0x7ba   :  { %6295 = vmatprep.subr.bf16.mxu0 %v7432_v26  ;;  %6336 = vmatprep.subr.bf16.mxu1 %v7434_v27  ;;  %v5925_v26 = vld [vmem:[%s10627_s1 + $0xb70] sm:$0xff]  ;;  %v8111_v20 = vld [vmem:[%s10629_s3 + $0x718] sm:$0xff]  }
 0x7bb   :  { %v5927_v27 = vld [vmem:[%s10627_s1 + $0xbf0] sm:$0xff]  ;;  %v8112_v21 = vld [vmem:[%s10629_s3 + $0x798] sm:$0xff]  }
 0x7bc   :  { %v7463_v40 = vcombine.low %v5925_v26, %v5927_v27 }
 0x7bd   :  { %6296 = vmatpush1.bf16.msra.mxu0 %v7431_v33  ;;  %6337 = vmatpush1.bf16.msra.mxu1 %v7433_v34  ;;  %v7464_v33 = vcombine.high %v5925_v26, %v5927_v27  ;;  %v7466_v34 = vcombine.high %v5926_v28, %v5928_v29  ;;  %v8118_v26 = vld [vmem:[%s10629_s3 + $0x7c8] sm:$0xff]   ;;  %v8121_v29 = vld [vmem:[%s10629_s3 + $0x740] sm:$0xff]  }
 0x7be   :  { %6297 = vmatprep.subr.bf16.mxu0 %v7428_v35  ;;  %6338 = vmatprep.subr.bf16.mxu1 %v7430_v36  ;;  %v5921_v35 = vld [vmem:[%s10627_s1 + $0xa70] sm:$0xff]  ;;  %v8119_v27 = vld [vmem:[%s10629_s3 + $0x708] sm:$0xff]  }
 0x7bf   :  { %v5923_v36 = vld [vmem:[%s10627_s1 + $0xaf0] sm:$0xff]  ;;  %v8120_v28 = vld [vmem:[%s10629_s3 + $0x788] sm:$0xff]  }
 0x7c0   :  { %v7459_v48 = vcombine.low %v5921_v35, %v5923_v36 }
 0x7c1   :  { %6298 = vmatpush1.bf16.msra.mxu0 %v7427_v42  ;;  %6339 = vmatpush1.bf16.msra.mxu1 %v7429_v43  ;;  %v7460_v42 = vcombine.high %v5921_v35, %v5923_v36  ;;  %v7462_v43 = vcombine.high %v5922_v37, %v5924_v39 }
 0x7c2   :  { %6299 = vmatprep.subr.bf16.mxu0 %v7424_v3  ;;  %6340 = vmatprep.subr.bf16.mxu1 %v7426_v44  ;;  %v5917_v3 = vld [vmem:[%s10627_s1 + $0x970] sm:$0xff] }
 0x7c3   :  { %v5919_v44 = vld [vmem:[%s10627_s1 + $0x9f0] sm:$0xff] }
 0x7c4   :  { %v7455_v55 = vcombine.low %v5917_v3, %v5919_v44 }
 0x7c5   :  { %6300 = vmatpush1.bf16.msra.mxu0 %v7423_v50  ;;  %6341 = vmatpush1.bf16.msra.mxu1 %v7425_v10  ;;  %v7456_v50 = vcombine.high %v5917_v3, %v5919_v44  ;;  %v7458_v10 = vcombine.high %v5918_v46, %v5920_v47  ;;  %v5945_v47 = vld [vmem:[%s10628_s2 + $0x1c] sm:$0xf] }
 0x7c6   :  { %6301 = vmatprep.subr.bf16.mxu0 %v7420_v51  ;;  %6342 = vmatprep.subr.bf16.mxu1 %v7422_v52  ;;  %v5913_v51 = vld [vmem:[%s10627_s1 + $0x870] sm:$0xff] }
 0x7c7   :  { %v5915_v52 = vld [vmem:[%s10627_s1 + $0x8f0] sm:$0xff] }
 0x7c9   :  { %6302 = vmatpush1.bf16.msra.mxu0 %v7419_v15  ;;  %6343 = vmatpush1.bf16.msra.mxu1 %v7421_v61  ;;  %v7452_v15 = vcombine.high %v5913_v51, %v5915_v52  ;;  %v7454_v61 = vcombine.high %v5914_v53, %v5916_v54 }
 0x7ca   :  { %6303 = vmatprep.subr.bf16.mxu0 %v7480_v62  ;;  %6344 = vmatprep.subr.bf16.mxu1 %v7482_v63  ;;  %v7451_v62 = vcombine.low %v5913_v51, %v5915_v52  ;;  %v7453_v63 = vcombine.low %v5914_v53, %v5916_v54 }
 0x7cd   :  { %6304 = vmatpush2.bf16.msra.mxu0 %v7479_v5  ;;  %6345 = vmatpush2.bf16.msra.mxu1 %v7481_v6  ;;  %v8098_v5 = vld [vmem:[%s10629_s3 + $0x7f0] sm:$0xff]  }
 0x7ce   :  { %6305 = vmatprep.subr.bf16.mxu0 %v7476_v7  ;;  %6346 = vmatprep.subr.bf16.mxu1 %v7478_v8  ;;  %v8099_v6 = vld [vmem:[%s10629_s3 + $0x730] sm:$0xff]   ;;  %v8101_v8 = vld [vmem:[%s10629_s3 + $0x768] sm:$0xff]  }
 0x7cf   :  { %v8100_v7 = vld [vmem:[%s10629_s3 + $0x7b0] sm:$0xff]  }
 0x7d1   :  { %6306 = vmatpush2.bf16.msra.mxu0 %v7475_v14  ;;  %6347 = vmatpush2.bf16.msra.mxu1 %v7477_v19  ;;  %v8106_v14 = vld [vmem:[%s10629_s3 + $0x7e0] sm:$0xff]  }
 0x7d2   :  { %6307 = vmatprep.subr.bf16.mxu0 %v7472_v16  ;;  %6348 = vmatprep.subr.bf16.mxu1 %v7474_v38  ;;  %v8107_v19 = vld [vmem:[%s10629_s3 + $0x720] sm:$0xff]   ;;  %v8109_v38 = vld [vmem:[%s10629_s3 + $0x758] sm:$0xff]  }
 0x7d3   :  { %v8108_v16 = vld [vmem:[%s10629_s3 + $0x7a0] sm:$0xff]  }
 0x7d5   :  { %6308 = vmatpush2.bf16.msra.mxu0 %v7471_v23  ;;  %6349 = vmatpush2.bf16.msra.mxu1 %v7473_v24  ;;  %v8114_v23 = vld [vmem:[%s10629_s3 + $0x7d0] sm:$0xff]  }
 0x7d6   :  { %6309 = vmatprep.subr.bf16.mxu0 %v7468_v45  ;;  %6350 = vmatprep.subr.bf16.mxu1 %v7470_v25  ;;  %v8115_v24 = vld [vmem:[%s10629_s3 + $0x710] sm:$0xff]   ;;  %v8117_v25 = vld [vmem:[%s10629_s3 + $0x748] sm:$0xff]  }
 0x7d7   :  { %v8116_v45 = vld [vmem:[%s10629_s3 + $0x790] sm:$0xff]  }
 0x7d9   :  { %6310 = vmatpush2.bf16.msra.mxu0 %v7467_v30  ;;  %6351 = vmatpush2.bf16.msra.mxu1 %v7469_v32  ;;  %v8122_v30 = vld [vmem:[%s10629_s3 + $0x7c0] sm:$0xff]  }
 0x7da   :  { %6311 = vmatprep.subr.bf16.mxu0 %v7464_v33  ;;  %6352 = vmatprep.subr.bf16.mxu1 %v7466_v34  ;;  %v8123_v32 = vld [vmem:[%s10629_s3 + $0x700] sm:$0xff]  }
 0x7db   :  { %v8124_v33 = vld [vmem:[%s10629_s3 + $0x780] sm:$0xff]  }
 0x7dd   :  { %6312 = vmatpush2.bf16.msra.mxu0 %v7463_v40  ;;  %6353 = vmatpush2.bf16.msra.mxu1 %v7465_v41 }
 0x7de   :  { %6313 = vmatprep.subr.bf16.mxu0 %v7460_v42  ;;  %6354 = vmatprep.subr.bf16.mxu1 %v7462_v43 }
 0x7e1   :  { %6314 = vmatpush2.bf16.msra.mxu0 %v7459_v48  ;;  %6355 = vmatpush2.bf16.msra.mxu1 %v7461_v49  ;;  %v5950_v48 = vrot.slane %v5945_v47, %v8506_v56  ;;  %v5958_v49 = vrot.slane %v5945_v47, %v8508_v57 }
 0x7e2   :  { %6315 = vmatprep.subr.bf16.mxu0 %v7456_v50  ;;  %6356 = vmatprep.subr.bf16.mxu1 %v7458_v10  ;;  %v5954_v50 = vrot.slane %v5945_v47, %v8513_v59  ;;  %v5962_v10 = vrot.slane %v5945_v47, %v8515_v60 }
 0x7e5   :  { %6316 = vmatpush2.bf16.msra.mxu0 %v7455_v55  ;;  %6357 = vmatpush2.bf16.msra.mxu1 %v7457_v58 }
 0x7e6   :  { %6317 = vmatprep.subr.bf16.mxu0 %v7452_v15  ;;  %6358 = vmatprep.subr.bf16.mxu1 %v7454_v61 }
 0x7e9   :  { %6318 = vmatpush2.bf16.msra.mxu0 %v7451_v62  ;;  %6359 = vmatpush2.bf16.msra.mxu1 %v7453_v63 }
 0x7ea   :  { %7824 = vmatprep.subr.bf16.mxu0 %v8093_v0  ;;  %7846 = vmatprep.subr.bf16.mxu1 %v8094_v1 }
 0x7ec   :  { %6320 = vmatmul.mubr.bf16.vlgmr.msra.gmra.mxu0 %v8408_v18  ;;  %6361 = vmatmul.mubr.bf16.vlgmr.msra.gmra.mxu1 %v8408_v18  ;;  %v8097_v18 = vld [vmem:[%s10629_s3 + $0x770] sm:$0xff]  }
 0x7ed   :  { %7825 = vmatpush3.bf16.msra.mxu0 %v8095_v2  ;;  %7847 = vmatpush3.bf16.msra.mxu1 %v8096_v4 }
 0x7ee   :  { %7826 = vmatprep.subr.bf16.mxu0 %v8097_v18  ;;  %7848 = vmatprep.subr.bf16.mxu1 %v8098_v5 }
 0x7f1   :  { %7827 = vmatpush3.bf16.msra.mxu0 %v8099_v6  ;;  %7849 = vmatpush3.bf16.msra.mxu1 %v8100_v7 }
 0x7f2   :  { %7828 = vmatprep.subr.bf16.mxu0 %v8101_v8  ;;  %7850 = vmatprep.subr.bf16.mxu1 %v8102_v9 }
 0x7f5   :  { %7829 = vmatpush3.bf16.msra.mxu0 %v8103_v11  ;;  %7851 = vmatpush3.bf16.msra.mxu1 %v8104_v12 }
 0x7f6   :  { %7830 = vmatprep.subr.bf16.mxu0 %v8105_v13  ;;  %7852 = vmatprep.subr.bf16.mxu1 %v8106_v14 }
 0x7f9   :  { %7831 = vmatpush3.bf16.msra.mxu0 %v8107_v19  ;;  %7853 = vmatpush3.bf16.msra.mxu1 %v8108_v16  ;;  %v7515_v19 = vld [vmem:[%s10630_s4] ss:$0 sm:$0xff] }
 0x7fa   :  { %7832 = vmatprep.subr.bf16.mxu0 %v8109_v38  ;;  %7854 = vmatprep.subr.bf16.mxu1 %v8110_v17 }
 0x7fd   :  { %7833 = vmatpush3.bf16.msra.mxu0 %v8111_v20  ;;  %7855 = vmatpush3.bf16.msra.mxu1 %v8112_v21 }
 0x7fe   :  { %7834 = vmatprep.subr.bf16.mxu0 %v8113_v22  ;;  %7856 = vmatprep.subr.bf16.mxu1 %v8114_v23 }
 0x801   :  { %7835 = vmatpush3.bf16.msra.mxu0 %v8115_v24  ;;  %7857 = vmatpush3.bf16.msra.mxu1 %v8116_v45 }
 0x802   :  { %7836 = vmatprep.subr.bf16.mxu0 %v8117_v25  ;;  %7858 = vmatprep.subr.bf16.mxu1 %v8118_v26 }
 0x805   :  { %7837 = vmatpush3.bf16.msra.mxu0 %v8119_v27  ;;  %7859 = vmatpush3.bf16.msra.mxu1 %v8120_v28 }
 0x806   :  { %7838 = vmatprep.subr.bf16.mxu0 %v8121_v29  ;;  %7860 = vmatprep.subr.bf16.mxu1 %v8122_v30 }
 0x809   :  { %7839 = vmatpush3.bf16.msra.mxu0 %v8123_v32  ;;  %7861 = vmatpush3.bf16.msra.mxu1 %v8124_v33 }
 0x86c   :  { %v7796_v34 = vpop.f32.mrf.mxu0  ;;  %v7818_v35 = vpop.f32.mrf.mxu1 }
 0x86e   :  { %v7797_v36 = vpop.f32.mrf.mxu0  ;;  %v7819_v37 = vpop.f32.mrf.mxu1 }
 0x86f   :  { %v7798_v39 = vadd.f32 %v7797_v36, %v7796_v34  ;;  %v7820_v40 = vadd.f32 %v7819_v37, %v7818_v35 }
 0x870   :  { %v7799_v41 = vpop.f32.mrf.mxu0  ;;  %v7821_v42 = vpop.f32.mrf.mxu1 }
 0x871   :  { %v5874_v43 = vadd.f32 %v7820_v40, %v7798_v39 }
 0x872   :  { %v7800_v3 = vpop.f32.mrf.mxu0  ;;  %v7822_v44 = vpop.f32.mrf.mxu1 }
 0x873   :  { %v5879_v46 = vadd.f32 %v5874_v43, %v10323_v31 }
 0x8ac   :  { %v6321_v51 = vpop.f32.mrf.mxu0  ;;  %v6362_v52 = vpop.f32.mrf.mxu1 }
 0x8ad   :  { %v6322_v53 = vadd.f32 %v6321_v51, %v5950_v48  ;;  %v6363_v54 = vadd.f32 %v6362_v52, %v5958_v49 }
 0x8ae   :  { %v6323_v55 = vpop.f32.mrf.mxu0  ;;  %v6364_v58 = vpop.f32.mrf.mxu1 }
 0x8af   :  { %v6324_v15 = vadd.f32 %v6323_v55, %v5954_v50  ;;  %v6365_v31 = vadd.f32 %v6364_v58, %v5962_v10  ;;  %v6369_v61 = vmax.f32 %v6322_v53, 0.0  ;;  %v6371_v62 = vmax.f32 %v6363_v54, 0.0 }
 0x8b0   :  { %v6325_v63 = vpop.f32.mrf.mxu0  ;;  %v6366_v0 = vpop.f32.mrf.mxu1 }
 0x8b1   :  { %v6370_v1 = vmax.f32 %v6324_v15, 0.0  ;;  %v6372_v56 = vmax.f32 %v6365_v31, 0.0  ;;  %v6374_v18 = vpack.c.bf16 %v6369_v61, %v6369_v61  ;;  %v6376_v60 = vpack.c.bf16 %v6371_v62, %v6371_v62 }
 0x8b2   :  { %v6326_v2 = vpop.f32.mrf.mxu0  ;;  %v6367_v57 = vpop.f32.mrf.mxu1 }
 0x8b3   :  { %v6375_v4 = vpack.c.bf16 %v6370_v1, %v6370_v1  ;;  %v6377_v59 = vpack.c.bf16 %v6372_v56, %v6372_v56 }
 0x8b5   :  { %6666 = vmatprep.mubr.bf16.mxu0 %v6375_v4  ;;  %6706 = vmatprep.mubr.bf16.mxu1 %v6377_v59 }
 0x8b6   :  { %6667 = vmatmul.mubr.bf16.vlgmr.msra.gmra.mxu0 %v6374_v18  ;;  %6707 = vmatmul.mubr.bf16.vlgmr.msra.gmra.mxu1 %v6376_v60 }
 0x976   :  { %v7840_v5 = vpop.f32.mrf.mxu0  ;;  %v7862_v6 = vpop.f32.mrf.mxu1 }
 0x978   :  { %v7841_v7 = vpop.f32.mrf.mxu0  ;;  %v7863_v8 = vpop.f32.mrf.mxu1 }
 0x979   :  { %v7842_v9 = vadd.f32 %v7841_v7, %v7840_v5  ;;  %v7864_v11 = vadd.f32 %v7863_v8, %v7862_v6 }
 0x97a   :  { %v7843_v12 = vpop.f32.mrf.mxu0  ;;  %v7865_v13 = vpop.f32.mrf.mxu1 }
 0x97b   :  { %v6709_v14 = vadd.f32 %v7864_v11, %v7842_v9 }
 0x97c   :  { %v7844_v16 = vpop.f32.mrf.mxu0  ;;  %v7866_v38 = vpop.f32.mrf.mxu1 }
 0x97d   :  { %v6714_v17 = vadd.f32 %v6709_v14, %v5879_v46 }
 0x97f   :  { %v6724_v20 = vadd.f32 %v7515_v19, %v6714_v17 }
 0x981   :  { %8127 = vtanh.f32 %v6724_v20 }
 0x98e   :  { %v8128_v21 = vpop.eup %8127 }
 0x98f   :  { %v6726_v22 = vmul.f32 %v8128_v21, %v8128_v21 }
 0x991   :  { %6727 = vadd.xlane.f32.xlu0 %v6726_v22 }
 0xa1a   :  { %v6728_v23 = vpop.xlane.xlu0 %6727 }
 0xa1b   :  { %v6729_v24 = vmax.f32 %v6728_v23, 1e-24 }
 0xa1d   :  { %8129 = vrsqrt.f32 %v6729_v24 }
 0xa2a   :  { %v8130_v45 = vpop.eup %8129 }
 0xa2b   :  { %v6731_v25 = vmul.f32 %v8130_v45, %v8128_v21 }
 0xa2d   :  { %6732 = vst [vmem:[#allocation3] sm:$0xff] %v6731_v25 }
 0xa2e   :  { %8144 = shalt.err (!%p8141_p4)
}
 0xa2f   :  { %6742 = dma.vmem_to_hbm [thread:$0]  %s6740_s21, 128, %s10631_s5, [#allocation4]  }
 0xa30   :  { %8153 = dma.done.wait [#allocation4], 128  }
 0xa31   :  { %8154 = vsyncadd [#allocation4], 4294967168 }
 0xa32   :  { %6746 = vsyncpa [#allocation4], 1 }

</bundles_post_ra>
